<compile_context>
chip_gen: v5e
topology: v5e:2x2
jax: 0.10.0
libtpu: 0.0.40
codegen_flags: <defaults>
</compile_context>

<pallas_src>
import jax
import jax.numpy as jnp
from jax import lax
from jax.experimental import pallas as pl
from jax.experimental.pallas import tpu as pltpu


def _make_kernel(C, S, D, H, W, eps):
    """Fused res_block kernel operating on (C, S) slabs, S = B*D*H*W (lane axis)."""
    HW = H * W
    taps = [(kd, kh, kw) for kd in range(3) for kh in range(3) for kw in range(3)]
    # flat-index offset of the source voxel for each tap (same batch element when valid)
    offsets = [(kd - 1) * HW + (kh - 1) * W + (kw - 1) for kd, kh, kw in taps]

    def kernel(x_ref, mask_ref,
               w1_ref, b1_ref, g1_ref, be1_ref,
               w2_ref, b2_ref, g2_ref, be2_ref,
               o_ref, patch_ref):

        def build_patches(src):
            # im2col in (C, S) layout: each tap is a static lane shift; the precomputed
            # mask zeroes wrapped / out-of-bounds lanes (== Conv3d zero padding).
            for t, off in enumerate(offsets):
                shifted = src if off == 0 else jnp.roll(src, shift=-off, axis=1)
                m = mask_ref[t:t + 1, :]                        # (1, S)
                patch_ref[t * C:(t + 1) * C, :] = shifted * m   # (C, S) block write

        def conv(w_ref, b_ref):
            # single MXU contraction, K = 27*C, N = S (lane-dense)
            return jnp.dot(w_ref[...], patch_ref[...],
                           preferred_element_type=jnp.float32) + b_ref[...]

        def bn(y, g_ref, be_ref):
            # training-mode BatchNorm3d: biased batch stats over (N, D, H, W) per channel
            mean = jnp.mean(y, axis=1, keepdims=True)
            cen = y - mean
            var = jnp.mean(cen * cen, axis=1, keepdims=True)
            return cen * lax.rsqrt(var + eps) * g_ref[...] + be_ref[...]

        x = x_ref[...]                                           # (C, S)

        build_patches(x)                                         # patches for conv1
        y1 = jnp.maximum(bn(conv(w1_ref, b1_ref), g1_ref, be1_ref), 0.0)

        build_patches(y1)                                        # patches for conv2 (scratch reused)
        y2 = bn(conv(w2_ref, b2_ref), g2_ref, be2_ref)

        o_ref[...] = (x + y2).astype(o_ref.dtype)                # residual add

    return kernel


def res_block_forward(x, w1, b1, g1, be1, w2, b2, g2, be2, *, eps=1e-5):
    """x: (B, C, D, H, W) f32. Returns (B, C, D, H, W) f32 (training-mode BN semantics)."""
    B, C, D, H, W = x.shape
    Cout = w1.shape[0]
    assert Cout == C and w2.shape[0] == C and w2.shape[1] == C, \
        "res_block requires input_channels == output_channels"
    S = B * D * H * W
    K = 27 * C

    # (B, C, D, H, W) -> channels-major, spatial-flat (C, S); S is the lane axis everywhere.
    x_cs = jnp.transpose(x, (1, 0, 2, 3, 4)).reshape(C, S)

    # conv weights (Cout, Cin, 3,3,3) -> (Cout, 27*Cin), tap-major / channel-minor K axis
    def pack_w(w):
        return jnp.transpose(w, (0, 2, 3, 4, 1)).reshape(Cout, K)

    w1k, w2k = pack_w(w1), pack_w(w2)
    col = lambda v: v.reshape(C, 1)

    # zero-padding validity mask per tap (27, S), precomputed once in the wrapper
    idx = jnp.arange(S)
    d = (idx // (H * W)) % D
    h = (idx // W) % H
    w_ = idx % W
    masks = []
    for kd in range(3):
        for kh in range(3):
            for kw in range(3):
                dd, hh, ww = d + kd - 1, h + kh - 1, w_ + kw - 1
                masks.append((dd >= 0) & (dd < D) & (hh >= 0) & (hh < H)
                             & (ww >= 0) & (ww < W))
    mask = jnp.stack(masks).astype(jnp.float32)                  # (27, S)

    kernel = _make_kernel(C, S, D, H, W, float(eps))

    # cost estimate + explicit VMEM budget (double-buffered in/out + scratch + headroom)
    flops = 2 * 2 * S * C * K                    # two convs
    buf_bytes = 4 * (x_cs.size + mask.size + w1k.size + w2k.size + 6 * C + C * S)
    scratch_bytes = 4 * K * S
    vmem_limit = int(2 * buf_bytes + scratch_bytes + (16 << 20))

    out = pl.pallas_call(
        kernel,
        out_shape=jax.ShapeDtypeStruct((C, S), jnp.float32),
        grid_spec=pltpu.PrefetchScalarGridSpec(
            num_scalar_prefetch=0,
            grid=(1,),
            in_specs=[
                pl.BlockSpec((C, S), lambda i: (0, 0)),          # x (C, S)
                pl.BlockSpec((27, S), lambda i: (0, 0)),         # zero-pad masks
                pl.BlockSpec((Cout, K), lambda i: (0, 0)),       # w1
                pl.BlockSpec((Cout, 1), lambda i: (0, 0)),       # b1
                pl.BlockSpec((Cout, 1), lambda i: (0, 0)),       # gamma1
                pl.BlockSpec((Cout, 1), lambda i: (0, 0)),       # beta1
                pl.BlockSpec((Cout, K), lambda i: (0, 0)),       # w2
                pl.BlockSpec((Cout, 1), lambda i: (0, 0)),       # b2
                pl.BlockSpec((Cout, 1), lambda i: (0, 0)),       # gamma2
                pl.BlockSpec((Cout, 1), lambda i: (0, 0)),       # beta2
            ],
            out_specs=pl.BlockSpec((C, S), lambda i: (0, 0)),
            scratch_shapes=[pltpu.VMEM((K, S), jnp.float32)],    # shared im2col scratch
        ),
        compiler_params=pltpu.CompilerParams(
            dimension_semantics=("parallel",),
            vmem_limit_bytes=vmem_limit,
        ),
        cost_estimate=pl.CostEstimate(flops=flops, transcendentals=2 * C,
                                      bytes_accessed=buf_bytes),
    )(x_cs, mask, w1k, col(b1), col(g1), col(be1), w2k, col(b2), col(g2), col(be2))

    return jnp.transpose(out.reshape(C, B, D, H, W), (1, 0, 2, 3, 4))


def reference(x, w1, b1, g1, be1, w2, b2, g2, be2, *, eps=1e-5):
    """Pure-JAX reference mirroring PyTorch res_block (training-mode BatchNorm)."""
    def conv(y, w, b):
        return lax.conv_general_dilated(
            y, w, window_strides=(1, 1, 1), padding=((1, 1), (1, 1), (1, 1)),
            dimension_numbers=("NCDHW", "OIDHW", "NCDHW"),
        ) + b[None, :, None, None, None]

    def bn(y, g, be):
        mean = jnp.mean(y, axis=(0, 2, 3, 4), keepdims=True)
        var = jnp.mean((y - mean) ** 2, axis=(0, 2, 3, 4), keepdims=True)
        return (y - mean) * lax.rsqrt(var + eps) * g[None, :, None, None, None] \
            + be[None, :, None, None, None]

    y = jnp.maximum(bn(conv(x, w1, b1), g1, be1), 0.0)
    y = bn(conv(y, w2, b2), g2, be2)
    return x + y


if __name__ == "__main__":
    key = jax.random.PRNGKey(0)
    ks = jax.random.split(key, 9)

    # res_block only type-checks with input_channels == output_channels (conv2 & residual)
    B, C, D, H, W = 2, 8, 8, 8, 8

    x = jax.random.normal(ks[0], (B, C, D, H, W), jnp.float32)
    w1 = jax.random.normal(ks[1], (C, C, 3, 3, 3), jnp.float32) * 0.1
    b1 = jax.random.normal(ks[2], (C,), jnp.float32) * 0.1
    g1 = 1.0 + 0.1 * jax.random.normal(ks[3], (C,), jnp.float32)
    be1 = jax.random.normal(ks[4], (C,), jnp.float32) * 0.1
    w2 = jax.random.normal(ks[5], (C, C, 3, 3, 3), jnp.float32) * 0.1
    b2 = jax.random.normal(ks[6], (C,), jnp.float32) * 0.1
    g2 = 1.0 + 0.1 * jax.random.normal(ks[7], (C,), jnp.float32)
    be2 = jax.random.normal(ks[8], (C,), jnp.float32) * 0.1

    fwd = jax.jit(res_block_forward)
    out = jax.block_until_ready(fwd(x, w1, b1, g1, be1, w2, b2, g2, be2))
    ref = jax.block_until_ready(reference(x, w1, b1, g1, be1, w2, b2, g2, be2))

    assert out.shape == (B, C, D, H, W), out.shape
    err = float(jnp.max(jnp.abs(out - ref)))
    if not err < 1e-3:
        raise AssertionError(f"kernel/reference mismatch, max abs err = {err}")
    print("KERNEL_OK")
</pallas_src>

<mosaic_0001>
module attributes {stable_mosaic.version = 11 : i64} {
  func.func @kernel(%arg0: i32, %arg1: memref<8x1024xf32, #tpu.memory_space<vmem>>, %arg2: memref<27x1024xf32, #tpu.memory_space<vmem>>, %arg3: memref<8x216xf32, #tpu.memory_space<vmem>>, %arg4: memref<8x1xf32, #tpu.memory_space<vmem>>, %arg5: memref<8x1xf32, #tpu.memory_space<vmem>>, %arg6: memref<8x1xf32, #tpu.memory_space<vmem>>, %arg7: memref<8x216xf32, #tpu.memory_space<vmem>>, %arg8: memref<8x1xf32, #tpu.memory_space<vmem>>, %arg9: memref<8x1xf32, #tpu.memory_space<vmem>>, %arg10: memref<8x1xf32, #tpu.memory_space<vmem>>, %arg11: memref<8x1024xf32, #tpu.memory_space<vmem>>, %arg12: memref<216x1024xf32, #tpu.memory_space<vmem>>) attributes {dimension_semantics = [#tpu.dimension_semantics<parallel>], iteration_bounds = array<i64: 1>, scalar_prefetch = 0 : i64, scratch_operands = 1 : i64, tpu.core_type = #tpu.core_type<tc>, window_params = [{pipeline_mode = #tpu.pipeline_mode<synchronous>, transform_indices = @transform_0, window_bounds = array<i64: 8, 1024>}, {pipeline_mode = #tpu.pipeline_mode<synchronous>, transform_indices = @transform_1, window_bounds = array<i64: 27, 1024>}, {pipeline_mode = #tpu.pipeline_mode<synchronous>, transform_indices = @transform_2, window_bounds = array<i64: 8, 216>}, {pipeline_mode = #tpu.pipeline_mode<synchronous>, transform_indices = @transform_3, window_bounds = array<i64: 8, 1>}, {pipeline_mode = #tpu.pipeline_mode<synchronous>, transform_indices = @transform_4, window_bounds = array<i64: 8, 1>}, {pipeline_mode = #tpu.pipeline_mode<synchronous>, transform_indices = @transform_5, window_bounds = array<i64: 8, 1>}, {pipeline_mode = #tpu.pipeline_mode<synchronous>, transform_indices = @transform_6, window_bounds = array<i64: 8, 216>}, {pipeline_mode = #tpu.pipeline_mode<synchronous>, transform_indices = @transform_7, window_bounds = array<i64: 8, 1>}, {pipeline_mode = #tpu.pipeline_mode<synchronous>, transform_indices = @transform_8, window_bounds = array<i64: 8, 1>}, {pipeline_mode = #tpu.pipeline_mode<synchronous>, transform_indices = @transform_9, window_bounds = array<i64: 8, 1>}, {pipeline_mode = #tpu.pipeline_mode<synchronous>, transform_indices = @transform_10, window_bounds = array<i64: 8, 1024>}]} {
    %c0 = arith.constant 0 : index
    %c0_0 = arith.constant 0 : index
    %0 = vector.load %arg1[%c0, %c0_0] : memref<8x1024xf32, #tpu.memory_space<vmem>>, vector<8x1024xf32>
    %1 = vector.extract_strided_slice %0 {offsets = [0, 951], sizes = [8, 73], strides = [1, 1]} : vector<8x1024xf32> to vector<8x73xf32>
    %2 = vector.extract_strided_slice %0 {offsets = [0, 0], sizes = [8, 951], strides = [1, 1]} : vector<8x1024xf32> to vector<8x951xf32>
    %3 = tpu.concatenate %1, %2 in 1 : vector<8x73xf32>, vector<8x951xf32> -> vector<8x1024xf32>
    %c0_1 = arith.constant 0 : index
    %c0_2 = arith.constant 0 : index
    %4 = vector.load %arg2[%c0_1, %c0_2] : memref<27x1024xf32, #tpu.memory_space<vmem>>, vector<1x1024xf32>
    %5 = vector.broadcast %4 : vector<1x1024xf32> to vector<8x1024xf32>
    %6 = arith.mulf %3, %5 : vector<8x1024xf32>
    %c0_3 = arith.constant 0 : index
    %c0_4 = arith.constant 0 : index
    %7 = vector.load %arg12[%c0_3, %c0_4] : memref<216x1024xf32, #tpu.memory_space<vmem>>, vector<8x1024xf32>
    tpu.vector_store %arg12[%c0_3, %c0_4], %6 {strides = array<i32>} : memref<216x1024xf32, #tpu.memory_space<vmem>>, vector<8x1024xf32>,
    %8 = vector.extract_strided_slice %0 {offsets = [0, 952], sizes = [8, 72], strides = [1, 1]} : vector<8x1024xf32> to vector<8x72xf32>
    %9 = vector.extract_strided_slice %0 {offsets = [0, 0], sizes = [8, 952], strides = [1, 1]} : vector<8x1024xf32> to vector<8x952xf32>
    %10 = tpu.concatenate %8, %9 in 1 : vector<8x72xf32>, vector<8x952xf32> -> vector<8x1024xf32>
    %c1 = arith.constant 1 : index
    %c0_5 = arith.constant 0 : index
    %11 = vector.load %arg2[%c1, %c0_5] : memref<27x1024xf32, #tpu.memory_space<vmem>>, vector<1x1024xf32>
    %12 = vector.broadcast %11 : vector<1x1024xf32> to vector<8x1024xf32>
    %13 = arith.mulf %10, %12 : vector<8x1024xf32>
    %c8 = arith.constant 8 : index
    %c0_6 = arith.constant 0 : index
    %14 = vector.load %arg12[%c8, %c0_6] : memref<216x1024xf32, #tpu.memory_space<vmem>>, vector<8x1024xf32>
    tpu.vector_store %arg12[%c8, %c0_6], %13 {strides = array<i32>} : memref<216x1024xf32, #tpu.memory_space<vmem>>, vector<8x1024xf32>,
    %15 = vector.extract_strided_slice %0 {offsets = [0, 953], sizes = [8, 71], strides = [1, 1]} : vector<8x1024xf32> to vector<8x71xf32>
    %16 = vector.extract_strided_slice %0 {offsets = [0, 0], sizes = [8, 953], strides = [1, 1]} : vector<8x1024xf32> to vector<8x953xf32>
    %17 = tpu.concatenate %15, %16 in 1 : vector<8x71xf32>, vector<8x953xf32> -> vector<8x1024xf32>
    %c2 = arith.constant 2 : index
    %c0_7 = arith.constant 0 : index
    %18 = vector.load %arg2[%c2, %c0_7] : memref<27x1024xf32, #tpu.memory_space<vmem>>, vector<1x1024xf32>
    %19 = vector.broadcast %18 : vector<1x1024xf32> to vector<8x1024xf32>
    %20 = arith.mulf %17, %19 : vector<8x1024xf32>
    %c16 = arith.constant 16 : index
    %c0_8 = arith.constant 0 : index
    %21 = vector.load %arg12[%c16, %c0_8] : memref<216x1024xf32, #tpu.memory_space<vmem>>, vector<8x1024xf32>
    tpu.vector_store %arg12[%c16, %c0_8], %20 {strides = array<i32>} : memref<216x1024xf32, #tpu.memory_space<vmem>>, vector<8x1024xf32>,
    %22 = vector.extract_strided_slice %0 {offsets = [0, 959], sizes = [8, 65], strides = [1, 1]} : vector<8x1024xf32> to vector<8x65xf32>
    %23 = vector.extract_strided_slice %0 {offsets = [0, 0], sizes = [8, 959], strides = [1, 1]} : vector<8x1024xf32> to vector<8x959xf32>
    %24 = tpu.concatenate %22, %23 in 1 : vector<8x65xf32>, vector<8x959xf32> -> vector<8x1024xf32>
    %c3 = arith.constant 3 : index
    %c0_9 = arith.constant 0 : index
    %25 = vector.load %arg2[%c3, %c0_9] : memref<27x1024xf32, #tpu.memory_space<vmem>>, vector<1x1024xf32>
    %26 = vector.broadcast %25 : vector<1x1024xf32> to vector<8x1024xf32>
    %27 = arith.mulf %24, %26 : vector<8x1024xf32>
    %c24 = arith.constant 24 : index
    %c0_10 = arith.constant 0 : index
    %28 = vector.load %arg12[%c24, %c0_10] : memref<216x1024xf32, #tpu.memory_space<vmem>>, vector<8x1024xf32>
    tpu.vector_store %arg12[%c24, %c0_10], %27 {strides = array<i32>} : memref<216x1024xf32, #tpu.memory_space<vmem>>, vector<8x1024xf32>,
    %29 = vector.extract_strided_slice %0 {offsets = [0, 960], sizes = [8, 64], strides = [1, 1]} : vector<8x1024xf32> to vector<8x64xf32>
    %30 = vector.extract_strided_slice %0 {offsets = [0, 0], sizes = [8, 960], strides = [1, 1]} : vector<8x1024xf32> to vector<8x960xf32>
    %31 = tpu.concatenate %29, %30 in 1 : vector<8x64xf32>, vector<8x960xf32> -> vector<8x1024xf32>
    %c4 = arith.constant 4 : index
    %c0_11 = arith.constant 0 : index
    %32 = vector.load %arg2[%c4, %c0_11] : memref<27x1024xf32, #tpu.memory_space<vmem>>, vector<1x1024xf32>
    %33 = vector.broadcast %32 : vector<1x1024xf32> to vector<8x1024xf32>
    %34 = arith.mulf %31, %33 : vector<8x1024xf32>
    %c32 = arith.constant 32 : index
    %c0_12 = arith.constant 0 : index
    %35 = vector.load %arg12[%c32, %c0_12] : memref<216x1024xf32, #tpu.memory_space<vmem>>, vector<8x1024xf32>
    tpu.vector_store %arg12[%c32, %c0_12], %34 {strides = array<i32>} : memref<216x1024xf32, #tpu.memory_space<vmem>>, vector<8x1024xf32>,
    %36 = vector.extract_strided_slice %0 {offsets = [0, 961], sizes = [8, 63], strides = [1, 1]} : vector<8x1024xf32> to vector<8x63xf32>
    %37 = vector.extract_strided_slice %0 {offsets = [0, 0], sizes = [8, 961], strides = [1, 1]} : vector<8x1024xf32> to vector<8x961xf32>
    %38 = tpu.concatenate %36, %37 in 1 : vector<8x63xf32>, vector<8x961xf32> -> vector<8x1024xf32>
    %c5 = arith.constant 5 : index
    %c0_13 = arith.constant 0 : index
    %39 = vector.load %arg2[%c5, %c0_13] : memref<27x1024xf32, #tpu.memory_space<vmem>>, vector<1x1024xf32>
    %40 = vector.broadcast %39 : vector<1x1024xf32> to vector<8x1024xf32>
    %41 = arith.mulf %38, %40 : vector<8x1024xf32>
    %c40 = arith.constant 40 : index
    %c0_14 = arith.constant 0 : index
    %42 = vector.load %arg12[%c40, %c0_14] : memref<216x1024xf32, #tpu.memory_space<vmem>>, vector<8x1024xf32>
    tpu.vector_store %arg12[%c40, %c0_14], %41 {strides = array<i32>} : memref<216x1024xf32, #tpu.memory_space<vmem>>, vector<8x1024xf32>,
    %43 = vector.extract_strided_slice %0 {offsets = [0, 967], sizes = [8, 57], strides = [1, 1]} : vector<8x1024xf32> to vector<8x57xf32>
    %44 = vector.extract_strided_slice %0 {offsets = [0, 0], sizes = [8, 967], strides = [1, 1]} : vector<8x1024xf32> to vector<8x967xf32>
    %45 = tpu.concatenate %43, %44 in 1 : vector<8x57xf32>, vector<8x967xf32> -> vector<8x1024xf32>
    %c6 = arith.constant 6 : index
    %c0_15 = arith.constant 0 : index
    %46 = vector.load %arg2[%c6, %c0_15] : memref<27x1024xf32, #tpu.memory_space<vmem>>, vector<1x1024xf32>
    %47 = vector.broadcast %46 : vector<1x1024xf32> to vector<8x1024xf32>
    %48 = arith.mulf %45, %47 : vector<8x1024xf32>
    %c48 = arith.constant 48 : index
    %c0_16 = arith.constant 0 : index
    %49 = vector.load %arg12[%c48, %c0_16] : memref<216x1024xf32, #tpu.memory_space<vmem>>, vector<8x1024xf32>
    tpu.vector_store %arg12[%c48, %c0_16], %48 {strides = array<i32>} : memref<216x1024xf32, #tpu.memory_space<vmem>>, vector<8x1024xf32>,
    %50 = vector.extract_strided_slice %0 {offsets = [0, 968], sizes = [8, 56], strides = [1, 1]} : vector<8x1024xf32> to vector<8x56xf32>
    %51 = vector.extract_strided_slice %0 {offsets = [0, 0], sizes = [8, 968], strides = [1, 1]} : vector<8x1024xf32> to vector<8x968xf32>
    %52 = tpu.concatenate %50, %51 in 1 : vector<8x56xf32>, vector<8x968xf32> -> vector<8x1024xf32>
    %c7 = arith.constant 7 : index
    %c0_17 = arith.constant 0 : index
    %53 = vector.load %arg2[%c7, %c0_17] : memref<27x1024xf32, #tpu.memory_space<vmem>>, vector<1x1024xf32>
    %54 = vector.broadcast %53 : vector<1x1024xf32> to vector<8x1024xf32>
    %55 = arith.mulf %52, %54 : vector<8x1024xf32>
    %c56 = arith.constant 56 : index
    %c0_18 = arith.constant 0 : index
    %56 = vector.load %arg12[%c56, %c0_18] : memref<216x1024xf32, #tpu.memory_space<vmem>>, vector<8x1024xf32>
    tpu.vector_store %arg12[%c56, %c0_18], %55 {strides = array<i32>} : memref<216x1024xf32, #tpu.memory_space<vmem>>, vector<8x1024xf32>,
    %57 = vector.extract_strided_slice %0 {offsets = [0, 969], sizes = [8, 55], strides = [1, 1]} : vector<8x1024xf32> to vector<8x55xf32>
    %58 = vector.extract_strided_slice %0 {offsets = [0, 0], sizes = [8, 969], strides = [1, 1]} : vector<8x1024xf32> to vector<8x969xf32>
    %59 = tpu.concatenate %57, %58 in 1 : vector<8x55xf32>, vector<8x969xf32> -> vector<8x1024xf32>
    %c8_19 = arith.constant 8 : index
    %c0_20 = arith.constant 0 : index
    %60 = vector.load %arg2[%c8_19, %c0_20] : memref<27x1024xf32, #tpu.memory_space<vmem>>, vector<1x1024xf32>
    %61 = vector.broadcast %60 : vector<1x1024xf32> to vector<8x1024xf32>
    %62 = arith.mulf %59, %61 : vector<8x1024xf32>
    %c64 = arith.constant 64 : index
    %c0_21 = arith.constant 0 : index
    %63 = vector.load %arg12[%c64, %c0_21] : memref<216x1024xf32, #tpu.memory_space<vmem>>, vector<8x1024xf32>
    tpu.vector_store %arg12[%c64, %c0_21], %62 {strides = array<i32>} : memref<216x1024xf32, #tpu.memory_space<vmem>>, vector<8x1024xf32>,
    %64 = vector.extract_strided_slice %0 {offsets = [0, 1015], sizes = [8, 9], strides = [1, 1]} : vector<8x1024xf32> to vector<8x9xf32>
    %65 = vector.extract_strided_slice %0 {offsets = [0, 0], sizes = [8, 1015], strides = [1, 1]} : vector<8x1024xf32> to vector<8x1015xf32>
    %66 = tpu.concatenate %64, %65 in 1 : vector<8x9xf32>, vector<8x1015xf32> -> vector<8x1024xf32>
    %c9 = arith.constant 9 : index
    %c0_22 = arith.constant 0 : index
    %67 = vector.load %arg2[%c9, %c0_22] : memref<27x1024xf32, #tpu.memory_space<vmem>>, vector<1x1024xf32>
    %68 = vector.broadcast %67 : vector<1x1024xf32> to vector<8x1024xf32>
    %69 = arith.mulf %66, %68 : vector<8x1024xf32>
    %c72 = arith.constant 72 : index
    %c0_23 = arith.constant 0 : index
    %70 = vector.load %arg12[%c72, %c0_23] : memref<216x1024xf32, #tpu.memory_space<vmem>>, vector<8x1024xf32>
    tpu.vector_store %arg12[%c72, %c0_23], %69 {strides = array<i32>} : memref<216x1024xf32, #tpu.memory_space<vmem>>, vector<8x1024xf32>,
    %71 = vector.extract_strided_slice %0 {offsets = [0, 1016], sizes = [8, 8], strides = [1, 1]} : vector<8x1024xf32> to vector<8x8xf32>
    %72 = vector.extract_strided_slice %0 {offsets = [0, 0], sizes = [8, 1016], strides = [1, 1]} : vector<8x1024xf32> to vector<8x1016xf32>
    %73 = tpu.concatenate %71, %72 in 1 : vector<8x8xf32>, vector<8x1016xf32> -> vector<8x1024xf32>
    %c10 = arith.constant 10 : index
    %c0_24 = arith.constant 0 : index
    %74 = vector.load %arg2[%c10, %c0_24] : memref<27x1024xf32, #tpu.memory_space<vmem>>, vector<1x1024xf32>
    %75 = vector.broadcast %74 : vector<1x1024xf32> to vector<8x1024xf32>
    %76 = arith.mulf %73, %75 : vector<8x1024xf32>
    %c80 = arith.constant 80 : index
    %c0_25 = arith.constant 0 : index
    %77 = vector.load %arg12[%c80, %c0_25] : memref<216x1024xf32, #tpu.memory_space<vmem>>, vector<8x1024xf32>
    tpu.vector_store %arg12[%c80, %c0_25], %76 {strides = array<i32>} : memref<216x1024xf32, #tpu.memory_space<vmem>>, vector<8x1024xf32>,
    %78 = vector.extract_strided_slice %0 {offsets = [0, 1017], sizes = [8, 7], strides = [1, 1]} : vector<8x1024xf32> to vector<8x7xf32>
    %79 = vector.extract_strided_slice %0 {offsets = [0, 0], sizes = [8, 1017], strides = [1, 1]} : vector<8x1024xf32> to vector<8x1017xf32>
    %80 = tpu.concatenate %78, %79 in 1 : vector<8x7xf32>, vector<8x1017xf32> -> vector<8x1024xf32>
    %c11 = arith.constant 11 : index
    %c0_26 = arith.constant 0 : index
    %81 = vector.load %arg2[%c11, %c0_26] : memref<27x1024xf32, #tpu.memory_space<vmem>>, vector<1x1024xf32>
    %82 = vector.broadcast %81 : vector<1x1024xf32> to vector<8x1024xf32>
    %83 = arith.mulf %80, %82 : vector<8x1024xf32>
    %c88 = arith.constant 88 : index
    %c0_27 = arith.constant 0 : index
    %84 = vector.load %arg12[%c88, %c0_27] : memref<216x1024xf32, #tpu.memory_space<vmem>>, vector<8x1024xf32>
    tpu.vector_store %arg12[%c88, %c0_27], %83 {strides = array<i32>} : memref<216x1024xf32, #tpu.memory_space<vmem>>, vector<8x1024xf32>,
    %85 = vector.extract_strided_slice %0 {offsets = [0, 1023], sizes = [8, 1], strides = [1, 1]} : vector<8x1024xf32> to vector<8x1xf32>
    %86 = vector.extract_strided_slice %0 {offsets = [0, 0], sizes = [8, 1023], strides = [1, 1]} : vector<8x1024xf32> to vector<8x1023xf32>
    %87 = tpu.concatenate %85, %86 in 1 : vector<8x1xf32>, vector<8x1023xf32> -> vector<8x1024xf32>
    %c12 = arith.constant 12 : index
    %c0_28 = arith.constant 0 : index
    %88 = vector.load %arg2[%c12, %c0_28] : memref<27x1024xf32, #tpu.memory_space<vmem>>, vector<1x1024xf32>
    %89 = vector.broadcast %88 : vector<1x1024xf32> to vector<8x1024xf32>
    %90 = arith.mulf %87, %89 : vector<8x1024xf32>
    %c96 = arith.constant 96 : index
    %c0_29 = arith.constant 0 : index
    %91 = vector.load %arg12[%c96, %c0_29] : memref<216x1024xf32, #tpu.memory_space<vmem>>, vector<8x1024xf32>
    tpu.vector_store %arg12[%c96, %c0_29], %90 {strides = array<i32>} : memref<216x1024xf32, #tpu.memory_space<vmem>>, vector<8x1024xf32>,
    %c13 = arith.constant 13 : index
    %c0_30 = arith.constant 0 : index
    %92 = vector.load %arg2[%c13, %c0_30] : memref<27x1024xf32, #tpu.memory_space<vmem>>, vector<1x1024xf32>
    %93 = vector.broadcast %92 : vector<1x1024xf32> to vector<8x1024xf32>
    %94 = arith.mulf %0, %93 : vector<8x1024xf32>
    %c104 = arith.constant 104 : index
    %c0_31 = arith.constant 0 : index
    %95 = vector.load %arg12[%c104, %c0_31] : memref<216x1024xf32, #tpu.memory_space<vmem>>, vector<8x1024xf32>
    tpu.vector_store %arg12[%c104, %c0_31], %94 {strides = array<i32>} : memref<216x1024xf32, #tpu.memory_space<vmem>>, vector<8x1024xf32>,
    %96 = vector.extract_strided_slice %0 {offsets = [0, 1], sizes = [8, 1023], strides = [1, 1]} : vector<8x1024xf32> to vector<8x1023xf32>
    %97 = vector.extract_strided_slice %0 {offsets = [0, 0], sizes = [8, 1], strides = [1, 1]} : vector<8x1024xf32> to vector<8x1xf32>
    %98 = tpu.concatenate %96, %97 in 1 : vector<8x1023xf32>, vector<8x1xf32> -> vector<8x1024xf32>
    %c14 = arith.constant 14 : index
    %c0_32 = arith.constant 0 : index
    %99 = vector.load %arg2[%c14, %c0_32] : memref<27x1024xf32, #tpu.memory_space<vmem>>, vector<1x1024xf32>
    %100 = vector.broadcast %99 : vector<1x1024xf32> to vector<8x1024xf32>
    %101 = arith.mulf %98, %100 : vector<8x1024xf32>
    %c112 = arith.constant 112 : index
    %c0_33 = arith.constant 0 : index
    %102 = vector.load %arg12[%c112, %c0_33] : memref<216x1024xf32, #tpu.memory_space<vmem>>, vector<8x1024xf32>
    tpu.vector_store %arg12[%c112, %c0_33], %101 {strides = array<i32>} : memref<216x1024xf32, #tpu.memory_space<vmem>>, vector<8x1024xf32>,
    %103 = vector.extract_strided_slice %0 {offsets = [0, 7], sizes = [8, 1017], strides = [1, 1]} : vector<8x1024xf32> to vector<8x1017xf32>
    %104 = vector.extract_strided_slice %0 {offsets = [0, 0], sizes = [8, 7], strides = [1, 1]} : vector<8x1024xf32> to vector<8x7xf32>
    %105 = tpu.concatenate %103, %104 in 1 : vector<8x1017xf32>, vector<8x7xf32> -> vector<8x1024xf32>
    %c15 = arith.constant 15 : index
    %c0_34 = arith.constant 0 : index
    %106 = vector.load %arg2[%c15, %c0_34] : memref<27x1024xf32, #tpu.memory_space<vmem>>, vector<1x1024xf32>
    %107 = vector.broadcast %106 : vector<1x1024xf32> to vector<8x1024xf32>
    %108 = arith.mulf %105, %107 : vector<8x1024xf32>
    %c120 = arith.constant 120 : index
    %c0_35 = arith.constant 0 : index
    %109 = vector.load %arg12[%c120, %c0_35] : memref<216x1024xf32, #tpu.memory_space<vmem>>, vector<8x1024xf32>
    tpu.vector_store %arg12[%c120, %c0_35], %108 {strides = array<i32>} : memref<216x1024xf32, #tpu.memory_space<vmem>>, vector<8x1024xf32>,
    %110 = vector.extract_strided_slice %0 {offsets = [0, 8], sizes = [8, 1016], strides = [1, 1]} : vector<8x1024xf32> to vector<8x1016xf32>
    %111 = vector.extract_strided_slice %0 {offsets = [0, 0], sizes = [8, 8], strides = [1, 1]} : vector<8x1024xf32> to vector<8x8xf32>
    %112 = tpu.concatenate %110, %111 in 1 : vector<8x1016xf32>, vector<8x8xf32> -> vector<8x1024xf32>
    %c16_36 = arith.constant 16 : index
    %c0_37 = arith.constant 0 : index
    %113 = vector.load %arg2[%c16_36, %c0_37] : memref<27x1024xf32, #tpu.memory_space<vmem>>, vector<1x1024xf32>
    %114 = vector.broadcast %113 : vector<1x1024xf32> to vector<8x1024xf32>
    %115 = arith.mulf %112, %114 : vector<8x1024xf32>
    %c128 = arith.constant 128 : index
    %c0_38 = arith.constant 0 : index
    %116 = vector.load %arg12[%c128, %c0_38] : memref<216x1024xf32, #tpu.memory_space<vmem>>, vector<8x1024xf32>
    tpu.vector_store %arg12[%c128, %c0_38], %115 {strides = array<i32>} : memref<216x1024xf32, #tpu.memory_space<vmem>>, vector<8x1024xf32>,
    %117 = vector.extract_strided_slice %0 {offsets = [0, 9], sizes = [8, 1015], strides = [1, 1]} : vector<8x1024xf32> to vector<8x1015xf32>
    %118 = vector.extract_strided_slice %0 {offsets = [0, 0], sizes = [8, 9], strides = [1, 1]} : vector<8x1024xf32> to vector<8x9xf32>
    %119 = tpu.concatenate %117, %118 in 1 : vector<8x1015xf32>, vector<8x9xf32> -> vector<8x1024xf32>
    %c17 = arith.constant 17 : index
    %c0_39 = arith.constant 0 : index
    %120 = vector.load %arg2[%c17, %c0_39] : memref<27x1024xf32, #tpu.memory_space<vmem>>, vector<1x1024xf32>
    %121 = vector.broadcast %120 : vector<1x1024xf32> to vector<8x1024xf32>
    %122 = arith.mulf %119, %121 : vector<8x1024xf32>
    %c136 = arith.constant 136 : index
    %c0_40 = arith.constant 0 : index
    %123 = vector.load %arg12[%c136, %c0_40] : memref<216x1024xf32, #tpu.memory_space<vmem>>, vector<8x1024xf32>
    tpu.vector_store %arg12[%c136, %c0_40], %122 {strides = array<i32>} : memref<216x1024xf32, #tpu.memory_space<vmem>>, vector<8x1024xf32>,
    %124 = vector.extract_strided_slice %0 {offsets = [0, 55], sizes = [8, 969], strides = [1, 1]} : vector<8x1024xf32> to vector<8x969xf32>
    %125 = vector.extract_strided_slice %0 {offsets = [0, 0], sizes = [8, 55], strides = [1, 1]} : vector<8x1024xf32> to vector<8x55xf32>
    %126 = tpu.concatenate %124, %125 in 1 : vector<8x969xf32>, vector<8x55xf32> -> vector<8x1024xf32>
    %c18 = arith.constant 18 : index
    %c0_41 = arith.constant 0 : index
    %127 = vector.load %arg2[%c18, %c0_41] : memref<27x1024xf32, #tpu.memory_space<vmem>>, vector<1x1024xf32>
    %128 = vector.broadcast %127 : vector<1x1024xf32> to vector<8x1024xf32>
    %129 = arith.mulf %126, %128 : vector<8x1024xf32>
    %c144 = arith.constant 144 : index
    %c0_42 = arith.constant 0 : index
    %130 = vector.load %arg12[%c144, %c0_42] : memref<216x1024xf32, #tpu.memory_space<vmem>>, vector<8x1024xf32>
    tpu.vector_store %arg12[%c144, %c0_42], %129 {strides = array<i32>} : memref<216x1024xf32, #tpu.memory_space<vmem>>, vector<8x1024xf32>,
    %131 = vector.extract_strided_slice %0 {offsets = [0, 56], sizes = [8, 968], strides = [1, 1]} : vector<8x1024xf32> to vector<8x968xf32>
    %132 = vector.extract_strided_slice %0 {offsets = [0, 0], sizes = [8, 56], strides = [1, 1]} : vector<8x1024xf32> to vector<8x56xf32>
    %133 = tpu.concatenate %131, %132 in 1 : vector<8x968xf32>, vector<8x56xf32> -> vector<8x1024xf32>
    %c19 = arith.constant 19 : index
    %c0_43 = arith.constant 0 : index
    %134 = vector.load %arg2[%c19, %c0_43] : memref<27x1024xf32, #tpu.memory_space<vmem>>, vector<1x1024xf32>
    %135 = vector.broadcast %134 : vector<1x1024xf32> to vector<8x1024xf32>
    %136 = arith.mulf %133, %135 : vector<8x1024xf32>
    %c152 = arith.constant 152 : index
    %c0_44 = arith.constant 0 : index
    %137 = vector.load %arg12[%c152, %c0_44] : memref<216x1024xf32, #tpu.memory_space<vmem>>, vector<8x1024xf32>
    tpu.vector_store %arg12[%c152, %c0_44], %136 {strides = array<i32>} : memref<216x1024xf32, #tpu.memory_space<vmem>>, vector<8x1024xf32>,
    %138 = vector.extract_strided_slice %0 {offsets = [0, 57], sizes = [8, 967], strides = [1, 1]} : vector<8x1024xf32> to vector<8x967xf32>
    %139 = vector.extract_strided_slice %0 {offsets = [0, 0], sizes = [8, 57], strides = [1, 1]} : vector<8x1024xf32> to vector<8x57xf32>
    %140 = tpu.concatenate %138, %139 in 1 : vector<8x967xf32>, vector<8x57xf32> -> vector<8x1024xf32>
    %c20 = arith.constant 20 : index
    %c0_45 = arith.constant 0 : index
    %141 = vector.load %arg2[%c20, %c0_45] : memref<27x1024xf32, #tpu.memory_space<vmem>>, vector<1x1024xf32>
    %142 = vector.broadcast %141 : vector<1x1024xf32> to vector<8x1024xf32>
    %143 = arith.mulf %140, %142 : vector<8x1024xf32>
    %c160 = arith.constant 160 : index
    %c0_46 = arith.constant 0 : index
    %144 = vector.load %arg12[%c160, %c0_46] : memref<216x1024xf32, #tpu.memory_space<vmem>>, vector<8x1024xf32>
    tpu.vector_store %arg12[%c160, %c0_46], %143 {strides = array<i32>} : memref<216x1024xf32, #tpu.memory_space<vmem>>, vector<8x1024xf32>,
    %145 = vector.extract_strided_slice %0 {offsets = [0, 63], sizes = [8, 961], strides = [1, 1]} : vector<8x1024xf32> to vector<8x961xf32>
    %146 = vector.extract_strided_slice %0 {offsets = [0, 0], sizes = [8, 63], strides = [1, 1]} : vector<8x1024xf32> to vector<8x63xf32>
    %147 = tpu.concatenate %145, %146 in 1 : vector<8x961xf32>, vector<8x63xf32> -> vector<8x1024xf32>
    %c21 = arith.constant 21 : index
    %c0_47 = arith.constant 0 : index
    %148 = vector.load %arg2[%c21, %c0_47] : memref<27x1024xf32, #tpu.memory_space<vmem>>, vector<1x1024xf32>
    %149 = vector.broadcast %148 : vector<1x1024xf32> to vector<8x1024xf32>
    %150 = arith.mulf %147, %149 : vector<8x1024xf32>
    %c168 = arith.constant 168 : index
    %c0_48 = arith.constant 0 : index
    %151 = vector.load %arg12[%c168, %c0_48] : memref<216x1024xf32, #tpu.memory_space<vmem>>, vector<8x1024xf32>
    tpu.vector_store %arg12[%c168, %c0_48], %150 {strides = array<i32>} : memref<216x1024xf32, #tpu.memory_space<vmem>>, vector<8x1024xf32>,
    %152 = vector.extract_strided_slice %0 {offsets = [0, 64], sizes = [8, 960], strides = [1, 1]} : vector<8x1024xf32> to vector<8x960xf32>
    %153 = vector.extract_strided_slice %0 {offsets = [0, 0], sizes = [8, 64], strides = [1, 1]} : vector<8x1024xf32> to vector<8x64xf32>
    %154 = tpu.concatenate %152, %153 in 1 : vector<8x960xf32>, vector<8x64xf32> -> vector<8x1024xf32>
    %c22 = arith.constant 22 : index
    %c0_49 = arith.constant 0 : index
    %155 = vector.load %arg2[%c22, %c0_49] : memref<27x1024xf32, #tpu.memory_space<vmem>>, vector<1x1024xf32>
    %156 = vector.broadcast %155 : vector<1x1024xf32> to vector<8x1024xf32>
    %157 = arith.mulf %154, %156 : vector<8x1024xf32>
    %c176 = arith.constant 176 : index
    %c0_50 = arith.constant 0 : index
    %158 = vector.load %arg12[%c176, %c0_50] : memref<216x1024xf32, #tpu.memory_space<vmem>>, vector<8x1024xf32>
    tpu.vector_store %arg12[%c176, %c0_50], %157 {strides = array<i32>} : memref<216x1024xf32, #tpu.memory_space<vmem>>, vector<8x1024xf32>,
    %159 = vector.extract_strided_slice %0 {offsets = [0, 65], sizes = [8, 959], strides = [1, 1]} : vector<8x1024xf32> to vector<8x959xf32>
    %160 = vector.extract_strided_slice %0 {offsets = [0, 0], sizes = [8, 65], strides = [1, 1]} : vector<8x1024xf32> to vector<8x65xf32>
    %161 = tpu.concatenate %159, %160 in 1 : vector<8x959xf32>, vector<8x65xf32> -> vector<8x1024xf32>
    %c23 = arith.constant 23 : index
    %c0_51 = arith.constant 0 : index
    %162 = vector.load %arg2[%c23, %c0_51] : memref<27x1024xf32, #tpu.memory_space<vmem>>, vector<1x1024xf32>
    %163 = vector.broadcast %162 : vector<1x1024xf32> to vector<8x1024xf32>
    %164 = arith.mulf %161, %163 : vector<8x1024xf32>
    %c184 = arith.constant 184 : index
    %c0_52 = arith.constant 0 : index
    %165 = vector.load %arg12[%c184, %c0_52] : memref<216x1024xf32, #tpu.memory_space<vmem>>, vector<8x1024xf32>
    tpu.vector_store %arg12[%c184, %c0_52], %164 {strides = array<i32>} : memref<216x1024xf32, #tpu.memory_space<vmem>>, vector<8x1024xf32>,
    %166 = vector.extract_strided_slice %0 {offsets = [0, 71], sizes = [8, 953], strides = [1, 1]} : vector<8x1024xf32> to vector<8x953xf32>
    %167 = vector.extract_strided_slice %0 {offsets = [0, 0], sizes = [8, 71], strides = [1, 1]} : vector<8x1024xf32> to vector<8x71xf32>
    %168 = tpu.concatenate %166, %167 in 1 : vector<8x953xf32>, vector<8x71xf32> -> vector<8x1024xf32>
    %c24_53 = arith.constant 24 : index
    %c0_54 = arith.constant 0 : index
    %169 = vector.load %arg2[%c24_53, %c0_54] : memref<27x1024xf32, #tpu.memory_space<vmem>>, vector<1x1024xf32>
    %170 = vector.broadcast %169 : vector<1x1024xf32> to vector<8x1024xf32>
    %171 = arith.mulf %168, %170 : vector<8x1024xf32>
    %c192 = arith.constant 192 : index
    %c0_55 = arith.constant 0 : index
    %172 = vector.load %arg12[%c192, %c0_55] : memref<216x1024xf32, #tpu.memory_space<vmem>>, vector<8x1024xf32>
    tpu.vector_store %arg12[%c192, %c0_55], %171 {strides = array<i32>} : memref<216x1024xf32, #tpu.memory_space<vmem>>, vector<8x1024xf32>,
    %173 = vector.extract_strided_slice %0 {offsets = [0, 72], sizes = [8, 952], strides = [1, 1]} : vector<8x1024xf32> to vector<8x952xf32>
    %174 = vector.extract_strided_slice %0 {offsets = [0, 0], sizes = [8, 72], strides = [1, 1]} : vector<8x1024xf32> to vector<8x72xf32>
    %175 = tpu.concatenate %173, %174 in 1 : vector<8x952xf32>, vector<8x72xf32> -> vector<8x1024xf32>
    %c25 = arith.constant 25 : index
    %c0_56 = arith.constant 0 : index
    %176 = vector.load %arg2[%c25, %c0_56] : memref<27x1024xf32, #tpu.memory_space<vmem>>, vector<1x1024xf32>
    %177 = vector.broadcast %176 : vector<1x1024xf32> to vector<8x1024xf32>
    %178 = arith.mulf %175, %177 : vector<8x1024xf32>
    %c200 = arith.constant 200 : index
    %c0_57 = arith.constant 0 : index
    %179 = vector.load %arg12[%c200, %c0_57] : memref<216x1024xf32, #tpu.memory_space<vmem>>, vector<8x1024xf32>
    tpu.vector_store %arg12[%c200, %c0_57], %178 {strides = array<i32>} : memref<216x1024xf32, #tpu.memory_space<vmem>>, vector<8x1024xf32>,
    %180 = vector.extract_strided_slice %0 {offsets = [0, 73], sizes = [8, 951], strides = [1, 1]} : vector<8x1024xf32> to vector<8x951xf32>
    %181 = vector.extract_strided_slice %0 {offsets = [0, 0], sizes = [8, 73], strides = [1, 1]} : vector<8x1024xf32> to vector<8x73xf32>
    %182 = tpu.concatenate %180, %181 in 1 : vector<8x951xf32>, vector<8x73xf32> -> vector<8x1024xf32>
    %c26 = arith.constant 26 : index
    %c0_58 = arith.constant 0 : index
    %183 = vector.load %arg2[%c26, %c0_58] : memref<27x1024xf32, #tpu.memory_space<vmem>>, vector<1x1024xf32>
    %184 = vector.broadcast %183 : vector<1x1024xf32> to vector<8x1024xf32>
    %185 = arith.mulf %182, %184 : vector<8x1024xf32>
    %c208 = arith.constant 208 : index
    %c0_59 = arith.constant 0 : index
    %186 = vector.load %arg12[%c208, %c0_59] : memref<216x1024xf32, #tpu.memory_space<vmem>>, vector<8x1024xf32>
    tpu.vector_store %arg12[%c208, %c0_59], %185 {strides = array<i32>} : memref<216x1024xf32, #tpu.memory_space<vmem>>, vector<8x1024xf32>,
    %c0_60 = arith.constant 0 : index
    %c0_61 = arith.constant 0 : index
    %187 = vector.load %arg3[%c0_60, %c0_61] : memref<8x216xf32, #tpu.memory_space<vmem>>, vector<8x216xf32>
    %c0_62 = arith.constant 0 : index
    %c0_63 = arith.constant 0 : index
    %188 = vector.load %arg12[%c0_62, %c0_63] : memref<216x1024xf32, #tpu.memory_space<vmem>>, vector<216x1024xf32>
    %cst = arith.constant dense<0.000000e+00> : vector<8x1024xf32>
    %189 = tpu.matmul %187, %188, %cst {dimension_numbers = #tpu.dot_dimension_numbers<[1], [0], [0], [1], [0, 0, 1, 1], [], []>} : vector<8x216xf32>, vector<216x1024xf32>, vector<8x1024xf32> -> vector<8x1024xf32>
    %c0_64 = arith.constant 0 : index
    %c0_65 = arith.constant 0 : index
    %190 = vector.load %arg4[%c0_64, %c0_65] : memref<8x1xf32, #tpu.memory_space<vmem>>, vector<8x1xf32>
    %191 = vector.broadcast %190 : vector<8x1xf32> to vector<8x1024xf32>
    %192 = arith.addf %189, %191 : vector<8x1024xf32>
    %cst_66 = arith.constant dense<0.000000e+00> : vector<8xf32>
    %193 = vector.multi_reduction <add>, %192, %cst_66 [1] : vector<8x1024xf32> to vector<8xf32>
    %194 = vector.shape_cast %193 : vector<8xf32> to vector<8x1xf32>
    %cst_67 = arith.constant 1.024000e+03 : f32
    %195 = vector.broadcast %cst_67 : f32 to vector<8x1xf32>
    %196 = arith.divf %194, %195 : vector<8x1xf32>
    %197 = vector.broadcast %196 : vector<8x1xf32> to vector<8x1024xf32>
    %198 = arith.subf %192, %197 : vector<8x1024xf32>
    %199 = arith.mulf %198, %198 : vector<8x1024xf32>
    %cst_68 = arith.constant dense<0.000000e+00> : vector<8xf32>
    %200 = vector.multi_reduction <add>, %199, %cst_68 [1] : vector<8x1024xf32> to vector<8xf32>
    %201 = vector.shape_cast %200 : vector<8xf32> to vector<8x1xf32>
    %cst_69 = arith.constant 1.024000e+03 : f32
    %202 = vector.broadcast %cst_69 : f32 to vector<8x1xf32>
    %203 = arith.divf %201, %202 : vector<8x1xf32>
    %cst_70 = arith.constant 9.99999974E-6 : f32
    %204 = vector.broadcast %cst_70 : f32 to vector<8x1xf32>
    %205 = arith.addf %203, %204 : vector<8x1xf32>
    %206 = math.rsqrt %205 : vector<8x1xf32>
    %207 = vector.broadcast %206 : vector<8x1xf32> to vector<8x1024xf32>
    %208 = arith.mulf %198, %207 : vector<8x1024xf32>
    %c0_71 = arith.constant 0 : index
    %c0_72 = arith.constant 0 : index
    %209 = vector.load %arg5[%c0_71, %c0_72] : memref<8x1xf32, #tpu.memory_space<vmem>>, vector<8x1xf32>
    %210 = vector.broadcast %209 : vector<8x1xf32> to vector<8x1024xf32>
    %211 = arith.mulf %208, %210 : vector<8x1024xf32>
    %c0_73 = arith.constant 0 : index
    %c0_74 = arith.constant 0 : index
    %212 = vector.load %arg6[%c0_73, %c0_74] : memref<8x1xf32, #tpu.memory_space<vmem>>, vector<8x1xf32>
    %213 = vector.broadcast %212 : vector<8x1xf32> to vector<8x1024xf32>
    %214 = arith.addf %211, %213 : vector<8x1024xf32>
    %cst_75 = arith.constant 0.000000e+00 : f32
    %215 = vector.broadcast %cst_75 : f32 to vector<8x1024xf32>
    %216 = arith.maximumf %214, %215 : vector<8x1024xf32>
    %217 = vector.extract_strided_slice %216 {offsets = [0, 951], sizes = [8, 73], strides = [1, 1]} : vector<8x1024xf32> to vector<8x73xf32>
    %218 = vector.extract_strided_slice %216 {offsets = [0, 0], sizes = [8, 951], strides = [1, 1]} : vector<8x1024xf32> to vector<8x951xf32>
    %219 = tpu.concatenate %217, %218 in 1 : vector<8x73xf32>, vector<8x951xf32> -> vector<8x1024xf32>
    %c0_76 = arith.constant 0 : index
    %c0_77 = arith.constant 0 : index
    %220 = vector.load %arg2[%c0_76, %c0_77] : memref<27x1024xf32, #tpu.memory_space<vmem>>, vector<1x1024xf32>
    %221 = vector.broadcast %220 : vector<1x1024xf32> to vector<8x1024xf32>
    %222 = arith.mulf %219, %221 : vector<8x1024xf32>
    %c0_78 = arith.constant 0 : index
    %c0_79 = arith.constant 0 : index
    %223 = vector.load %arg12[%c0_78, %c0_79] : memref<216x1024xf32, #tpu.memory_space<vmem>>, vector<8x1024xf32>
    tpu.vector_store %arg12[%c0_78, %c0_79], %222 {strides = array<i32>} : memref<216x1024xf32, #tpu.memory_space<vmem>>, vector<8x1024xf32>,
    %224 = vector.extract_strided_slice %216 {offsets = [0, 952], sizes = [8, 72], strides = [1, 1]} : vector<8x1024xf32> to vector<8x72xf32>
    %225 = vector.extract_strided_slice %216 {offsets = [0, 0], sizes = [8, 952], strides = [1, 1]} : vector<8x1024xf32> to vector<8x952xf32>
    %226 = tpu.concatenate %224, %225 in 1 : vector<8x72xf32>, vector<8x952xf32> -> vector<8x1024xf32>
    %c1_80 = arith.constant 1 : index
    %c0_81 = arith.constant 0 : index
    %227 = vector.load %arg2[%c1_80, %c0_81] : memref<27x1024xf32, #tpu.memory_space<vmem>>, vector<1x1024xf32>
    %228 = vector.broadcast %227 : vector<1x1024xf32> to vector<8x1024xf32>
    %229 = arith.mulf %226, %228 : vector<8x1024xf32>
    %c8_82 = arith.constant 8 : index
    %c0_83 = arith.constant 0 : index
    %230 = vector.load %arg12[%c8_82, %c0_83] : memref<216x1024xf32, #tpu.memory_space<vmem>>, vector<8x1024xf32>
    tpu.vector_store %arg12[%c8_82, %c0_83], %229 {strides = array<i32>} : memref<216x1024xf32, #tpu.memory_space<vmem>>, vector<8x1024xf32>,
    %231 = vector.extract_strided_slice %216 {offsets = [0, 953], sizes = [8, 71], strides = [1, 1]} : vector<8x1024xf32> to vector<8x71xf32>
    %232 = vector.extract_strided_slice %216 {offsets = [0, 0], sizes = [8, 953], strides = [1, 1]} : vector<8x1024xf32> to vector<8x953xf32>
    %233 = tpu.concatenate %231, %232 in 1 : vector<8x71xf32>, vector<8x953xf32> -> vector<8x1024xf32>
    %c2_84 = arith.constant 2 : index
    %c0_85 = arith.constant 0 : index
    %234 = vector.load %arg2[%c2_84, %c0_85] : memref<27x1024xf32, #tpu.memory_space<vmem>>, vector<1x1024xf32>
    %235 = vector.broadcast %234 : vector<1x1024xf32> to vector<8x1024xf32>
    %236 = arith.mulf %233, %235 : vector<8x1024xf32>
    %c16_86 = arith.constant 16 : index
    %c0_87 = arith.constant 0 : index
    %237 = vector.load %arg12[%c16_86, %c0_87] : memref<216x1024xf32, #tpu.memory_space<vmem>>, vector<8x1024xf32>
    tpu.vector_store %arg12[%c16_86, %c0_87], %236 {strides = array<i32>} : memref<216x1024xf32, #tpu.memory_space<vmem>>, vector<8x1024xf32>,
    %238 = vector.extract_strided_slice %216 {offsets = [0, 959], sizes = [8, 65], strides = [1, 1]} : vector<8x1024xf32> to vector<8x65xf32>
    %239 = vector.extract_strided_slice %216 {offsets = [0, 0], sizes = [8, 959], strides = [1, 1]} : vector<8x1024xf32> to vector<8x959xf32>
    %240 = tpu.concatenate %238, %239 in 1 : vector<8x65xf32>, vector<8x959xf32> -> vector<8x1024xf32>
    %c3_88 = arith.constant 3 : index
    %c0_89 = arith.constant 0 : index
    %241 = vector.load %arg2[%c3_88, %c0_89] : memref<27x1024xf32, #tpu.memory_space<vmem>>, vector<1x1024xf32>
    %242 = vector.broadcast %241 : vector<1x1024xf32> to vector<8x1024xf32>
    %243 = arith.mulf %240, %242 : vector<8x1024xf32>
    %c24_90 = arith.constant 24 : index
    %c0_91 = arith.constant 0 : index
    %244 = vector.load %arg12[%c24_90, %c0_91] : memref<216x1024xf32, #tpu.memory_space<vmem>>, vector<8x1024xf32>
    tpu.vector_store %arg12[%c24_90, %c0_91], %243 {strides = array<i32>} : memref<216x1024xf32, #tpu.memory_space<vmem>>, vector<8x1024xf32>,
    %245 = vector.extract_strided_slice %216 {offsets = [0, 960], sizes = [8, 64], strides = [1, 1]} : vector<8x1024xf32> to vector<8x64xf32>
    %246 = vector.extract_strided_slice %216 {offsets = [0, 0], sizes = [8, 960], strides = [1, 1]} : vector<8x1024xf32> to vector<8x960xf32>
    %247 = tpu.concatenate %245, %246 in 1 : vector<8x64xf32>, vector<8x960xf32> -> vector<8x1024xf32>
    %c4_92 = arith.constant 4 : index
    %c0_93 = arith.constant 0 : index
    %248 = vector.load %arg2[%c4_92, %c0_93] : memref<27x1024xf32, #tpu.memory_space<vmem>>, vector<1x1024xf32>
    %249 = vector.broadcast %248 : vector<1x1024xf32> to vector<8x1024xf32>
    %250 = arith.mulf %247, %249 : vector<8x1024xf32>
    %c32_94 = arith.constant 32 : index
    %c0_95 = arith.constant 0 : index
    %251 = vector.load %arg12[%c32_94, %c0_95] : memref<216x1024xf32, #tpu.memory_space<vmem>>, vector<8x1024xf32>
    tpu.vector_store %arg12[%c32_94, %c0_95], %250 {strides = array<i32>} : memref<216x1024xf32, #tpu.memory_space<vmem>>, vector<8x1024xf32>,
    %252 = vector.extract_strided_slice %216 {offsets = [0, 961], sizes = [8, 63], strides = [1, 1]} : vector<8x1024xf32> to vector<8x63xf32>
    %253 = vector.extract_strided_slice %216 {offsets = [0, 0], sizes = [8, 961], strides = [1, 1]} : vector<8x1024xf32> to vector<8x961xf32>
    %254 = tpu.concatenate %252, %253 in 1 : vector<8x63xf32>, vector<8x961xf32> -> vector<8x1024xf32>
    %c5_96 = arith.constant 5 : index
    %c0_97 = arith.constant 0 : index
    %255 = vector.load %arg2[%c5_96, %c0_97] : memref<27x1024xf32, #tpu.memory_space<vmem>>, vector<1x1024xf32>
    %256 = vector.broadcast %255 : vector<1x1024xf32> to vector<8x1024xf32>
    %257 = arith.mulf %254, %256 : vector<8x1024xf32>
    %c40_98 = arith.constant 40 : index
    %c0_99 = arith.constant 0 : index
    %258 = vector.load %arg12[%c40_98, %c0_99] : memref<216x1024xf32, #tpu.memory_space<vmem>>, vector<8x1024xf32>
    tpu.vector_store %arg12[%c40_98, %c0_99], %257 {strides = array<i32>} : memref<216x1024xf32, #tpu.memory_space<vmem>>, vector<8x1024xf32>,
    %259 = vector.extract_strided_slice %216 {offsets = [0, 967], sizes = [8, 57], strides = [1, 1]} : vector<8x1024xf32> to vector<8x57xf32>
    %260 = vector.extract_strided_slice %216 {offsets = [0, 0], sizes = [8, 967], strides = [1, 1]} : vector<8x1024xf32> to vector<8x967xf32>
    %261 = tpu.concatenate %259, %260 in 1 : vector<8x57xf32>, vector<8x967xf32> -> vector<8x1024xf32>
    %c6_100 = arith.constant 6 : index
    %c0_101 = arith.constant 0 : index
    %262 = vector.load %arg2[%c6_100, %c0_101] : memref<27x1024xf32, #tpu.memory_space<vmem>>, vector<1x1024xf32>
    %263 = vector.broadcast %262 : vector<1x1024xf32> to vector<8x1024xf32>
    %264 = arith.mulf %261, %263 : vector<8x1024xf32>
    %c48_102 = arith.constant 48 : index
    %c0_103 = arith.constant 0 : index
    %265 = vector.load %arg12[%c48_102, %c0_103] : memref<216x1024xf32, #tpu.memory_space<vmem>>, vector<8x1024xf32>
    tpu.vector_store %arg12[%c48_102, %c0_103], %264 {strides = array<i32>} : memref<216x1024xf32, #tpu.memory_space<vmem>>, vector<8x1024xf32>,
    %266 = vector.extract_strided_slice %216 {offsets = [0, 968], sizes = [8, 56], strides = [1, 1]} : vector<8x1024xf32> to vector<8x56xf32>
    %267 = vector.extract_strided_slice %216 {offsets = [0, 0], sizes = [8, 968], strides = [1, 1]} : vector<8x1024xf32> to vector<8x968xf32>
    %268 = tpu.concatenate %266, %267 in 1 : vector<8x56xf32>, vector<8x968xf32> -> vector<8x1024xf32>
    %c7_104 = arith.constant 7 : index
    %c0_105 = arith.constant 0 : index
    %269 = vector.load %arg2[%c7_104, %c0_105] : memref<27x1024xf32, #tpu.memory_space<vmem>>, vector<1x1024xf32>
    %270 = vector.broadcast %269 : vector<1x1024xf32> to vector<8x1024xf32>
    %271 = arith.mulf %268, %270 : vector<8x1024xf32>
    %c56_106 = arith.constant 56 : index
    %c0_107 = arith.constant 0 : index
    %272 = vector.load %arg12[%c56_106, %c0_107] : memref<216x1024xf32, #tpu.memory_space<vmem>>, vector<8x1024xf32>
    tpu.vector_store %arg12[%c56_106, %c0_107], %271 {strides = array<i32>} : memref<216x1024xf32, #tpu.memory_space<vmem>>, vector<8x1024xf32>,
    %273 = vector.extract_strided_slice %216 {offsets = [0, 969], sizes = [8, 55], strides = [1, 1]} : vector<8x1024xf32> to vector<8x55xf32>
    %274 = vector.extract_strided_slice %216 {offsets = [0, 0], sizes = [8, 969], strides = [1, 1]} : vector<8x1024xf32> to vector<8x969xf32>
    %275 = tpu.concatenate %273, %274 in 1 : vector<8x55xf32>, vector<8x969xf32> -> vector<8x1024xf32>
    %c8_108 = arith.constant 8 : index
    %c0_109 = arith.constant 0 : index
    %276 = vector.load %arg2[%c8_108, %c0_109] : memref<27x1024xf32, #tpu.memory_space<vmem>>, vector<1x1024xf32>
    %277 = vector.broadcast %276 : vector<1x1024xf32> to vector<8x1024xf32>
    %278 = arith.mulf %275, %277 : vector<8x1024xf32>
    %c64_110 = arith.constant 64 : index
    %c0_111 = arith.constant 0 : index
    %279 = vector.load %arg12[%c64_110, %c0_111] : memref<216x1024xf32, #tpu.memory_space<vmem>>, vector<8x1024xf32>
    tpu.vector_store %arg12[%c64_110, %c0_111], %278 {strides = array<i32>} : memref<216x1024xf32, #tpu.memory_space<vmem>>, vector<8x1024xf32>,
    %280 = vector.extract_strided_slice %216 {offsets = [0, 1015], sizes = [8, 9], strides = [1, 1]} : vector<8x1024xf32> to vector<8x9xf32>
    %281 = vector.extract_strided_slice %216 {offsets = [0, 0], sizes = [8, 1015], strides = [1, 1]} : vector<8x1024xf32> to vector<8x1015xf32>
    %282 = tpu.concatenate %280, %281 in 1 : vector<8x9xf32>, vector<8x1015xf32> -> vector<8x1024xf32>
    %c9_112 = arith.constant 9 : index
    %c0_113 = arith.constant 0 : index
    %283 = vector.load %arg2[%c9_112, %c0_113] : memref<27x1024xf32, #tpu.memory_space<vmem>>, vector<1x1024xf32>
    %284 = vector.broadcast %283 : vector<1x1024xf32> to vector<8x1024xf32>
    %285 = arith.mulf %282, %284 : vector<8x1024xf32>
    %c72_114 = arith.constant 72 : index
    %c0_115 = arith.constant 0 : index
    %286 = vector.load %arg12[%c72_114, %c0_115] : memref<216x1024xf32, #tpu.memory_space<vmem>>, vector<8x1024xf32>
    tpu.vector_store %arg12[%c72_114, %c0_115], %285 {strides = array<i32>} : memref<216x1024xf32, #tpu.memory_space<vmem>>, vector<8x1024xf32>,
    %287 = vector.extract_strided_slice %216 {offsets = [0, 1016], sizes = [8, 8], strides = [1, 1]} : vector<8x1024xf32> to vector<8x8xf32>
    %288 = vector.extract_strided_slice %216 {offsets = [0, 0], sizes = [8, 1016], strides = [1, 1]} : vector<8x1024xf32> to vector<8x1016xf32>
    %289 = tpu.concatenate %287, %288 in 1 : vector<8x8xf32>, vector<8x1016xf32> -> vector<8x1024xf32>
    %c10_116 = arith.constant 10 : index
    %c0_117 = arith.constant 0 : index
    %290 = vector.load %arg2[%c10_116, %c0_117] : memref<27x1024xf32, #tpu.memory_space<vmem>>, vector<1x1024xf32>
    %291 = vector.broadcast %290 : vector<1x1024xf32> to vector<8x1024xf32>
    %292 = arith.mulf %289, %291 : vector<8x1024xf32>
    %c80_118 = arith.constant 80 : index
    %c0_119 = arith.constant 0 : index
    %293 = vector.load %arg12[%c80_118, %c0_119] : memref<216x1024xf32, #tpu.memory_space<vmem>>, vector<8x1024xf32>
    tpu.vector_store %arg12[%c80_118, %c0_119], %292 {strides = array<i32>} : memref<216x1024xf32, #tpu.memory_space<vmem>>, vector<8x1024xf32>,
    %294 = vector.extract_strided_slice %216 {offsets = [0, 1017], sizes = [8, 7], strides = [1, 1]} : vector<8x1024xf32> to vector<8x7xf32>
    %295 = vector.extract_strided_slice %216 {offsets = [0, 0], sizes = [8, 1017], strides = [1, 1]} : vector<8x1024xf32> to vector<8x1017xf32>
    %296 = tpu.concatenate %294, %295 in 1 : vector<8x7xf32>, vector<8x1017xf32> -> vector<8x1024xf32>
    %c11_120 = arith.constant 11 : index
    %c0_121 = arith.constant 0 : index
    %297 = vector.load %arg2[%c11_120, %c0_121] : memref<27x1024xf32, #tpu.memory_space<vmem>>, vector<1x1024xf32>
    %298 = vector.broadcast %297 : vector<1x1024xf32> to vector<8x1024xf32>
    %299 = arith.mulf %296, %298 : vector<8x1024xf32>
    %c88_122 = arith.constant 88 : index
    %c0_123 = arith.constant 0 : index
    %300 = vector.load %arg12[%c88_122, %c0_123] : memref<216x1024xf32, #tpu.memory_space<vmem>>, vector<8x1024xf32>
    tpu.vector_store %arg12[%c88_122, %c0_123], %299 {strides = array<i32>} : memref<216x1024xf32, #tpu.memory_space<vmem>>, vector<8x1024xf32>,
    %301 = vector.extract_strided_slice %216 {offsets = [0, 1023], sizes = [8, 1], strides = [1, 1]} : vector<8x1024xf32> to vector<8x1xf32>
    %302 = vector.extract_strided_slice %216 {offsets = [0, 0], sizes = [8, 1023], strides = [1, 1]} : vector<8x1024xf32> to vector<8x1023xf32>
    %303 = tpu.concatenate %301, %302 in 1 : vector<8x1xf32>, vector<8x1023xf32> -> vector<8x1024xf32>
    %c12_124 = arith.constant 12 : index
    %c0_125 = arith.constant 0 : index
    %304 = vector.load %arg2[%c12_124, %c0_125] : memref<27x1024xf32, #tpu.memory_space<vmem>>, vector<1x1024xf32>
    %305 = vector.broadcast %304 : vector<1x1024xf32> to vector<8x1024xf32>
    %306 = arith.mulf %303, %305 : vector<8x1024xf32>
    %c96_126 = arith.constant 96 : index
    %c0_127 = arith.constant 0 : index
    %307 = vector.load %arg12[%c96_126, %c0_127] : memref<216x1024xf32, #tpu.memory_space<vmem>>, vector<8x1024xf32>
    tpu.vector_store %arg12[%c96_126, %c0_127], %306 {strides = array<i32>} : memref<216x1024xf32, #tpu.memory_space<vmem>>, vector<8x1024xf32>,
    %c13_128 = arith.constant 13 : index
    %c0_129 = arith.constant 0 : index
    %308 = vector.load %arg2[%c13_128, %c0_129] : memref<27x1024xf32, #tpu.memory_space<vmem>>, vector<1x1024xf32>
    %309 = vector.broadcast %308 : vector<1x1024xf32> to vector<8x1024xf32>
    %310 = arith.mulf %216, %309 : vector<8x1024xf32>
    %c104_130 = arith.constant 104 : index
    %c0_131 = arith.constant 0 : index
    %311 = vector.load %arg12[%c104_130, %c0_131] : memref<216x1024xf32, #tpu.memory_space<vmem>>, vector<8x1024xf32>
    tpu.vector_store %arg12[%c104_130, %c0_131], %310 {strides = array<i32>} : memref<216x1024xf32, #tpu.memory_space<vmem>>, vector<8x1024xf32>,
    %312 = vector.extract_strided_slice %216 {offsets = [0, 1], sizes = [8, 1023], strides = [1, 1]} : vector<8x1024xf32> to vector<8x1023xf32>
    %313 = vector.extract_strided_slice %216 {offsets = [0, 0], sizes = [8, 1], strides = [1, 1]} : vector<8x1024xf32> to vector<8x1xf32>
    %314 = tpu.concatenate %312, %313 in 1 : vector<8x1023xf32>, vector<8x1xf32> -> vector<8x1024xf32>
    %c14_132 = arith.constant 14 : index
    %c0_133 = arith.constant 0 : index
    %315 = vector.load %arg2[%c14_132, %c0_133] : memref<27x1024xf32, #tpu.memory_space<vmem>>, vector<1x1024xf32>
    %316 = vector.broadcast %315 : vector<1x1024xf32> to vector<8x1024xf32>
    %317 = arith.mulf %314, %316 : vector<8x1024xf32>
    %c112_134 = arith.constant 112 : index
    %c0_135 = arith.constant 0 : index
    %318 = vector.load %arg12[%c112_134, %c0_135] : memref<216x1024xf32, #tpu.memory_space<vmem>>, vector<8x1024xf32>
    tpu.vector_store %arg12[%c112_134, %c0_135], %317 {strides = array<i32>} : memref<216x1024xf32, #tpu.memory_space<vmem>>, vector<8x1024xf32>,
    %319 = vector.extract_strided_slice %216 {offsets = [0, 7], sizes = [8, 1017], strides = [1, 1]} : vector<8x1024xf32> to vector<8x1017xf32>
    %320 = vector.extract_strided_slice %216 {offsets = [0, 0], sizes = [8, 7], strides = [1, 1]} : vector<8x1024xf32> to vector<8x7xf32>
    %321 = tpu.concatenate %319, %320 in 1 : vector<8x1017xf32>, vector<8x7xf32> -> vector<8x1024xf32>
    %c15_136 = arith.constant 15 : index
    %c0_137 = arith.constant 0 : index
    %322 = vector.load %arg2[%c15_136, %c0_137] : memref<27x1024xf32, #tpu.memory_space<vmem>>, vector<1x1024xf32>
    %323 = vector.broadcast %322 : vector<1x1024xf32> to vector<8x1024xf32>
    %324 = arith.mulf %321, %323 : vector<8x1024xf32>
    %c120_138 = arith.constant 120 : index
    %c0_139 = arith.constant 0 : index
    %325 = vector.load %arg12[%c120_138, %c0_139] : memref<216x1024xf32, #tpu.memory_space<vmem>>, vector<8x1024xf32>
    tpu.vector_store %arg12[%c120_138, %c0_139], %324 {strides = array<i32>} : memref<216x1024xf32, #tpu.memory_space<vmem>>, vector<8x1024xf32>,
    %326 = vector.extract_strided_slice %216 {offsets = [0, 8], sizes = [8, 1016], strides = [1, 1]} : vector<8x1024xf32> to vector<8x1016xf32>
    %327 = vector.extract_strided_slice %216 {offsets = [0, 0], sizes = [8, 8], strides = [1, 1]} : vector<8x1024xf32> to vector<8x8xf32>
    %328 = tpu.concatenate %326, %327 in 1 : vector<8x1016xf32>, vector<8x8xf32> -> vector<8x1024xf32>
    %c16_140 = arith.constant 16 : index
    %c0_141 = arith.constant 0 : index
    %329 = vector.load %arg2[%c16_140, %c0_141] : memref<27x1024xf32, #tpu.memory_space<vmem>>, vector<1x1024xf32>
    %330 = vector.broadcast %329 : vector<1x1024xf32> to vector<8x1024xf32>
    %331 = arith.mulf %328, %330 : vector<8x1024xf32>
    %c128_142 = arith.constant 128 : index
    %c0_143 = arith.constant 0 : index
    %332 = vector.load %arg12[%c128_142, %c0_143] : memref<216x1024xf32, #tpu.memory_space<vmem>>, vector<8x1024xf32>
    tpu.vector_store %arg12[%c128_142, %c0_143], %331 {strides = array<i32>} : memref<216x1024xf32, #tpu.memory_space<vmem>>, vector<8x1024xf32>,
    %333 = vector.extract_strided_slice %216 {offsets = [0, 9], sizes = [8, 1015], strides = [1, 1]} : vector<8x1024xf32> to vector<8x1015xf32>
    %334 = vector.extract_strided_slice %216 {offsets = [0, 0], sizes = [8, 9], strides = [1, 1]} : vector<8x1024xf32> to vector<8x9xf32>
    %335 = tpu.concatenate %333, %334 in 1 : vector<8x1015xf32>, vector<8x9xf32> -> vector<8x1024xf32>
    %c17_144 = arith.constant 17 : index
    %c0_145 = arith.constant 0 : index
    %336 = vector.load %arg2[%c17_144, %c0_145] : memref<27x1024xf32, #tpu.memory_space<vmem>>, vector<1x1024xf32>
    %337 = vector.broadcast %336 : vector<1x1024xf32> to vector<8x1024xf32>
    %338 = arith.mulf %335, %337 : vector<8x1024xf32>
    %c136_146 = arith.constant 136 : index
    %c0_147 = arith.constant 0 : index
    %339 = vector.load %arg12[%c136_146, %c0_147] : memref<216x1024xf32, #tpu.memory_space<vmem>>, vector<8x1024xf32>
    tpu.vector_store %arg12[%c136_146, %c0_147], %338 {strides = array<i32>} : memref<216x1024xf32, #tpu.memory_space<vmem>>, vector<8x1024xf32>,
    %340 = vector.extract_strided_slice %216 {offsets = [0, 55], sizes = [8, 969], strides = [1, 1]} : vector<8x1024xf32> to vector<8x969xf32>
    %341 = vector.extract_strided_slice %216 {offsets = [0, 0], sizes = [8, 55], strides = [1, 1]} : vector<8x1024xf32> to vector<8x55xf32>
    %342 = tpu.concatenate %340, %341 in 1 : vector<8x969xf32>, vector<8x55xf32> -> vector<8x1024xf32>
    %c18_148 = arith.constant 18 : index
    %c0_149 = arith.constant 0 : index
    %343 = vector.load %arg2[%c18_148, %c0_149] : memref<27x1024xf32, #tpu.memory_space<vmem>>, vector<1x1024xf32>
    %344 = vector.broadcast %343 : vector<1x1024xf32> to vector<8x1024xf32>
    %345 = arith.mulf %342, %344 : vector<8x1024xf32>
    %c144_150 = arith.constant 144 : index
    %c0_151 = arith.constant 0 : index
    %346 = vector.load %arg12[%c144_150, %c0_151] : memref<216x1024xf32, #tpu.memory_space<vmem>>, vector<8x1024xf32>
    tpu.vector_store %arg12[%c144_150, %c0_151], %345 {strides = array<i32>} : memref<216x1024xf32, #tpu.memory_space<vmem>>, vector<8x1024xf32>,
    %347 = vector.extract_strided_slice %216 {offsets = [0, 56], sizes = [8, 968], strides = [1, 1]} : vector<8x1024xf32> to vector<8x968xf32>
    %348 = vector.extract_strided_slice %216 {offsets = [0, 0], sizes = [8, 56], strides = [1, 1]} : vector<8x1024xf32> to vector<8x56xf32>
    %349 = tpu.concatenate %347, %348 in 1 : vector<8x968xf32>, vector<8x56xf32> -> vector<8x1024xf32>
    %c19_152 = arith.constant 19 : index
    %c0_153 = arith.constant 0 : index
    %350 = vector.load %arg2[%c19_152, %c0_153] : memref<27x1024xf32, #tpu.memory_space<vmem>>, vector<1x1024xf32>
    %351 = vector.broadcast %350 : vector<1x1024xf32> to vector<8x1024xf32>
    %352 = arith.mulf %349, %351 : vector<8x1024xf32>
    %c152_154 = arith.constant 152 : index
    %c0_155 = arith.constant 0 : index
    %353 = vector.load %arg12[%c152_154, %c0_155] : memref<216x1024xf32, #tpu.memory_space<vmem>>, vector<8x1024xf32>
    tpu.vector_store %arg12[%c152_154, %c0_155], %352 {strides = array<i32>} : memref<216x1024xf32, #tpu.memory_space<vmem>>, vector<8x1024xf32>,
    %354 = vector.extract_strided_slice %216 {offsets = [0, 57], sizes = [8, 967], strides = [1, 1]} : vector<8x1024xf32> to vector<8x967xf32>
    %355 = vector.extract_strided_slice %216 {offsets = [0, 0], sizes = [8, 57], strides = [1, 1]} : vector<8x1024xf32> to vector<8x57xf32>
    %356 = tpu.concatenate %354, %355 in 1 : vector<8x967xf32>, vector<8x57xf32> -> vector<8x1024xf32>
    %c20_156 = arith.constant 20 : index
    %c0_157 = arith.constant 0 : index
    %357 = vector.load %arg2[%c20_156, %c0_157] : memref<27x1024xf32, #tpu.memory_space<vmem>>, vector<1x1024xf32>
    %358 = vector.broadcast %357 : vector<1x1024xf32> to vector<8x1024xf32>
    %359 = arith.mulf %356, %358 : vector<8x1024xf32>
    %c160_158 = arith.constant 160 : index
    %c0_159 = arith.constant 0 : index
    %360 = vector.load %arg12[%c160_158, %c0_159] : memref<216x1024xf32, #tpu.memory_space<vmem>>, vector<8x1024xf32>
    tpu.vector_store %arg12[%c160_158, %c0_159], %359 {strides = array<i32>} : memref<216x1024xf32, #tpu.memory_space<vmem>>, vector<8x1024xf32>,
    %361 = vector.extract_strided_slice %216 {offsets = [0, 63], sizes = [8, 961], strides = [1, 1]} : vector<8x1024xf32> to vector<8x961xf32>
    %362 = vector.extract_strided_slice %216 {offsets = [0, 0], sizes = [8, 63], strides = [1, 1]} : vector<8x1024xf32> to vector<8x63xf32>
    %363 = tpu.concatenate %361, %362 in 1 : vector<8x961xf32>, vector<8x63xf32> -> vector<8x1024xf32>
    %c21_160 = arith.constant 21 : index
    %c0_161 = arith.constant 0 : index
    %364 = vector.load %arg2[%c21_160, %c0_161] : memref<27x1024xf32, #tpu.memory_space<vmem>>, vector<1x1024xf32>
    %365 = vector.broadcast %364 : vector<1x1024xf32> to vector<8x1024xf32>
    %366 = arith.mulf %363, %365 : vector<8x1024xf32>
    %c168_162 = arith.constant 168 : index
    %c0_163 = arith.constant 0 : index
    %367 = vector.load %arg12[%c168_162, %c0_163] : memref<216x1024xf32, #tpu.memory_space<vmem>>, vector<8x1024xf32>
    tpu.vector_store %arg12[%c168_162, %c0_163], %366 {strides = array<i32>} : memref<216x1024xf32, #tpu.memory_space<vmem>>, vector<8x1024xf32>,
    %368 = vector.extract_strided_slice %216 {offsets = [0, 64], sizes = [8, 960], strides = [1, 1]} : vector<8x1024xf32> to vector<8x960xf32>
    %369 = vector.extract_strided_slice %216 {offsets = [0, 0], sizes = [8, 64], strides = [1, 1]} : vector<8x1024xf32> to vector<8x64xf32>
    %370 = tpu.concatenate %368, %369 in 1 : vector<8x960xf32>, vector<8x64xf32> -> vector<8x1024xf32>
    %c22_164 = arith.constant 22 : index
    %c0_165 = arith.constant 0 : index
    %371 = vector.load %arg2[%c22_164, %c0_165] : memref<27x1024xf32, #tpu.memory_space<vmem>>, vector<1x1024xf32>
    %372 = vector.broadcast %371 : vector<1x1024xf32> to vector<8x1024xf32>
    %373 = arith.mulf %370, %372 : vector<8x1024xf32>
    %c176_166 = arith.constant 176 : index
    %c0_167 = arith.constant 0 : index
    %374 = vector.load %arg12[%c176_166, %c0_167] : memref<216x1024xf32, #tpu.memory_space<vmem>>, vector<8x1024xf32>
    tpu.vector_store %arg12[%c176_166, %c0_167], %373 {strides = array<i32>} : memref<216x1024xf32, #tpu.memory_space<vmem>>, vector<8x1024xf32>,
    %375 = vector.extract_strided_slice %216 {offsets = [0, 65], sizes = [8, 959], strides = [1, 1]} : vector<8x1024xf32> to vector<8x959xf32>
    %376 = vector.extract_strided_slice %216 {offsets = [0, 0], sizes = [8, 65], strides = [1, 1]} : vector<8x1024xf32> to vector<8x65xf32>
    %377 = tpu.concatenate %375, %376 in 1 : vector<8x959xf32>, vector<8x65xf32> -> vector<8x1024xf32>
    %c23_168 = arith.constant 23 : index
    %c0_169 = arith.constant 0 : index
    %378 = vector.load %arg2[%c23_168, %c0_169] : memref<27x1024xf32, #tpu.memory_space<vmem>>, vector<1x1024xf32>
    %379 = vector.broadcast %378 : vector<1x1024xf32> to vector<8x1024xf32>
    %380 = arith.mulf %377, %379 : vector<8x1024xf32>
    %c184_170 = arith.constant 184 : index
    %c0_171 = arith.constant 0 : index
    %381 = vector.load %arg12[%c184_170, %c0_171] : memref<216x1024xf32, #tpu.memory_space<vmem>>, vector<8x1024xf32>
    tpu.vector_store %arg12[%c184_170, %c0_171], %380 {strides = array<i32>} : memref<216x1024xf32, #tpu.memory_space<vmem>>, vector<8x1024xf32>,
    %382 = vector.extract_strided_slice %216 {offsets = [0, 71], sizes = [8, 953], strides = [1, 1]} : vector<8x1024xf32> to vector<8x953xf32>
    %383 = vector.extract_strided_slice %216 {offsets = [0, 0], sizes = [8, 71], strides = [1, 1]} : vector<8x1024xf32> to vector<8x71xf32>
    %384 = tpu.concatenate %382, %383 in 1 : vector<8x953xf32>, vector<8x71xf32> -> vector<8x1024xf32>
    %c24_172 = arith.constant 24 : index
    %c0_173 = arith.constant 0 : index
    %385 = vector.load %arg2[%c24_172, %c0_173] : memref<27x1024xf32, #tpu.memory_space<vmem>>, vector<1x1024xf32>
    %386 = vector.broadcast %385 : vector<1x1024xf32> to vector<8x1024xf32>
    %387 = arith.mulf %384, %386 : vector<8x1024xf32>
    %c192_174 = arith.constant 192 : index
    %c0_175 = arith.constant 0 : index
    %388 = vector.load %arg12[%c192_174, %c0_175] : memref<216x1024xf32, #tpu.memory_space<vmem>>, vector<8x1024xf32>
    tpu.vector_store %arg12[%c192_174, %c0_175], %387 {strides = array<i32>} : memref<216x1024xf32, #tpu.memory_space<vmem>>, vector<8x1024xf32>,
    %389 = vector.extract_strided_slice %216 {offsets = [0, 72], sizes = [8, 952], strides = [1, 1]} : vector<8x1024xf32> to vector<8x952xf32>
    %390 = vector.extract_strided_slice %216 {offsets = [0, 0], sizes = [8, 72], strides = [1, 1]} : vector<8x1024xf32> to vector<8x72xf32>
    %391 = tpu.concatenate %389, %390 in 1 : vector<8x952xf32>, vector<8x72xf32> -> vector<8x1024xf32>
    %c25_176 = arith.constant 25 : index
    %c0_177 = arith.constant 0 : index
    %392 = vector.load %arg2[%c25_176, %c0_177] : memref<27x1024xf32, #tpu.memory_space<vmem>>, vector<1x1024xf32>
    %393 = vector.broadcast %392 : vector<1x1024xf32> to vector<8x1024xf32>
    %394 = arith.mulf %391, %393 : vector<8x1024xf32>
    %c200_178 = arith.constant 200 : index
    %c0_179 = arith.constant 0 : index
    %395 = vector.load %arg12[%c200_178, %c0_179] : memref<216x1024xf32, #tpu.memory_space<vmem>>, vector<8x1024xf32>
    tpu.vector_store %arg12[%c200_178, %c0_179], %394 {strides = array<i32>} : memref<216x1024xf32, #tpu.memory_space<vmem>>, vector<8x1024xf32>,
    %396 = vector.extract_strided_slice %216 {offsets = [0, 73], sizes = [8, 951], strides = [1, 1]} : vector<8x1024xf32> to vector<8x951xf32>
    %397 = vector.extract_strided_slice %216 {offsets = [0, 0], sizes = [8, 73], strides = [1, 1]} : vector<8x1024xf32> to vector<8x73xf32>
    %398 = tpu.concatenate %396, %397 in 1 : vector<8x951xf32>, vector<8x73xf32> -> vector<8x1024xf32>
    %c26_180 = arith.constant 26 : index
    %c0_181 = arith.constant 0 : index
    %399 = vector.load %arg2[%c26_180, %c0_181] : memref<27x1024xf32, #tpu.memory_space<vmem>>, vector<1x1024xf32>
    %400 = vector.broadcast %399 : vector<1x1024xf32> to vector<8x1024xf32>
    %401 = arith.mulf %398, %400 : vector<8x1024xf32>
    %c208_182 = arith.constant 208 : index
    %c0_183 = arith.constant 0 : index
    %402 = vector.load %arg12[%c208_182, %c0_183] : memref<216x1024xf32, #tpu.memory_space<vmem>>, vector<8x1024xf32>
    tpu.vector_store %arg12[%c208_182, %c0_183], %401 {strides = array<i32>} : memref<216x1024xf32, #tpu.memory_space<vmem>>, vector<8x1024xf32>,
    %c0_184 = arith.constant 0 : index
    %c0_185 = arith.constant 0 : index
    %403 = vector.load %arg7[%c0_184, %c0_185] : memref<8x216xf32, #tpu.memory_space<vmem>>, vector<8x216xf32>
    %c0_186 = arith.constant 0 : index
    %c0_187 = arith.constant 0 : index
    %404 = vector.load %arg12[%c0_186, %c0_187] : memref<216x1024xf32, #tpu.memory_space<vmem>>, vector<216x1024xf32>
    %cst_188 = arith.constant dense<0.000000e+00> : vector<8x1024xf32>
    %405 = tpu.matmul %403, %404, %cst_188 {dimension_numbers = #tpu.dot_dimension_numbers<[1], [0], [0], [1], [0, 0, 1, 1], [], []>} : vector<8x216xf32>, vector<216x1024xf32>, vector<8x1024xf32> -> vector<8x1024xf32>
    %c0_189 = arith.constant 0 : index
    %c0_190 = arith.constant 0 : index
    %406 = vector.load %arg8[%c0_189, %c0_190] : memref<8x1xf32, #tpu.memory_space<vmem>>, vector<8x1xf32>
    %407 = vector.broadcast %406 : vector<8x1xf32> to vector<8x1024xf32>
    %408 = arith.addf %405, %407 : vector<8x1024xf32>
    %cst_191 = arith.constant dense<0.000000e+00> : vector<8xf32>
    %409 = vector.multi_reduction <add>, %408, %cst_191 [1] : vector<8x1024xf32> to vector<8xf32>
    %410 = vector.shape_cast %409 : vector<8xf32> to vector<8x1xf32>
    %cst_192 = arith.constant 1.024000e+03 : f32
    %411 = vector.broadcast %cst_192 : f32 to vector<8x1xf32>
    %412 = arith.divf %410, %411 : vector<8x1xf32>
    %413 = vector.broadcast %412 : vector<8x1xf32> to vector<8x1024xf32>
    %414 = arith.subf %408, %413 : vector<8x1024xf32>
    %415 = arith.mulf %414, %414 : vector<8x1024xf32>
    %cst_193 = arith.constant dense<0.000000e+00> : vector<8xf32>
    %416 = vector.multi_reduction <add>, %415, %cst_193 [1] : vector<8x1024xf32> to vector<8xf32>
    %417 = vector.shape_cast %416 : vector<8xf32> to vector<8x1xf32>
    %cst_194 = arith.constant 1.024000e+03 : f32
    %418 = vector.broadcast %cst_194 : f32 to vector<8x1xf32>
    %419 = arith.divf %417, %418 : vector<8x1xf32>
    %cst_195 = arith.constant 9.99999974E-6 : f32
    %420 = vector.broadcast %cst_195 : f32 to vector<8x1xf32>
    %421 = arith.addf %419, %420 : vector<8x1xf32>
    %422 = math.rsqrt %421 : vector<8x1xf32>
    %423 = vector.broadcast %422 : vector<8x1xf32> to vector<8x1024xf32>
    %424 = arith.mulf %414, %423 : vector<8x1024xf32>
    %c0_196 = arith.constant 0 : index
    %c0_197 = arith.constant 0 : index
    %425 = vector.load %arg9[%c0_196, %c0_197] : memref<8x1xf32, #tpu.memory_space<vmem>>, vector<8x1xf32>
    %426 = vector.broadcast %425 : vector<8x1xf32> to vector<8x1024xf32>
    %427 = arith.mulf %424, %426 : vector<8x1024xf32>
    %c0_198 = arith.constant 0 : index
    %c0_199 = arith.constant 0 : index
    %428 = vector.load %arg10[%c0_198, %c0_199] : memref<8x1xf32, #tpu.memory_space<vmem>>, vector<8x1xf32>
    %429 = vector.broadcast %428 : vector<8x1xf32> to vector<8x1024xf32>
    %430 = arith.addf %427, %429 : vector<8x1024xf32>
    %431 = arith.addf %0, %430 : vector<8x1024xf32>
    %c0_200 = arith.constant 0 : index
    %c0_201 = arith.constant 0 : index
    %432 = vector.load %arg11[%c0_200, %c0_201] : memref<8x1024xf32, #tpu.memory_space<vmem>>, vector<8x1024xf32>
    tpu.vector_store %arg11[%c0_200, %c0_201], %431 {strides = array<i32>} : memref<8x1024xf32, #tpu.memory_space<vmem>>, vector<8x1024xf32>,
    return
  }
  func.func @transform_0(%arg0: i32) -> (i32, i32) {
    %c0_i32 = arith.constant 0 : i32
    %c0_i32_0 = arith.constant 0 : i32
    %c0_i32_1 = arith.constant 0 : i32
    return %c0_i32, %c0_i32_0 : i32, i32
  }
  func.func @transform_1(%arg0: i32) -> (i32, i32) {
    %c0_i32 = arith.constant 0 : i32
    %c0_i32_0 = arith.constant 0 : i32
    %c0_i32_1 = arith.constant 0 : i32
    return %c0_i32, %c0_i32_0 : i32, i32
  }
  func.func @transform_2(%arg0: i32) -> (i32, i32) {
    %c0_i32 = arith.constant 0 : i32
    %c0_i32_0 = arith.constant 0 : i32
    %c0_i32_1 = arith.constant 0 : i32
    return %c0_i32, %c0_i32_0 : i32, i32
  }
  func.func @transform_3(%arg0: i32) -> (i32, i32) {
    %c0_i32 = arith.constant 0 : i32
    %c0_i32_0 = arith.constant 0 : i32
    %c0_i32_1 = arith.constant 0 : i32
    return %c0_i32, %c0_i32_0 : i32, i32
  }
  func.func @transform_4(%arg0: i32) -> (i32, i32) {
    %c0_i32 = arith.constant 0 : i32
    %c0_i32_0 = arith.constant 0 : i32
    %c0_i32_1 = arith.constant 0 : i32
    return %c0_i32, %c0_i32_0 : i32, i32
  }
  func.func @transform_5(%arg0: i32) -> (i32, i32) {
    %c0_i32 = arith.constant 0 : i32
    %c0_i32_0 = arith.constant 0 : i32
    %c0_i32_1 = arith.constant 0 : i32
    return %c0_i32, %c0_i32_0 : i32, i32
  }
  func.func @transform_6(%arg0: i32) -> (i32, i32) {
    %c0_i32 = arith.constant 0 : i32
    %c0_i32_0 = arith.constant 0 : i32
    %c0_i32_1 = arith.constant 0 : i32
    return %c0_i32, %c0_i32_0 : i32, i32
  }
  func.func @transform_7(%arg0: i32) -> (i32, i32) {
    %c0_i32 = arith.constant 0 : i32
    %c0_i32_0 = arith.constant 0 : i32
    %c0_i32_1 = arith.constant 0 : i32
    return %c0_i32, %c0_i32_0 : i32, i32
  }
  func.func @transform_8(%arg0: i32) -> (i32, i32) {
    %c0_i32 = arith.constant 0 : i32
    %c0_i32_0 = arith.constant 0 : i32
    %c0_i32_1 = arith.constant 0 : i32
    return %c0_i32, %c0_i32_0 : i32, i32
  }
  func.func @transform_9(%arg0: i32) -> (i32, i32) {
    %c0_i32 = arith.constant 0 : i32
    %c0_i32_0 = arith.constant 0 : i32
    %c0_i32_1 = arith.constant 0 : i32
    return %c0_i32, %c0_i32_0 : i32, i32
  }
  func.func @transform_10(%arg0: i32) -> (i32, i32) {
    %c0_i32 = arith.constant 0 : i32
    %c0_i32_0 = arith.constant 0 : i32
    %c0_i32_1 = arith.constant 0 : i32
    return %c0_i32, %c0_i32_0 : i32, i32
  }
}

</mosaic_0001>

<bundles_post_ra>
// kernel: res_block_forward.1
= control target key start
LH: loop header
LB: loop body
LE: loop exit
PB: predicated region body
PF: predicated region fallthrough
CT: control target
= control target key end

     0   :  { %s4627_s19 = smov 73   ;;  %s8237_s30 = smov 72   ;;  %vm68_vm0 = vcmask 596992   ;;  %vm138_vm1 = vcmask 588800   ;;  %vm209_vm2 = vcmask 580608   ;;  %vm280_vm3 = vcmask 531456   ;;  %s8169_s0 = inlined_call_operand.vmem [shape: f32[8,1024], index: 0, kind: input, shape index: {}]   ;;  %s8170_s1 = inlined_call_operand.vmem [shape: f32[27,1024], index: 1, kind: input, shape index: {}]   ;;  %s8171_s2 = inlined_call_operand.vmem [shape: f32[8,216], index: 2, kind: input, shape index: {}]   ;;  %s8172_s3 = inlined_call_operand.vmem [shape: f32[8,1], index: 3, kind: input, shape index: {}]   ;;  %s8173_s4 = inlined_call_operand.vmem [shape: f32[8,1], index: 4, kind: input, shape index: {}]   ;;  %s8174_s5 = inlined_call_operand.vmem [shape: f32[8,1], index: 5, kind: input, shape index: {}]   ;;  %s8175_s6 = inlined_call_operand.vmem [shape: f32[8,216], index: 6, kind: input, shape index: {}]   ;;  %s8176_s7 = inlined_call_operand.vmem [shape: f32[8,1], index: 7, kind: input, shape index: {}]   ;;  %s8177_s8 = inlined_call_operand.vmem [shape: f32[8,1], index: 8, kind: input, shape index: {}]   ;;  %s8178_s9 = inlined_call_operand.vmem [shape: f32[8,1], index: 9, kind: input, shape index: {}]   ;;  %s8179_s10 = inlined_call_operand.vmem [shape: f32[8,1024], index: 10, kind: output, shape index: {}]  }
   0x1   :  { %v4704_v0 = vld [vmem:[%s8169_s0 + $0x38] sm:$0xff]  ;;  %v4714_v2 = vld [vmem:[%s8169_s0 + $0x8] sm:$0xff]  ;;  %v4725_v3 = vld [vmem:[%s8169_s0 + $0x20] sm:$0xff]  ;;  %s8235_s11 = smov 71   ;;  %s8186_s12 = smov 65   ;;  %vm351_vm4 = vcmask 523264  }
   0x2   :  { %v4709_v1 = vld [vmem:[%s8169_s0 + $0x18] sm:$0xff]  ;;  %44 = vrot.lane.b32.xlu0 %v4704_v0, %s4627_s19  ;;  %56 = vrot.lane.b32.xlu1 %v4714_v2, %s4627_s19  ;;  %v4730_v4 = vld [vmem:[%s8169_s0] sm:$0xff]  ;;  %s8189_s13 = smov 64   ;;  %s8191_s18 = smov 63   ;;  %vm422_vm5 = vcmask 515072   ;;  %vm1097_vm6 = vcmask 990208  }
   0x3   :  { %60 = vrot.lane.b32.xlu2 %v4709_v1, %s4627_s19  ;;  %v4735_v5 = vld [vmem:[%s8169_s0 + $0x10] sm:$0xff]  ;;  %v4746_v6 = vld [vmem:[%s8169_s0 + $0x28] sm:$0xff]  ;;  %s4633_s24 = smov 127   ;;  %s4634_s25 = smov 121   ;;  %vm8323_vm7 = vcmask 1039360   ;;  %vm8288_vm8 = vcmask 7168  }
   0x4   :  { %v4751_v7 = vld [vmem:[%s8169_s0 + $0x30] sm:$0xff]  ;;  %s4635_s20 = smov 1   ;;  %s4636_s21 = smov 55   ;;  %vm8322_vm9 = vcmask 449536   ;;  %vm8272_vm10 = vcmask 56320   ;;  %vm564_vm11 = vcmask 457728  }
   0x5   :  { %v85_v8 = vld [vmem:[%s8170_s1] ss:$8 sm:$0xf]  ;;  %v4498_v20 = vld [vmem:[%s8170_s1 + $0x82] ss:$8 sm:$0xf] }
   0x6   :  { %v86_v9 = vld [vmem:[%s8170_s1] ss:$8 sm:$0xf0]  ;;  %v4499_v21 = vld [vmem:[%s8170_s1 + $0x82] ss:$8 sm:$0xf0] }
   0x7   :  { %v4821_v11 = vor.u32 %v86_v9, %v85_v8  ;;  %v4866_v22 = vor.u32 %v4499_v21, %v4498_v20  ;;  %v4500_v32 = vld [vmem:[%s8170_s1 + $0x83] ss:$8 sm:$0xf]  ;;  %v4464_v37 = vld [vmem:[%s8170_s1 + $0x1] ss:$8 sm:$0xf] }
   0x8   :  { %v4501_v33 = vld [vmem:[%s8170_s1 + $0x83] ss:$8 sm:$0xf0]  ;;  %v4465_v38 = vld [vmem:[%s8170_s1 + $0x1] ss:$8 sm:$0xf0] }
   0x9   :  { %8421 = vst [vmem:[#allocation4_spill] sm:$0xff] %v4821_v11  ;;  %v93_v12 = vperm.slane %v4821_v11, 4  ;;  %v1306_v23 = vperm.slane %v4866_v22, 7  ;;  %v91_v26 = vperm.slane %v4821_v11, 2  ;;  %v4922_v39 = vor.u32 %v4501_v33, %v4500_v32  ;;  %s4637_s28 = smov 7   ;;  %s4638_s17 = smov 8  }
   0xa   :  { %54 = vrot.lane.b32.xlu0 %v4730_v4, %s4627_s19  ;;  %58 = vrot.lane.b32.xlu1 %v4735_v5, %s4627_s19  ;;  %8428 = vst [vmem:[#allocation11_spill] sm:$0xff] %v4866_v22  ;;  %v4924_v40 = vor.u32 %v4465_v38, %v4464_v37  ;;  %v4502_v53 = vld [vmem:[%s8170_s1 + $0x84] ss:$8 sm:$0xf]  ;;  %s4639_s22 = smov 56   ;;  %s4640_s14 = smov 9  }
   0xb   :  { %62 = vrot.lane.b32.xlu2 %v4725_v3, %s4627_s19  ;;  %8436 = vst [vmem:[#allocation19_spill] sm:$0xff] %v4922_v39  ;;  %v1343_v41 = vperm.slane %v4922_v39, 7  ;;  %v4503_v54 = vld [vmem:[%s8170_s1 + $0x84] ss:$8 sm:$0xf0]  ;;  %s4641_s15 = smov 57  }
   0xc   :  { %8437 = vst [vmem:[#allocation20_spill] sm:$0xff] %v4924_v40  ;;  %v162_v44 = vperm.slane %v4924_v40, 2  ;;  %v164_v50 = vperm.slane %v4924_v40, 4  ;;  %v4980_v57 = vor.u32 %v4503_v54, %v4502_v53  ;;  %v4466_v63 = vld [vmem:[%s8170_s1 + $0x2] ss:$8 sm:$0xf] }
   0xd   :  { %v4467_v8 = vld [vmem:[%s8170_s1 + $0x2] ss:$8 sm:$0xf0]  ;;  %v4505_v53 = vld [vmem:[%s8170_s1 + $0x85] ss:$8 sm:$0xf0] }
   0xe   :  { %8446 = vst [vmem:[#allocation29_spill] sm:$0xff] %v4980_v57  ;;  %v1380_v59 = vperm.slane %v4980_v57, 7  ;;  %v5012_v20 = vor.u32 %v4467_v8, %v4466_v63  ;;  %s4642_s16 = smov 119   ;;  %s4643_s26 = smov 120   ;;  %vm777_vm12 = vcmask 64512   ;;  %vm493_vm13 = vcmask 465920  }
   0xf   :  { %vm706_vm14 = vcmask 72704   ;;  %vm1239_vm15 = vcmask 973824  }
  0x10   :  { %8452 = vst [vmem:[#allocation35_spill] sm:$0xff] %v5012_v20  ;;  %v233_v21 = vperm.slane %v5012_v20, 2  ;;  %v235_v38 = vperm.slane %v5012_v20, 4 }
  0x12   :  { %64 = vrot.lane.b32.xlu0 %v4746_v6, %s4627_s19  ;;  %66 = vrot.lane.b32.xlu1 %v4751_v7, %s4627_s19 }
  0x13   :  { %121 = vrot.lane.b32.xlu2 %v4704_v0, %s8237_s30 }
  0x1a   :  { %124 = vrot.lane.b32.xlu0 %v4730_v4, %s8237_s30  ;;  %126 = vrot.lane.b32.xlu1 %v4714_v2, %s8237_s30 }
  0x1b   :  { %128 = vrot.lane.b32.xlu2 %v4735_v5, %s8237_s30 }
  0x22   :  { %130 = vrot.lane.b32.xlu0 %v4709_v1, %s8237_s30  ;;  %132 = vrot.lane.b32.xlu1 %v4725_v3, %s8237_s30 }
  0x23   :  { %134 = vrot.lane.b32.xlu2 %v4746_v6, %s8237_s30 }
  0x2a   :  { %136 = vrot.lane.b32.xlu0 %v4751_v7, %s8237_s30  ;;  %192 = vrot.lane.b32.xlu1 %v4704_v0, %s8235_s11 }
  0x2b   :  { %195 = vrot.lane.b32.xlu2 %v4730_v4, %s8235_s11 }
  0x32   :  { %197 = vrot.lane.b32.xlu0 %v4714_v2, %s8235_s11  ;;  %199 = vrot.lane.b32.xlu1 %v4735_v5, %s8235_s11 }
  0x33   :  { %201 = vrot.lane.b32.xlu2 %v4709_v1, %s8235_s11 }
  0x3a   :  { %203 = vrot.lane.b32.xlu0 %v4725_v3, %s8235_s11  ;;  %205 = vrot.lane.b32.xlu1 %v4746_v6, %s8235_s11 }
  0x3b   :  { %207 = vrot.lane.b32.xlu2 %v4751_v7, %s8235_s11  ;;  %s8741_s11 = smov 71  }
  0x42   :  { %263 = vrot.lane.b32.xlu0 %v4704_v0, %s8186_s12  ;;  %266 = vrot.lane.b32.xlu1 %v4730_v4, %s8186_s12 }
  0x43   :  { %268 = vrot.lane.b32.xlu2 %v4714_v2, %s8186_s12 }
  0x4a   :  { %270 = vrot.lane.b32.xlu0 %v4735_v5, %s8186_s12  ;;  %272 = vrot.lane.b32.xlu1 %v4709_v1, %s8186_s12 }
  0x4b   :  { %274 = vrot.lane.b32.xlu2 %v4725_v3, %s8186_s12 }
  0x52   :  { %276 = vrot.lane.b32.xlu0 %v4746_v6, %s8186_s12  ;;  %278 = vrot.lane.b32.xlu1 %v4751_v7, %s8186_s12 }
  0x53   :  { %334 = vrot.lane.b32.xlu2 %v4704_v0, %s8189_s13 }
  0x5a   :  { %337 = vrot.lane.b32.xlu0 %v4730_v4, %s8189_s13  ;;  %339 = vrot.lane.b32.xlu1 %v4714_v2, %s8189_s13 }
  0x5b   :  { %341 = vrot.lane.b32.xlu2 %v4735_v5, %s8189_s13 }
  0x5d   :  { %v4819_v10 = vpop.permute.xlu2 %60 }
  0x5e   :  { %8420 = vst [vmem:[#allocation3_spill] sm:$0xff] %v4819_v10 }
  0x62   :  { %343 = vrot.lane.b32.xlu0 %v4709_v1, %s8189_s13  ;;  %345 = vrot.lane.b32.xlu1 %v4725_v3, %s8189_s13 }
  0x63   :  { %347 = vrot.lane.b32.xlu2 %v4746_v6, %s8189_s13 }
  0x65   :  { %v4830_v13 = vpop.permute.xlu2 %62 }
  0x66   :  { %8422 = vst [vmem:[#allocation5_spill] sm:$0xff] %v4830_v13  ;;  %v4835_v14 = vsel %vm68_vm0, %v4819_v10, %v4830_v13 }
  0x67   :  { %8423 = vst [vmem:[#allocation6_spill] sm:$0xff] %v4835_v14  ;;  %v4838_v15 = vmul.f32 %v93_v12, %v4835_v14 }
  0x69   :  { %8424 = vst [vmem:[#allocation7_spill] sm:$0xff] %v4838_v15 }
  0x6a   :  { %349 = vrot.lane.b32.xlu0 %v4751_v7, %s8189_s13  ;;  %405 = vrot.lane.b32.xlu1 %v4704_v0, %s8191_s18 }
  0x6b   :  { %408 = vrot.lane.b32.xlu2 %v4730_v4, %s8191_s18 }
  0x6d   :  { %v4846_v16 = vpop.permute.xlu2 %121 }
  0x6e   :  { %8425 = vst [vmem:[#allocation8_spill] sm:$0xff] %v4846_v16 }
  0x72   :  { %410 = vrot.lane.b32.xlu0 %v4714_v2, %s8191_s18  ;;  %412 = vrot.lane.b32.xlu1 %v4735_v5, %s8191_s18 }
  0x73   :  { %414 = vrot.lane.b32.xlu2 %v4709_v1, %s8191_s18 }
  0x74   :  { %v4854_v17 = vpop.permute.xlu0 %44  ;;  %v4858_v19 = vpop.permute.xlu1 %56 }
  0x75   :  { %8426 = vst [vmem:[#allocation9_spill] sm:$0xff] %v4854_v17  ;;  %v4856_v18 = vpop.permute.xlu2 %128 }
  0x76   :  { %8427 = vst [vmem:[#allocation10_spill] sm:$0xff] %v4856_v18 }
  0x7a   :  { %416 = vrot.lane.b32.xlu0 %v4725_v3, %s8191_s18  ;;  %418 = vrot.lane.b32.xlu1 %v4746_v6, %s8191_s18 }
  0x7b   :  { %420 = vrot.lane.b32.xlu2 %v4751_v7, %s8191_s18 }
  0x7c   :  { %v4877_v25 = vpop.permute.xlu0 %54  ;;  %v4880_v27 = vpop.permute.xlu1 %58 }
  0x7d   :  { %v4875_v24 = vpop.permute.xlu2 %134  ;;  %8430 = vst [vmem:[#allocation13_spill] sm:$0xff] %v4880_v27  ;;  %v4885_v28 = vsel %vm68_vm0, %v4854_v17, %v4877_v25  ;;  %v4890_v29 = vsel %vm68_vm0, %v4858_v19, %v4880_v27 }
  0x7e   :  { %8429 = vst [vmem:[#allocation12_spill] sm:$0xff] %v4875_v24  ;;  %v4893_v30 = vmul.f32 %v1306_v23, %v4885_v28  ;;  %v4896_v31 = vmul.f32 %v91_v26, %v4890_v29 }
  0x7f   :  { %8431 = vst [vmem:[#allocation14_spill] sm:$0xff] %v4885_v28 }
  0x80   :  { %8432 = vst [vmem:[#allocation15_spill] sm:$0xff] %v4893_v30 }
  0x81   :  { %8433 = vst [vmem:[#allocation16_spill] sm:$0xff] %v4896_v31 }
  0x82   :  { %1083 = vrot.lane.b32.xlu0 %v4714_v2, %s4634_s25  ;;  %1085 = vrot.lane.b32.xlu1 %v4735_v5, %s4634_s25 }
  0x83   :  { %1012 = vrot.lane.b32.xlu2 %v4714_v2, %s4633_s24 }
  0x84   :  { %v4912_v35 = vpop.permute.xlu0 %64  ;;  %v4914_v36 = vpop.permute.xlu1 %66 }
  0x85   :  { %v4910_v34 = vpop.permute.xlu2 %195  ;;  %8434 = vst [vmem:[#allocation17_spill] sm:$0xff] %v4912_v35 }
  0x86   :  { %8435 = vst [vmem:[#allocation18_spill] sm:$0xff] %v4914_v36  ;;  %v4470_v36 = vld [vmem:[%s8170_s1 + $0x4] ss:$8 sm:$0xf] }
  0x8a   :  { %1014 = vrot.lane.b32.xlu0 %v4735_v5, %s4633_s24  ;;  %1081 = vrot.lane.b32.xlu1 %v4730_v4, %s4634_s25 }
  0x8b   :  { %905 = vrot.lane.b32.xlu2 %v4730_v4, %s4635_s20 }
  0x8c   :  { %v4935_v43 = vpop.permute.xlu0 %124  ;;  %v4938_v45 = vpop.permute.xlu1 %126 }
  0x8d   :  { %v4933_v42 = vpop.permute.xlu2 %201  ;;  %v4943_v46 = vsel %vm138_vm1, %v4846_v16, %v4935_v43  ;;  %v4948_v47 = vsel %vm138_vm1, %v4938_v45, %v4856_v18 }
  0x8e   :  { %8438 = vst [vmem:[#allocation21_spill] sm:$0xff] %v4933_v42  ;;  %v4951_v48 = vmul.f32 %v1343_v41, %v4943_v46  ;;  %v4954_v49 = vmul.f32 %v162_v44, %v4948_v47 }
  0x8f   :  { %8439 = vst [vmem:[#allocation22_spill] sm:$0xff] %v4943_v46 }
  0x90   :  { %8440 = vst [vmem:[#allocation23_spill] sm:$0xff] %v4951_v48  ;;  %v4469_v48 = vld [vmem:[%s8170_s1 + $0x3] ss:$8 sm:$0xf0] }
  0x91   :  { %8441 = vst [vmem:[#allocation24_spill] sm:$0xff] %v4954_v49 }
  0x92   :  { %907 = vrot.lane.b32.xlu0 %v4714_v2, %s4635_s20  ;;  %1010 = vrot.lane.b32.xlu1 %v4730_v4, %s4633_s24 }
  0x93   :  { %623 = vrot.lane.b32.xlu2 %v4714_v2, %s4636_s21 }
  0x94   :  { %v4965_v52 = vpop.permute.xlu0 %130  ;;  %v4973_v55 = vpop.permute.xlu1 %132 }
  0x95   :  { %v4963_v51 = vpop.permute.xlu2 %207  ;;  %8443 = vst [vmem:[#allocation26_spill] sm:$0xff] %v4965_v52  ;;  %v4978_v56 = vsel %vm138_vm1, %v4965_v52, %v4973_v55 }
  0x96   :  { %8442 = vst [vmem:[#allocation25_spill] sm:$0xff] %v4963_v51  ;;  %v4983_v58 = vmul.f32 %v164_v50, %v4978_v56  ;;  %v4504_v50 = vld [vmem:[%s8170_s1 + $0x85] ss:$8 sm:$0xf] }
  0x97   :  { %8444 = vst [vmem:[#allocation27_spill] sm:$0xff] %v4973_v55  ;;  %v5059_v63 = vor.u32 %v4505_v53, %v4504_v50  ;;  %v4468_v53 = vld [vmem:[%s8170_s1 + $0x3] ss:$8 sm:$0xf] }
  0x98   :  { %8445 = vst [vmem:[#allocation28_spill] sm:$0xff] %v4978_v56  ;;  %v5091_v17 = vor.u32 %v4469_v48, %v4468_v53  ;;  %v4471_v55 = vld [vmem:[%s8170_s1 + $0x4] ss:$8 sm:$0xf0] }
  0x99   :  { %8447 = vst [vmem:[#allocation30_spill] sm:$0xff] %v4983_v58 }
  0x9a   :  { %625 = vrot.lane.b32.xlu0 %v4735_v5, %s4636_s21  ;;  %834 = vrot.lane.b32.xlu1 %v4730_v4, %s4637_s28  ;;  %8465 = vst [vmem:[#allocation48_spill] sm:$0xff] %v5091_v17 }
  0x9b   :  { %836 = vrot.lane.b32.xlu2 %v4714_v2, %s4637_s28 }
  0x9c   :  { %v4994_v61 = vpop.permute.xlu0 %136  ;;  %v4996_v62 = vpop.permute.xlu1 %192 }
  0x9d   :  { %v4992_v60 = vpop.permute.xlu2 %268  ;;  %8448 = vst [vmem:[#allocation31_spill] sm:$0xff] %v4994_v61  ;;  %v5007_v9 = vsel %vm209_vm2, %v4996_v62, %v4910_v34  ;;  %v4506_v61 = vld [vmem:[%s8170_s1 + $0x86] ss:$8 sm:$0xf] }
  0x9e   :  { %8449 = vst [vmem:[#allocation32_spill] sm:$0xff] %v4996_v62  ;;  %v5010_v12 = vmul.f32 %v1380_v59, %v5007_v9  ;;  %v306_v62 = vperm.slane %v5091_v17, 4 }
  0x9f   :  { %8450 = vst [vmem:[#allocation33_spill] sm:$0xff] %v5007_v9 }
  0xa0   :  { %8451 = vst [vmem:[#allocation34_spill] sm:$0xff] %v5010_v12 }
  0xa2   :  { %552 = vrot.lane.b32.xlu0 %v4714_v2, %s4639_s22  ;;  %554 = vrot.lane.b32.xlu1 %v4735_v5, %s4639_s22 }
  0xa3   :  { %763 = vrot.lane.b32.xlu2 %v4730_v4, %s4638_s17 }
  0xa4   :  { %v5023_v26 = vpop.permute.xlu0 %197  ;;  %v5025_v32 = vpop.permute.xlu1 %199 }
  0xa5   :  { %v5021_v23 = vpop.permute.xlu2 %274  ;;  %8454 = vst [vmem:[#allocation37_spill] sm:$0xff] %v5025_v32  ;;  %v5030_v33 = vsel %vm209_vm2, %v5023_v26, %v5025_v32 }
  0xa6   :  { %8453 = vst [vmem:[#allocation36_spill] sm:$0xff] %v5021_v23  ;;  %v5033_v37 = vmul.f32 %v233_v21, %v5030_v33  ;;  %v1417_v21 = vperm.slane %v5059_v63, 7 }
  0xa8   :  { %8455 = vst [vmem:[#allocation38_spill] sm:$0xff] %v5033_v37 }
  0xaa   :  { %765 = vrot.lane.b32.xlu0 %v4714_v2, %s4638_s17  ;;  %1087 = vrot.lane.b32.xlu1 %v4709_v1, %s4634_s25 }
  0xab   :  { %902 = vrot.lane.b32.xlu2 %v4704_v0, %s4635_s20 }
  0xac   :  { %v5044_v44 = vpop.permute.xlu0 %203  ;;  %v5052_v54 = vpop.permute.xlu1 %205 }
  0xad   :  { %v5042_v41 = vpop.permute.xlu2 %334  ;;  %8457 = vst [vmem:[#allocation40_spill] sm:$0xff] %v5044_v44  ;;  %v5057_v59 = vsel %vm209_vm2, %v4933_v42, %v5044_v44 }
  0xae   :  { %8456 = vst [vmem:[#allocation39_spill] sm:$0xff] %v5042_v41  ;;  %v5062_v8 = vmul.f32 %v235_v38, %v5057_v59 }
  0xaf   :  { %8458 = vst [vmem:[#allocation41_spill] sm:$0xff] %v5052_v54 }
  0xb0   :  { %8459 = vst [vmem:[#allocation42_spill] sm:$0xff] %v5057_v59 }
  0xb1   :  { %8460 = vst [vmem:[#allocation43_spill] sm:$0xff] %v5062_v8 }
  0xb2   :  { %481 = vrot.lane.b32.xlu0 %v4714_v2, %s4641_s15  ;;  %483 = vrot.lane.b32.xlu1 %v4735_v5, %s4641_s15 }
  0xb3   :  { %692 = vrot.lane.b32.xlu2 %v4730_v4, %s4640_s14 }
  0xb4   :  { %v5073_v50 = vpop.permute.xlu0 %263  ;;  %v5075_v38 = vpop.permute.xlu1 %266 }
  0xb5   :  { %v5071_v30 = vpop.permute.xlu2 %341  ;;  %8462 = vst [vmem:[#allocation45_spill] sm:$0xff] %v5073_v50  ;;  %v5086_v12 = vsel %vm280_vm3, %v5073_v50, %v5075_v38 }
  0xb6   :  { %8461 = vst [vmem:[#allocation44_spill] sm:$0xff] %v5071_v30  ;;  %v5089_v16 = vmul.f32 %v1417_v21, %v5086_v12  ;;  %v304_v21 = vperm.slane %v5091_v17, 2 }
  0xb7   :  { %8463 = vst [vmem:[#allocation46_spill] sm:$0xff] %v5086_v12 }
  0xb8   :  { %8464 = vst [vmem:[#allocation47_spill] sm:$0xff] %v5089_v16 }
  0xba   :  { %694 = vrot.lane.b32.xlu0 %v4714_v2, %s4640_s14  ;;  %1016 = vrot.lane.b32.xlu1 %v4709_v1, %s4633_s24 }
  0xbb   :  { %1089 = vrot.lane.b32.xlu2 %v4725_v3, %s4634_s25 }
  0xbc   :  { %v5102_v58 = vpop.permute.xlu0 %270  ;;  %v5105_v16 = vpop.permute.xlu1 %272 }
  0xbd   :  { %v5100_v15 = vpop.permute.xlu2 %347  ;;  %8467 = vst [vmem:[#allocation50_spill] sm:$0xff] %v5102_v58  ;;  %v5110_v48 = vsel %vm280_vm3, %v4992_v60, %v5102_v58  ;;  %v5115_v53 = vsel %vm280_vm3, %v5105_v16, %v5021_v23  ;;  %v5149_v23 = vor.u32 %v4471_v55, %v4470_v36 }
  0xbe   :  { %8466 = vst [vmem:[#allocation49_spill] sm:$0xff] %v5100_v15  ;;  %v5118_v8 = vmul.f32 %v306_v62, %v5115_v53  ;;  %v5121_v50 = vmul.f32 %v304_v21, %v5110_v48  ;;  %v4507_v62 = vld [vmem:[%s8170_s1 + $0x86] ss:$8 sm:$0xf0] }
  0xbf   :  { %8468 = vst [vmem:[#allocation51_spill] sm:$0xff] %v5105_v16  ;;  %v5147_v24 = vor.u32 %v4507_v62, %v4506_v61  ;;  %v375_v61 = vperm.slane %v5149_v23, 2  ;;  %v4489_v16 = vld [vmem:[%s8170_s1 + $0x45] ss:$8 sm:$0xf0] }
  0xc0   :  { %8469 = vst [vmem:[#allocation52_spill] sm:$0xff] %v5115_v53 }
  0xc1   :  { %8470 = vst [vmem:[#allocation53_spill] sm:$0xff] %v5118_v8 }
  0xc2   :  { %8471 = vst [vmem:[#allocation54_spill] sm:$0xff] %v5121_v50  ;;  %621 = vrot.lane.b32.xlu0 %v4730_v4, %s4636_s21  ;;  %831 = vrot.lane.b32.xlu1 %v4704_v0, %s4637_s28 }
  0xc3   :  { %1018 = vrot.lane.b32.xlu2 %v4725_v3, %s4633_s24  ;;  %8474 = vst [vmem:[#allocation57_spill] sm:$0xff] %v5149_v23 }
  0xc4   :  { %v5137_v21 = vpop.permute.xlu0 %276  ;;  %v5139_v51 = vpop.permute.xlu1 %278 }
  0xc5   :  { %v5135_v8 = vpop.permute.xlu2 %408  ;;  %8472 = vst [vmem:[#allocation55_spill] sm:$0xff] %v5137_v21 }
  0xc6   :  { %8473 = vst [vmem:[#allocation56_spill] sm:$0xff] %v5139_v51  ;;  %v1454_v51 = vperm.slane %v5147_v24, 7 }
  0xca   :  { %550 = vrot.lane.b32.xlu0 %v4730_v4, %s4639_s22  ;;  %760 = vrot.lane.b32.xlu1 %v4704_v0, %s4638_s17 }
  0xcb   :  { %909 = vrot.lane.b32.xlu2 %v4735_v5, %s4635_s20 }
  0xcc   :  { %v5160_v44 = vpop.permute.xlu0 %337  ;;  %v5163_v36 = vpop.permute.xlu1 %339 }
  0xcd   :  { %v5158_v21 = vpop.permute.xlu2 %414  ;;  %v5168_v55 = vsel %vm351_vm4, %v5042_v41, %v5160_v44  ;;  %v5173_v62 = vsel %vm351_vm4, %v5163_v36, %v5071_v30  ;;  %v377_v41 = vperm.slane %v5149_v23, 4 }
  0xce   :  { %8475 = vst [vmem:[#allocation58_spill] sm:$0xff] %v5158_v21  ;;  %v5176_v54 = vmul.f32 %v1454_v51, %v5168_v55  ;;  %v5179_v13 = vmul.f32 %v375_v61, %v5173_v62  ;;  %v4508_v51 = vld [vmem:[%s8170_s1 + $0x87] ss:$8 sm:$0xf] }
  0xcf   :  { %v4509_v61 = vld [vmem:[%s8170_s1 + $0x87] ss:$8 sm:$0xf0] }
  0xd0   :  { %8476 = vst [vmem:[#allocation59_spill] sm:$0xff] %v5176_v54  ;;  %v5205_v49 = vor.u32 %v4509_v61, %v4508_v51  ;;  %v4472_v61 = vld [vmem:[%s8170_s1 + $0x5] ss:$8 sm:$0xf] }
  0xd1   :  { %8477 = vst [vmem:[#allocation60_spill] sm:$0xff] %v5179_v13 }
  0xd2   :  { %479 = vrot.lane.b32.xlu0 %v4730_v4, %s4641_s15  ;;  %689 = vrot.lane.b32.xlu1 %v4704_v0, %s4640_s14  ;;  %v1491_v37 = vperm.slane %v5205_v49, 7 }
  0xd3   :  { %838 = vrot.lane.b32.xlu2 %v4735_v5, %s4637_s28 }
  0xd4   :  { %v5190_v15 = vpop.permute.xlu0 %343  ;;  %v5198_v54 = vpop.permute.xlu1 %345 }
  0xd5   :  { %v5188_v35 = vpop.permute.xlu2 %420  ;;  %8479 = vst [vmem:[#allocation62_spill] sm:$0xff] %v5190_v15  ;;  %v5203_v31 = vsel %vm351_vm4, %v5190_v15, %v5198_v54 }
  0xd6   :  { %8478 = vst [vmem:[#allocation61_spill] sm:$0xff] %v5188_v35  ;;  %v5208_v35 = vmul.f32 %v377_v41, %v5203_v31 }
  0xd7   :  { %8480 = vst [vmem:[#allocation63_spill] sm:$0xff] %v5198_v54 }
  0xd8   :  { %8481 = vst [vmem:[#allocation64_spill] sm:$0xff] %v5203_v31 }
  0xd9   :  { %8482 = vst [vmem:[#allocation65_spill] sm:$0xff] %v5208_v35  ;;  %v4473_v35 = vld [vmem:[%s8170_s1 + $0x5] ss:$8 sm:$0xf0] }
  0xda   :  { %911 = vrot.lane.b32.xlu0 %v4709_v1, %s4635_s20  ;;  %618 = vrot.lane.b32.xlu1 %v4704_v0, %s4636_s21 }
  0xdb   :  { %767 = vrot.lane.b32.xlu2 %v4735_v5, %s4638_s17 }
  0xdc   :  { %v5219_v54 = vpop.permute.xlu0 %349  ;;  %v5221_v51 = vpop.permute.xlu1 %405 }
  0xdd   :  { %v5217_v50 = vpop.permute.xlu2 %1012  ;;  %8483 = vst [vmem:[#allocation66_spill] sm:$0xff] %v5219_v54  ;;  %v5226_v41 = vsel %vm422_vm5, %v5221_v51, %v5135_v8  ;;  %v5241_v54 = vor.u32 %v4473_v35, %v4472_v61 }
  0xde   :  { %8484 = vst [vmem:[#allocation67_spill] sm:$0xff] %v5221_v51  ;;  %v5235_v13 = vmul.f32 %v1491_v37, %v5226_v41 }
  0xdf   :  { %8486 = vst [vmem:[#allocation69_spill] sm:$0xff] %v5241_v54  ;;  %v446_v10 = vperm.slane %v5241_v54, 2  ;;  %v448_v35 = vperm.slane %v5241_v54, 4 }
  0xe0   :  { %8485 = vst [vmem:[#allocation68_spill] sm:$0xff] %v5235_v13 }
  0xe2   :  { %840 = vrot.lane.b32.xlu0 %v4709_v1, %s4637_s28  ;;  %547 = vrot.lane.b32.xlu1 %v4704_v0, %s4639_s22 }
  0xe3   :  { %696 = vrot.lane.b32.xlu2 %v4735_v5, %s4640_s14 }
  0xe4   :  { %v5247_v27 = vpop.permute.xlu0 %410  ;;  %v5250_v18 = vpop.permute.xlu1 %412 }
  0xe5   :  { %v5245_v51 = vpop.permute.xlu2 %905  ;;  %8487 = vst [vmem:[#allocation70_spill] sm:$0xff] %v5250_v18  ;;  %v5255_v37 = vsel %vm422_vm5, %v5247_v27, %v5250_v18 }
  0xe6   :  { %v5258_v13 = vmul.f32 %v446_v10, %v5255_v37  ;;  %v4492_v10 = vld [vmem:[%s8170_s1 + $0x47] ss:$8 sm:$0xf] }
  0xe8   :  { %8488 = vst [vmem:[#allocation71_spill] sm:$0xff] %v5258_v13  ;;  %v4493_v13 = vld [vmem:[%s8170_s1 + $0x47] ss:$8 sm:$0xf0] }
  0xe9   :  { %v5284_v56 = vor.u32 %v4493_v13, %v4492_v10 }
  0xea   :  { %769 = vrot.lane.b32.xlu0 %v4709_v1, %s4638_s17  ;;  %476 = vrot.lane.b32.xlu1 %v4704_v0, %s4641_s15 }
  0xeb   :  { %698 = vrot.lane.b32.xlu2 %v4709_v1, %s4640_s14  ;;  %8492 = vst [vmem:[#allocation75_spill] sm:$0xff] %v5284_v56  ;;  %v1121_v13 = vperm.slane %v5284_v56, 1 }
  0xec   :  { %v5269_v52 = vpop.permute.xlu0 %416  ;;  %v5277_v32 = vpop.permute.xlu1 %418 }
  0xed   :  { %v5267_v61 = vpop.permute.xlu2 %623  ;;  %8489 = vst [vmem:[#allocation72_spill] sm:$0xff] %v5269_v52  ;;  %v5282_v42 = vsel %vm422_vm5, %v5158_v21, %v5269_v52  ;;  %v4491_v52 = vld [vmem:[%s8170_s1 + $0x46] ss:$8 sm:$0xf0] }
  0xee   :  { %8490 = vst [vmem:[#allocation73_spill] sm:$0xff] %v5277_v32  ;;  %v5287_v58 = vmul.f32 %v448_v35, %v5282_v42  ;;  %v4490_v32 = vld [vmem:[%s8170_s1 + $0x46] ss:$8 sm:$0xf] }
  0xef   :  { %8491 = vst [vmem:[#allocation74_spill] sm:$0xff] %v5282_v42  ;;  %v5312_v15 = vor.u32 %v4491_v52, %v4490_v32  ;;  %v4486_v52 = vld [vmem:[%s8170_s1 + $0x44] ss:$8 sm:$0xf] }
  0xf0   :  { %8493 = vst [vmem:[#allocation76_spill] sm:$0xff] %v5287_v58  ;;  %v4488_v58 = vld [vmem:[%s8170_s1 + $0x45] ss:$8 sm:$0xf] }
  0xf1   :  { %v5316_v18 = vor.u32 %v4489_v16, %v4488_v58  ;;  %v1050_v21 = vperm.slane %v5312_v15, 1  ;;  %v4487_v16 = vld [vmem:[%s8170_s1 + $0x44] ss:$8 sm:$0xf0]  ;;  %v1120_v58 = vperm.slane %v5284_v56, 0  ;;  %v1049_v56 = vperm.slane %v5312_v15, 0 }
  0xf2   :  { %627 = vrot.lane.b32.xlu0 %v4709_v1, %s4636_s21  ;;  %1225 = vrot.lane.b32.xlu1 %v4714_v2, %s4642_s16  ;;  %v5342_v31 = vor.u32 %v4487_v16, %v4486_v52 }
  0xf3   :  { %1227 = vrot.lane.b32.xlu2 %v4735_v5, %s4642_s16  ;;  %8496 = vst [vmem:[#allocation79_spill] sm:$0xff] %v5316_v18  ;;  %v979_v32 = vperm.slane %v5316_v18, 1  ;;  %v978_v12 = vperm.slane %v5316_v18, 0 }
  0xf4   :  { %v1084_v10 = vpop.permute.xlu0 %1083  ;;  %v5310_v30 = vpop.permute.xlu1 %1085  ;;  %8499 = vst [vmem:[#allocation82_spill] sm:$0xff] %v5342_v31  ;;  %v942_v9 = vperm.slane %v5342_v31, 1 }
  0xf5   :  { %v5302_v35 = vpop.permute.xlu2 %836  ;;  %8495 = vst [vmem:[#allocation78_spill] sm:$0xff] %v5310_v30  ;;  %v1099_v59 = vsel %vm1097_vm6, %v1084_v10, %v5310_v30  ;;  %v995_v46 = vmul.f32 %v979_v32, %v4714_v2 }
  0xf6   :  { %8494 = vst [vmem:[#allocation77_spill] sm:$0xff] %v5302_v35  ;;  %v1137_v53 = vmul.f32 %v1121_v13, %v1099_v59 }
  0xf8   :  { %1895 = vmatpush.msra.mxu2 %v1137_v53 }
  0xfa   :  { %556 = vrot.lane.b32.xlu0 %v4709_v1, %s4639_s22  ;;  %629 = vrot.lane.b32.xlu1 %v4725_v3, %s4636_s21 }
  0xfb   :  { %1154 = vrot.lane.b32.xlu2 %v4714_v2, %s4643_s26  ;;  %v4515_v2 = vld [vmem:[%s8170_s1 + $0xc2] ss:$8 sm:$0xf0] }
  0xfc   :  { %v5335_v53 = vpop.permute.xlu0 %1014  ;;  %v5337_v13 = vpop.permute.xlu1 %1081 }
  0xfd   :  { %v5333_v59 = vpop.permute.xlu2 %763  ;;  %8497 = vst [vmem:[#allocation80_spill] sm:$0xff] %v5335_v53  ;;  %v1028_v30 = vsel %vm8323_vm7, %v5217_v50, %v5335_v53  ;;  %v1098_v42 = vsel %vm1097_vm6, %v5337_v13, %v1084_v10  ;;  %v941_v53 = vperm.slane %v5342_v31, 0 }
  0xfe   :  { %8498 = vst [vmem:[#allocation81_spill] sm:$0xff] %v5337_v13  ;;  %v1066_v14 = vmul.f32 %v1050_v21, %v1028_v30  ;;  %v1136_v28 = vmul.f32 %v1120_v58, %v1098_v42  ;;  %v4514_v30 = vld [vmem:[%s8170_s1 + $0xc2] ss:$8 sm:$0xf]  ;;  %v994_v13 = vmul.f32 %v978_v12, %v4730_v4 }
  0xff   :  { %v5380_v16 = vor.u32 %v4515_v2, %v4514_v30 }
 0x100   :  { %1896 = vmatpush.msra.mxu2 %v1066_v14  ;;  %1855 = vmatpush.msra.mxu0 %v1136_v28  ;;  %v4484_v14 = vld [vmem:[%s8170_s1 + $0x43] ss:$8 sm:$0xf] }
 0x101   :  { %8503 = vst [vmem:[#allocation86_spill] sm:$0xff] %v5380_v16 }
 0x102   :  { %1156 = vrot.lane.b32.xlu0 %v4735_v5, %s4643_s26  ;;  %485 = vrot.lane.b32.xlu1 %v4709_v1, %s4641_s15  ;;  %v4485_v5 = vld [vmem:[%s8170_s1 + $0x43] ss:$8 sm:$0xf0] }
 0x103   :  { %558 = vrot.lane.b32.xlu2 %v4725_v3, %s4639_s22  ;;  %1897 = vmatpush.msra.mxu2 %v995_v46  ;;  %v5382_v58 = vor.u32 %v4485_v5, %v4484_v14 }
 0x104   :  { %v5370_v42 = vpop.permute.xlu0 %907  ;;  %v5372_v21 = vpop.permute.xlu1 %1010 }
 0x105   :  { %v5368_v28 = vpop.permute.xlu2 %902  ;;  %8501 = vst [vmem:[#allocation84_spill] sm:$0xff] %v5370_v42  ;;  %v920_v10 = vsel %vm8288_vm8, %v5245_v51, %v5370_v42  ;;  %v1027_v46 = vsel %vm8323_vm7, %v5372_v21, %v5217_v50  ;;  %v4512_v50 = vld [vmem:[%s8170_s1 + $0xc1] ss:$8 sm:$0xf] }
 0x106   :  { %8500 = vst [vmem:[#allocation83_spill] sm:$0xff] %v5368_v28  ;;  %v958_v52 = vmul.f32 %v942_v9, %v920_v10  ;;  %v1065_v32 = vmul.f32 %v1049_v56, %v1027_v46  ;;  %v935_v18 = vsel %vm8288_vm8, %v5368_v28, %v5245_v51  ;;  %v1596_v9 = vperm.slane %v5380_v16, 1  ;;  %v4513_v51 = vld [vmem:[%s8170_s1 + $0xc1] ss:$8 sm:$0xf0] }
 0x107   :  { %8502 = vst [vmem:[#allocation85_spill] sm:$0xff] %v5372_v21  ;;  %v871_v56 = vperm.slane %v5382_v58, 1  ;;  %v957_v12 = vmul.f32 %v941_v53, %v935_v18  ;;  %v5418_v5 = vor.u32 %v4513_v51, %v4512_v50 }
 0x108   :  { %1898 = vmatpush.msra.mxu2 %v958_v52  ;;  %1856 = vmatpush.msra.mxu0 %v1065_v32  ;;  %v4482_v52 = vld [vmem:[%s8170_s1 + $0x42] ss:$8 sm:$0xf] }
 0x109   :  { %v1559_v46 = vperm.slane %v5418_v5, 1  ;;  %v4483_v32 = vld [vmem:[%s8170_s1 + $0x42] ss:$8 sm:$0xf0] }
 0x10a   :  { %1091 = vrot.lane.b32.xlu0 %v4746_v6, %s4634_s25  ;;  %1223 = vrot.lane.b32.xlu1 %v4730_v4, %s4642_s16  ;;  %v5444_v50 = vor.u32 %v4483_v32, %v4482_v52 }
 0x10b   :  { %487 = vrot.lane.b32.xlu2 %v4725_v3, %s4641_s15  ;;  %1857 = vmatpush.msra.mxu0 %v994_v13 }
 0x10c   :  { %v5405_v2 = vpop.permute.xlu0 %625  ;;  %v5407_v14 = vpop.permute.xlu1 %834 }
 0x10d   :  { %v5403_v30 = vpop.permute.xlu2 %692  ;;  %8504 = vst [vmem:[#allocation87_spill] sm:$0xff] %v5405_v2  ;;  %1858 = vmatpush.msra.mxu0 %v957_v12  ;;  %v5412_v13 = vsel %vm8322_vm9, %v5267_v61, %v5405_v2  ;;  %v849_v53 = vsel %vm8272_vm10, %v5407_v14, %v5302_v35 }
 0x10e   :  { %8505 = vst [vmem:[#allocation88_spill] sm:$0xff] %v5412_v13  ;;  %v1612_v18 = vmul.f32 %v1596_v9, %v5412_v13  ;;  %v887_v10 = vmul.f32 %v871_v56, %v849_v53  ;;  %v4510_v53 = vld [vmem:[%s8170_s1 + $0xc0] ss:$8 sm:$0xf] }
 0x10f   :  { %v4480_v13 = vld [vmem:[%s8170_s1 + $0x41] ss:$8 sm:$0xf] }
 0x110   :  { %1920 = vmatpush.msra.mxu3 %v1612_v18  ;;  %1899 = vmatpush.msra.mxu2 %v887_v10  ;;  %v800_v18 = vperm.slane %v5444_v50, 1  ;;  %v4511_v10 = vld [vmem:[%s8170_s1 + $0xc0] ss:$8 sm:$0xf0] }
 0x111   :  { %v5469_v21 = vor.u32 %v4511_v10, %v4510_v53 }
 0x112   :  { %1020 = vrot.lane.b32.xlu0 %v4746_v6, %s4633_s24  ;;  %1093 = vrot.lane.b32.xlu1 %v4751_v7, %s4634_s25 }
 0x113   :  { %1152 = vrot.lane.b32.xlu2 %v4730_v4, %s4643_s26  ;;  %8511 = vst [vmem:[#allocation94_spill] sm:$0xff] %v5469_v21 }
 0x114   :  { %v5435_v4 = vpop.permute.xlu0 %552  ;;  %v5437_v56 = vpop.permute.xlu1 %554 }
 0x115   :  { %v5433_v9 = vpop.permute.xlu2 %1089  ;;  %8507 = vst [vmem:[#allocation90_spill] sm:$0xff] %v5437_v56  ;;  %v5442_v12 = vsel %vm564_vm11, %v5435_v4, %v5437_v56  ;;  %v1448_v56 = vperm.slane %v5147_v24, 1 }
 0x116   :  { %8506 = vst [vmem:[#allocation89_spill] sm:$0xff] %v5433_v9  ;;  %v1575_v51 = vmul.f32 %v1559_v46, %v5442_v12 }
 0x117   :  { %8508 = vst [vmem:[#allocation91_spill] sm:$0xff] %v5442_v12  ;;  %v1522_v12 = vperm.slane %v5469_v21, 1 }
 0x118   :  { %1921 = vmatpush.msra.mxu3 %v1575_v51 }
 0x11a   :  { %1022 = vrot.lane.b32.xlu0 %v4751_v7, %s4633_s24  ;;  %913 = vrot.lane.b32.xlu1 %v4725_v3, %s4635_s20 }
 0x11b   :  { %842 = vrot.lane.b32.xlu2 %v4725_v3, %s4637_s28 }
 0x11c   :  { %v5462_v52 = vpop.permute.xlu0 %765  ;;  %v5464_v32 = vpop.permute.xlu1 %1087 }
 0x11d   :  { %v5460_v46 = vpop.permute.xlu2 %1018  ;;  %8510 = vst [vmem:[#allocation93_spill] sm:$0xff] %v5462_v52  ;;  %v778_v51 = vsel %vm777_vm12, %v5333_v59, %v5462_v52 }
 0x11e   :  { %8509 = vst [vmem:[#allocation92_spill] sm:$0xff] %v5460_v46  ;;  %v816_v28 = vmul.f32 %v800_v18, %v778_v51  ;;  %v1485_v51 = vperm.slane %v5205_v49, 1 }
 0x120   :  { %1900 = vmatpush.msra.mxu2 %v816_v28  ;;  %v4481_v28 = vld [vmem:[%s8170_s1 + $0x41] ss:$8 sm:$0xf0]  ;;  %v1501_v2 = vmul.f32 %v1485_v51, %v5255_v37 }
 0x121   :  { %v5496_v35 = vor.u32 %v4481_v28, %v4480_v13  ;;  %v1464_v13 = vmul.f32 %v1448_v56, %v5173_v62  ;;  %v1337_v28 = vperm.slane %v4922_v39, 1  ;;  %v4478_v62 = vld [vmem:[%s8170_s1 + $0x40] ss:$8 sm:$0xf] }
 0x122   :  { %915 = vrot.lane.b32.xlu0 %v4746_v6, %s4635_s20  ;;  %771 = vrot.lane.b32.xlu1 %v4725_v3, %s4638_s17 }
 0x123   :  { %844 = vrot.lane.b32.xlu2 %v4746_v6, %s4637_s28 }
 0x124   :  { %v5486_v53 = vpop.permute.xlu0 %481  ;;  %v5488_v10 = vpop.permute.xlu1 %483 }
 0x125   :  { %v5484_v18 = vpop.permute.xlu2 %909  ;;  %8513 = vst [vmem:[#allocation96_spill] sm:$0xff] %v5488_v10  ;;  %v5494_v52 = vsel %vm493_vm13, %v5486_v53, %v5488_v10  ;;  %v729_v10 = vperm.slane %v5496_v35, 1 }
 0x126   :  { %8512 = vst [vmem:[#allocation95_spill] sm:$0xff] %v5484_v18  ;;  %v1538_v42 = vmul.f32 %v1522_v12, %v5494_v52  ;;  %v1411_v18 = vperm.slane %v5059_v63, 1 }
 0x127   :  { %8514 = vst [vmem:[#allocation97_spill] sm:$0xff] %v5494_v52 }
 0x128   :  { %1922 = vmatpush.msra.mxu3 %v1538_v42  ;;  %v1374_v42 = vperm.slane %v4980_v57, 1  ;;  %v1427_v52 = vmul.f32 %v1411_v18, %v5110_v48  ;;  %v1353_v18 = vmul.f32 %v1337_v28, %v4948_v47 }
 0x12a   :  { %700 = vrot.lane.b32.xlu0 %v4725_v3, %s4640_s14  ;;  %773 = vrot.lane.b32.xlu1 %v4746_v6, %s4638_s17 }
 0x12b   :  { %1095 = vrot.lane.b32.xlu2 %v4704_v0, %s4634_s25  ;;  %1923 = vmatpush.msra.mxu3 %v1501_v2  ;;  %v4479_v2 = vld [vmem:[%s8170_s1 + $0x40] ss:$8 sm:$0xf0] }
 0x12c   :  { %v5513_v12 = vpop.permute.xlu0 %694  ;;  %v5516_v51 = vpop.permute.xlu1 %1016  ;;  %v5530_v48 = vor.u32 %v4479_v2, %v4478_v62 }
 0x12d   :  { %v5511_v37 = vpop.permute.xlu2 %838  ;;  %8516 = vst [vmem:[#allocation99_spill] sm:$0xff] %v5513_v12  ;;  %1924 = vmatpush.msra.mxu3 %v1464_v13  ;;  %v707_v31 = vsel %vm706_vm14, %v5403_v30, %v5513_v12  ;;  %v1300_v13 = vperm.slane %v4866_v22, 1  ;;  %v1595_v12 = vperm.slane %v5380_v16, 0 }
 0x12e   :  { %8515 = vst [vmem:[#allocation98_spill] sm:$0xff] %v5511_v37  ;;  %v745_v56 = vmul.f32 %v729_v10, %v707_v31  ;;  %v1390_v37 = vmul.f32 %v1374_v42, %v5030_v33  ;;  %v658_v31 = vperm.slane %v5530_v48, 1 }
 0x12f   :  { %1925 = vmatpush.msra.mxu3 %v1427_v52  ;;  %8517 = vst [vmem:[#allocation100_spill] sm:$0xff] %v5530_v48  ;;  %v1316_v33 = vmul.f32 %v1300_v13, %v4890_v29  ;;  %v870_v52 = vperm.slane %v5382_v58, 0  ;;  %v4477_v29 = vld [vmem:[%s8170_s1 + $0x7] ss:$8 sm:$0xf0] }
 0x130   :  { %1901 = vmatpush.msra.mxu2 %v745_v56 }
 0x131   :  { %1926 = vmatpush.msra.mxu3 %v1390_v37  ;;  %v4476_v37 = vld [vmem:[%s8170_s1 + $0x7] ss:$8 sm:$0xf] }
 0x132   :  { %631 = vrot.lane.b32.xlu0 %v4746_v6, %s4636_s21  ;;  %702 = vrot.lane.b32.xlu1 %v4746_v6, %s4640_s14  ;;  %v5561_v13 = vor.u32 %v4477_v29, %v4476_v37  ;;  %v4475_v37 = vld [vmem:[%s8170_s1 + $0x6] ss:$8 sm:$0xf0] }
 0x133   :  { %1024 = vrot.lane.b32.xlu2 %v4704_v0, %s4633_s24  ;;  %1927 = vmatpush.msra.mxu3 %v1353_v18 }
 0x134   :  { %v5545_v47 = vpop.permute.xlu0 %621  ;;  %v5547_v0 = vpop.permute.xlu1 %831  ;;  %8519 = vst [vmem:[#allocation102_spill] sm:$0xff] %v5561_v13  ;;  %v587_v18 = vperm.slane %v5561_v13, 1 }
 0x135   :  { %v5543_v10 = vpop.permute.xlu2 %767  ;;  %8518 = vst [vmem:[#allocation101_spill] sm:$0xff] %v5547_v0  ;;  %1928 = vmatpush.msra.mxu3 %v1316_v33  ;;  %v636_v42 = vsel %vm8322_vm9, %v5545_v47, %v5267_v61  ;;  %v864_v28 = vsel %vm8272_vm10, %v5547_v0, %v5407_v14  ;;  %v1558_v61 = vperm.slane %v5418_v5, 0  ;;  %v799_v14 = vperm.slane %v5444_v50, 0 }
 0x136   :  { %v1611_v62 = vmul.f32 %v1595_v12, %v636_v42  ;;  %v674_v2 = vmul.f32 %v658_v31, %v636_v42  ;;  %v886_v56 = vmul.f32 %v870_v52, %v864_v28  ;;  %v4474_v42 = vld [vmem:[%s8170_s1 + $0x6] ss:$8 sm:$0xf] }
 0x138   :  { %1880 = vmatpush.msra.mxu1 %v1611_v62  ;;  %1902 = vmatpush.msra.mxu2 %v674_v2 }
 0x139   :  { %1859 = vmatpush.msra.mxu0 %v886_v56  ;;  %v5590_v56 = vor.u32 %v4475_v37, %v4474_v42 }
 0x13a   :  { %1229 = vrot.lane.b32.xlu0 %v4709_v1, %s4642_s16  ;;  %560 = vrot.lane.b32.xlu1 %v4746_v6, %s4639_s22 }
 0x13b   :  { %633 = vrot.lane.b32.xlu2 %v4751_v7, %s4636_s21  ;;  %8522 = vst [vmem:[#allocation105_spill] sm:$0xff] %v5590_v56  ;;  %v516_v0 = vperm.slane %v5590_v56, 1 }
 0x13c   :  { %v5574_v31 = vpop.permute.xlu0 %550  ;;  %v5576_v33 = vpop.permute.xlu1 %760 }
 0x13d   :  { %v5572_v12 = vpop.permute.xlu2 %696  ;;  %8521 = vst [vmem:[#allocation104_spill] sm:$0xff] %v5576_v33  ;;  %v565_v52 = vsel %vm564_vm11, %v5574_v31, %v5435_v4  ;;  %v793_v29 = vsel %vm777_vm12, %v5576_v33, %v5333_v59  ;;  %v1521_v4 = vperm.slane %v5469_v21, 0  ;;  %v728_v59 = vperm.slane %v5496_v35, 0 }
 0x13e   :  { %8520 = vst [vmem:[#allocation103_spill] sm:$0xff] %v5572_v12  ;;  %v1574_v28 = vmul.f32 %v1558_v61, %v565_v52  ;;  %v603_v62 = vmul.f32 %v587_v18, %v565_v52  ;;  %v815_v2 = vmul.f32 %v799_v14, %v793_v29  ;;  %v445_v52 = vperm.slane %v5241_v54, 1 }
 0x13f   :  { %v374_v33 = vperm.slane %v5149_v23, 1 }
 0x140   :  { %1881 = vmatpush.msra.mxu1 %v1574_v28  ;;  %1903 = vmatpush.msra.mxu2 %v603_v62  ;;  %v423_v28 = vsel %vm422_vm5, %v5135_v8, %v5247_v27  ;;  %v281_v8 = vsel %vm280_vm3, %v5075_v38, %v4992_v60  ;;  %v210_v60 = vsel %vm209_vm2, %v4910_v34, %v5023_v26  ;;  %v232_v38 = vperm.slane %v5012_v20, 1 }
 0x141   :  { %1860 = vmatpush.msra.mxu0 %v815_v2  ;;  %v1447_v2 = vperm.slane %v5147_v24, 0  ;;  %v461_v27 = vmul.f32 %v445_v52, %v423_v28 }
 0x142   :  { %1158 = vrot.lane.b32.xlu0 %v4709_v1, %s4643_s26  ;;  %1231 = vrot.lane.b32.xlu1 %v4725_v3, %s4642_s16  ;;  %v1484_v1 = vperm.slane %v5205_v49, 0 }
 0x143   :  { %489 = vrot.lane.b32.xlu2 %v4746_v6, %s4641_s15 }
 0x144   :  { %v5603_v18 = vpop.permute.xlu0 %479  ;;  %v5605_v14 = vpop.permute.xlu1 %689  ;;  %v1500_v12 = vmul.f32 %v1484_v1, %v423_v28  ;;  %v248_v28 = vmul.f32 %v232_v38, %v210_v60  ;;  %v4497_v38 = vld [vmem:[%s8170_s1 + $0x81] ss:$8 sm:$0xf0] }
 0x145   :  { %v5601_v61 = vpop.permute.xlu2 %698  ;;  %8524 = vst [vmem:[#allocation107_spill] sm:$0xff] %v5605_v14  ;;  %v494_v6 = vsel %vm493_vm13, %v5603_v18, %v5486_v53  ;;  %v722_v42 = vsel %vm706_vm14, %v5605_v14, %v5403_v30  ;;  %v352_v53 = vsel %vm351_vm4, %v5160_v44, %v5163_v36  ;;  %v1410_v30 = vperm.slane %v5059_v63, 0 }
 0x146   :  { %8523 = vst [vmem:[#allocation106_spill] sm:$0xff] %v5601_v61  ;;  %v1537_v37 = vmul.f32 %v1521_v4, %v494_v6  ;;  %v532_v29 = vmul.f32 %v516_v0, %v494_v6  ;;  %v744_v62 = vmul.f32 %v728_v59, %v722_v42  ;;  %v303_v0 = vperm.slane %v5091_v17, 1 }
 0x147   :  { %v1463_v44 = vmul.f32 %v1447_v2, %v352_v53  ;;  %v657_v36 = vperm.slane %v5530_v48, 0  ;;  %v1373_v4 = vperm.slane %v4980_v57, 0  ;;  %v390_v59 = vmul.f32 %v374_v33, %v352_v53 }
 0x148   :  { %1882 = vmatpush.msra.mxu1 %v1537_v37  ;;  %1904 = vmatpush.msra.mxu2 %v532_v29  ;;  %v319_v52 = vmul.f32 %v303_v0, %v281_v8  ;;  %v1336_v33 = vperm.slane %v4922_v39, 0  ;;  %v161_v37 = vperm.slane %v4924_v40, 1  ;;  %v139_v29 = vsel %vm138_vm1, %v4935_v43, %v4938_v45  ;;  %v5667_v43 = vld [vmem:[%s8169_s0 + $0x30] sm:$0xff] }
 0x149   :  { %1861 = vmatpush.msra.mxu0 %v744_v62  ;;  %v1389_v26 = vmul.f32 %v1373_v4, %v210_v60  ;;  %v1299_v62 = vperm.slane %v4866_v22, 0  ;;  %v90_v2 = vperm.slane %v4821_v11, 1  ;;  %8529 = vst [vmem:[#allocation112_spill] sm:$0xff] %v5667_v43  ;;  %v586_v45 = vperm.slane %v5561_v13, 0 }
 0x14a   :  { %562 = vrot.lane.b32.xlu0 %v4751_v7, %s4639_s22  ;;  %917 = vrot.lane.b32.xlu1 %v4751_v7, %s4635_s20  ;;  %v1352_v53 = vmul.f32 %v1336_v33, %v139_v29  ;;  %v4496_v60 = vld [vmem:[%s8170_s1 + $0x81] ss:$8 sm:$0xf]  ;;  %v444_v33 = vperm.slane %v5241_v54, 0  ;;  %v1302_v14 = vperm.slane %v4866_v22, 3 }
 0x14b   :  { %1160 = vrot.lane.b32.xlu2 %v4725_v3, %s4643_s26  ;;  %1883 = vmatpush.msra.mxu1 %v1500_v12  ;;  %v1426_v12 = vmul.f32 %v1410_v30, %v281_v8  ;;  %v177_v30 = vmul.f32 %v161_v37, %v139_v29  ;;  %v4613_v29 = vld [vmem:[%s8169_s0 + $0x38] sm:$0xff] }
 0x14c   :  { %1905 = vmatpush.msra.mxu2 %v461_v27  ;;  %v5638_v6 = vpop.permute.xlu0 %911  ;;  %v5644_v1 = vpop.permute.xlu1 %618 }
 0x14d   :  { %v5636_v3 = vpop.permute.xlu2 %1227  ;;  %8526 = vst [vmem:[#allocation109_spill] sm:$0xff] %v5638_v6  ;;  %1884 = vmatpush.msra.mxu1 %v1463_v44  ;;  %v5649_v42 = vsel %vm8322_vm9, %v5644_v1, %v5545_v47  ;;  %v69_v47 = vsel %vm68_vm0, %v4877_v25, %v4858_v19 }
 0x14e   :  { %8525 = vst [vmem:[#allocation108_spill] sm:$0xff] %v5636_v3  ;;  %1906 = vmatpush.msra.mxu2 %v390_v59  ;;  %v673_v34 = vmul.f32 %v657_v36, %v5649_v42  ;;  %v106_v25 = vmul.f32 %v90_v2, %v69_v47  ;;  %v5689_v36 = vld [vmem:[%s8169_s0 + $0x28] sm:$0xff] }
 0x14f   :  { %8527 = vst [vmem:[#allocation110_spill] sm:$0xff] %v5644_v1  ;;  %1885 = vmatpush.msra.mxu1 %v1426_v12 }
 0x150   :  { %8528 = vst [vmem:[#allocation111_spill] sm:$0xff] %v5649_v42  ;;  %1907 = vmatpush.msra.mxu2 %v319_v52  ;;  %1862 = vmatpush.msra.mxu0 %v673_v34  ;;  %v5717_v34 = vor.u32 %v4497_v38, %v4496_v60  ;;  %v8541_v60 = vld [vmem:[#allocation33_spill] sm:$0xff]  ;;  %v8549_v42 = vld [vmem:[#allocation82_spill] sm:$0xff] }
 0x151   :  { %1886 = vmatpush.msra.mxu1 %v1389_v26  ;;  %8533 = vst [vmem:[#allocation116_spill] sm:$0xff] %v5689_v36  ;;  %v373_v26 = vperm.slane %v5149_v23, 0 }
 0x152   :  { %1908 = vmatpush.msra.mxu2 %v248_v28  ;;  %846 = vrot.lane.b32.xlu1 %v5667_v43, %s4637_s28  ;;  %8538 = vst [vmem:[#allocation121_spill] sm:$0xff] %v5717_v34  ;;  %v460_v28 = vmul.f32 %v444_v33, %v5226_v41  ;;  %v8542_v33 = vld [vmem:[#allocation75_spill] sm:$0xff] }
 0x153   :  { %775 = vrot.lane.b32.xlu2 %v4751_v7, %s4638_s17  ;;  %491 = vrot.lane.b32.xlu0 %v5667_v43, %s4641_s15  ;;  %v1315_v7 = vmul.f32 %v1299_v62, %v69_v47  ;;  %v1263_v62 = vperm.slane %v5717_v34, 1  ;;  %v389_v47 = vmul.f32 %v373_v26, %v5168_v55  ;;  %v89_v55 = vperm.slane %v4821_v11, 0  ;;  %v8543_v26 = vld [vmem:[#allocation22_spill] sm:$0xff] }
 0x154   :  { %1887 = vmatpush.msra.mxu1 %v1352_v53  ;;  %1909 = vmatpush.msra.mxu2 %v177_v30  ;;  %v5676_v27 = vpop.permute.xlu0 %840  ;;  %v5678_v8 = vpop.permute.xlu1 %547  ;;  %v231_v53 = vperm.slane %v5012_v20, 0 }
 0x155   :  { %v5674_v19 = vpop.permute.xlu2 %1154  ;;  %8530 = vst [vmem:[#allocation113_spill] sm:$0xff] %v5676_v27  ;;  %v5683_v0 = vsel %vm564_vm11, %v5678_v8, %v5574_v31  ;;  %v515_v31 = vperm.slane %v5590_v56, 0 }
 0x156   :  { %8531 = vst [vmem:[#allocation114_spill] sm:$0xff] %v5678_v8  ;;  %1888 = vmatpush.msra.mxu1 %v1315_v7  ;;  %1910 = vmatpush.msra.mxu2 %v106_v25  ;;  %v602_v44 = vmul.f32 %v586_v45, %v5683_v0  ;;  %v8540_v45 = vld [vmem:[#allocation46_spill] sm:$0xff]  ;;  %v247_v38 = vmul.f32 %v231_v53, %v8541_v60  ;;  %v8550_v8 = vld [vmem:[#allocation95_spill] sm:$0xff] }
 0x157   :  { %8532 = vst [vmem:[#allocation115_spill] sm:$0xff] %v5683_v0  ;;  %v4494_v60 = vld [vmem:[%s8170_s1 + $0x80] ss:$8 sm:$0xf]  ;;  %v922_v1 = vsel %vm8288_vm8, %v8550_v8, %v5638_v6 }
 0x158   :  { %1863 = vmatpush.msra.mxu0 %v602_v44  ;;  %v160_v44 = vperm.slane %v4924_v40, 0  ;;  %v4614_v0 = vld [vmem:[%s8169_s0 + $0x18] sm:$0xff] }
 0x15a   :  { %1233 = vrot.lane.b32.xlu1 %v5689_v36, %s4642_s16 }
 0x15b   :  { %1162 = vrot.lane.b32.xlu2 %v5689_v36, %s4643_s26  ;;  %704 = vrot.lane.b32.xlu0 %v5667_v43, %s4640_s14  ;;  %v1597_v36 = vperm.slane %v5380_v16, 2 }
 0x15c   :  { %v5700_v59 = vpop.permute.xlu0 %769  ;;  %v5708_v12 = vpop.permute.xlu1 %476 }
 0x15d   :  { %v5698_v4 = vpop.permute.xlu2 %558  ;;  %8535 = vst [vmem:[#allocation118_spill] sm:$0xff] %v5700_v59  ;;  %v5713_v52 = vsel %vm493_vm13, %v5708_v12, %v5603_v18  ;;  %v302_v18 = vperm.slane %v5091_v17, 0 }
 0x15e   :  { %8534 = vst [vmem:[#allocation117_spill] sm:$0xff] %v5698_v4  ;;  %v531_v37 = vmul.f32 %v515_v31, %v5713_v52 }
 0x15f   :  { %8536 = vst [vmem:[#allocation119_spill] sm:$0xff] %v5708_v12  ;;  %v318_v7 = vmul.f32 %v302_v18, %v8540_v45  ;;  %v1101_v18 = vsel %vm1097_vm6, %v5464_v32, %v5433_v9  ;;  %v8544_v45 = vld [vmem:[#allocation79_spill] sm:$0xff]  ;;  %v944_v12 = vperm.slane %v8549_v42, 3  ;;  %v8558_v9 = vld [vmem:[#allocation90_spill] sm:$0xff] }
 0x160   :  { %8537 = vst [vmem:[#allocation120_spill] sm:$0xff] %v5713_v52  ;;  %1864 = vmatpush.msra.mxu0 %v531_v37  ;;  %v1123_v37 = vperm.slane %v8542_v33, 3  ;;  %v981_v53 = vperm.slane %v8544_v45, 3 }
 0x162   :  { %1164 = vrot.lane.b32.xlu1 %v5667_v43, %s4643_s26  ;;  %1865 = vmatpush.msra.mxu0 %v460_v28  ;;  %v176_v28 = vmul.f32 %v160_v44, %v8543_v26  ;;  %v1030_v44 = vsel %vm8323_vm7, %v5516_v51, %v5460_v46  ;;  %v1561_v26 = vperm.slane %v5418_v5, 3  ;;  %v8557_v46 = vld [vmem:[#allocation103_spill] sm:$0xff] }
 0x163   :  { %1237 = vrot.lane.b32.xlu2 %v4613_v29, %s4642_s16  ;;  %1235 = vrot.lane.b32.xlu0 %v5667_v43, %s4642_s16 }
 0x164   :  { %v5731_v2 = vpop.permute.xlu0 %627  ;;  %v5735_v30 = vpop.permute.xlu1 %1225  ;;  %1866 = vmatpush.msra.mxu0 %v389_v47  ;;  %v1052_v47 = vperm.slane %v5312_v15, 3 }
 0x165   :  { %v5737_v41 = vpop.permute.xlu2 %487  ;;  %v1241_v25 = vsel %vm1239_vm15, %v5735_v30, %v5636_v3  ;;  %v1412_v3 = vperm.slane %v5059_v63, 2 }
 0x166   :  { %8539 = vst [vmem:[#allocation122_spill] sm:$0xff] %v5737_v41  ;;  %v1279_v31 = vmul.f32 %v1263_v62, %v1241_v25  ;;  %1867 = vmatpush.msra.mxu0 %v318_v7  ;;  %v1598_v62 = vperm.slane %v5380_v16, 3  ;;  %v8545_v25 = vld [vmem:[#allocation14_spill] sm:$0xff] }
 0x168   :  { %1929 = vmatpush.msra.mxu3 %v1279_v31  ;;  %1868 = vmatpush.msra.mxu0 %v247_v38  ;;  %v105_v31 = vmul.f32 %v89_v55, %v8545_v25 }
 0x16a   :  { %1869 = vmatpush.msra.mxu0 %v176_v28  ;;  %v4495_v28 = vld [vmem:[%s8170_s1 + $0x80] ss:$8 sm:$0xf0] }
 0x16b   :  { %1166 = vrot.lane.b32.xlu0 %v4613_v29, %s4643_s26  ;;  %v1139_v29 = vmul.f32 %v1123_v37, %v1101_v18  ;;  %v1068_v37 = vmul.f32 %v1052_v47, %v1030_v44  ;;  %v5788_v43 = vor.u32 %v4495_v28, %v4494_v60  ;;  %v873_v47 = vperm.slane %v5382_v58, 3 }
 0x16c   :  { %v557_v7 = vpop.permute.xlu0 %556  ;;  %v5762_v38 = vpop.permute.xlu1 %629  ;;  %1870 = vmatpush.msra.mxu0 %v105_v31  ;;  %v997_v31 = vmul.f32 %v4614_v0, %v981_v53  ;;  %v960_v28 = vmul.f32 %v944_v12, %v922_v1  ;;  %v1487_v60 = vperm.slane %v5205_v49, 3 }
 0x16d   :  { %v5772_v55 = vsel %vm8322_vm9, %v5731_v2, %v5762_v38  ;;  %v5776_v25 = vsel %vm564_vm11, %v557_v7, %v5698_v4  ;;  %v5778_v52 = vpop.permute.xlu2 %1152  ;;  %8551 = vst [vmem:[#allocation79_spill] sm:$0xff] %v5788_v43  ;;  %v1192_v53 = vperm.slane %v5788_v43, 1  ;;  %v1413_v4 = vperm.slane %v5059_v63, 3 }
 0x16e   :  { %8546 = vst [vmem:[#allocation46_spill] sm:$0xff] %v5772_v55  ;;  %1975 = vmatpush.msrb.mxu0 %v1139_v29  ;;  %v1614_v18 = vmul.f32 %v1598_v62, %v5772_v55  ;;  %v1577_v29 = vmul.f32 %v1561_v26, %v5776_v25  ;;  %v8552_v62 = vld [vmem:[#allocation6_spill] sm:$0xff]  ;;  %v802_v26 = vperm.slane %v5444_v50, 3 }
 0x16f   :  { %8547 = vst [vmem:[#allocation33_spill] sm:$0xff] %v5776_v25  ;;  %v5793_v44 = vmul.f32 %v1302_v14, %v8552_v62  ;;  %v8553_v55 = vld [vmem:[#allocation98_spill] sm:$0xff]  ;;  %v1450_v14 = vperm.slane %v5147_v24, 3  ;;  %v780_v62 = vsel %vm777_vm12, %v5543_v10, %v5700_v59 }
 0x170   :  { %8548 = vst [vmem:[#allocation22_spill] sm:$0xff] %v5778_v52  ;;  %1976 = vmatpush.msrb.mxu0 %v1068_v37  ;;  %2000 = vmatpush.msrb.mxu2 %v1614_v18  ;;  %v851_v0 = vsel %vm8272_vm10, %v8553_v55, %v5676_v27  ;;  %v1524_v37 = vperm.slane %v5469_v21, 3  ;;  %vm1168_vm10 = vcmask 982016   ;;  %v731_v27 = vperm.slane %v5496_v35, 3 }
 0x171   :  { %v889_v1 = vmul.f32 %v873_v47, %v851_v0  ;;  %v1560_v47 = vperm.slane %v5418_v5, 2  ;;  %v818_v0 = vmul.f32 %v802_v26, %v780_v62  ;;  %v8560_v62 = vld [vmem:[#allocation74_spill] sm:$0xff] }
 0x172   :  { %1977 = vmatpush.msrb.mxu0 %v997_v31  ;;  %2001 = vmatpush.msrb.mxu2 %v1577_v29  ;;  %v8555_v29 = vld [vmem:[#allocation87_spill] sm:$0xff] }
 0x173   :  { %v638_v25 = vsel %vm8322_vm9, %v8555_v29, %v5731_v2  ;;  %v567_v2 = vsel %vm564_vm11, %v8558_v9, %v557_v7  ;;  %v660_v29 = vperm.slane %v5530_v48, 3  ;;  %v589_v7 = vperm.slane %v5561_v13, 3 }
 0x174   :  { %v5804_v18 = vpop.permute.xlu0 %1156  ;;  %1978 = vmatpush.msrb.mxu0 %v960_v28  ;;  %v486_v31 = vpop.permute.xlu1 %485  ;;  %v709_v28 = vsel %vm706_vm14, %v8557_v46, %v5601_v61 }
 0x175   :  { %8554 = vst [vmem:[#allocation14_spill] sm:$0xff] %v5804_v18  ;;  %v1170_v12 = vsel %vm1168_vm10, %v5674_v19, %v5804_v18  ;;  %v5820_v59 = vsel %vm493_vm13, %v486_v31, %v5737_v41  ;;  %v1376_v41 = vperm.slane %v4980_v57, 3  ;;  %v5833_v61 = vpop.permute.xlu2 %842  ;;  %v747_v26 = vmul.f32 %v731_v27, %v709_v28  ;;  %v8564_v27 = vld [vmem:[#allocation70_spill] sm:$0xff] }
 0x176   :  { %v1208_v6 = vmul.f32 %v1192_v53, %v1170_v12  ;;  %8556 = vst [vmem:[#allocation82_spill] sm:$0xff] %v5820_v59  ;;  %1979 = vmatpush.msrb.mxu0 %v889_v1  ;;  %v1540_v18 = vmul.f32 %v1524_v37, %v5820_v59  ;;  %v1613_v53 = vmul.f32 %v1597_v36, %v638_v25  ;;  %v1523_v12 = vperm.slane %v5469_v21, 2  ;;  %v8561_v1 = vld [vmem:[#allocation96_spill] sm:$0xff] }
 0x177   :  { %8559 = vst [vmem:[#allocation95_spill] sm:$0xff] %v5833_v61  ;;  %v1503_v37 = vmul.f32 %v1487_v60, %v8560_v62  ;;  %v496_v9 = vsel %vm493_vm13, %v8561_v1, %v486_v31  ;;  %v8562_v36 = vld [vmem:[#allocation64_spill] sm:$0xff]  ;;  %v1486_v21 = vperm.slane %v5205_v49, 2  ;;  %v518_v28 = vperm.slane %v5590_v56, 3  ;;  %v8566_v1 = vld [vmem:[#allocation42_spill] sm:$0xff] }
 0x178   :  { %1930 = vmatpush.msra.mxu3 %v1208_v6  ;;  %1980 = vmatpush.msrb.mxu0 %v818_v0  ;;  %v1576_v6 = vmul.f32 %v1560_v47, %v567_v2  ;;  %v1466_v59 = vmul.f32 %v1450_v14, %v8562_v36  ;;  %v676_v0 = vmul.f32 %v660_v29, %v638_v25  ;;  %v1262_v31 = vperm.slane %v5717_v34, 0  ;;  %v8565_v14 = vld [vmem:[#allocation52_spill] sm:$0xff] }
 0x179   :  { %2002 = vmatpush.msrb.mxu2 %v1540_v18  ;;  %v8563_v18 = vld [vmem:[#allocation58_spill] sm:$0xff]  ;;  %v1539_v47 = vmul.f32 %v1523_v12, %v496_v9  ;;  %v1429_v62 = vmul.f32 %v1413_v4, %v8565_v14  ;;  %v1392_v36 = vmul.f32 %v1376_v41, %v8566_v1  ;;  %v605_v29 = vmul.f32 %v589_v7, %v567_v2  ;;  %v8571_v1 = vld [vmem:[#allocation51_spill] sm:$0xff] }
 0x17a   :  { %1960 = vmatpush.msrb.mxu3 %v1613_v53  ;;  %1981 = vmatpush.msrb.mxu0 %v747_v26  ;;  %v425_v60 = vsel %vm422_vm5, %v8564_v27, %v8563_v18  ;;  %v1449_v26 = vperm.slane %v5147_v24, 2  ;;  %v8569_v18 = vld [vmem:[#allocation44_spill] sm:$0xff]  ;;  %v1191_v61 = vperm.slane %v5788_v43, 0  ;;  %v1169_v41 = vsel %vm1168_vm10, %v5778_v52, %v5674_v19 }
 0x17b   :  { %2003 = vmatpush.msrb.mxu2 %v1503_v37  ;;  %v8568_v37 = vld [vmem:[#allocation62_spill] sm:$0xff]  ;;  %v1502_v12 = vmul.f32 %v1486_v21, %v425_v60  ;;  %v534_v2 = vmul.f32 %v518_v28, %v496_v9  ;;  %v376_v21 = vperm.slane %v5149_v23, 3  ;;  %v1051_v19 = vperm.slane %v5312_v15, 2 }
 0x17c   :  { %1961 = vmatpush.msrb.mxu3 %v1576_v6  ;;  %v5847_v53 = vpop.permute.xlu0 %1091  ;;  %1982 = vmatpush.msrb.mxu0 %v676_v0  ;;  %v5852_v25 = vpop.permute.xlu1 %1223  ;;  %v354_v27 = vsel %vm351_vm4, %v8569_v18, %v8568_v37  ;;  %v447_v6 = vperm.slane %v5241_v54, 3  ;;  %v8570_v0 = vld [vmem:[#allocation78_spill] sm:$0xff]  ;;  %v980_v18 = vperm.slane %v8544_v45, 2  ;;  %v1207_v28 = vmul.f32 %v1191_v61, %v1169_v41  ;;  %v8624_v54 = vld [vmem:[#allocation92_spill] sm:$0xff] }
 0x17d   :  { %8567 = vst [vmem:[#allocation6_spill] sm:$0xff] %v5852_v25  ;;  %2004 = vmatpush.msrb.mxu2 %v1466_v59  ;;  %v1240_v4 = vsel %vm1239_vm15, %v5852_v25, %v5735_v30  ;;  %v1122_v59 = vperm.slane %v8542_v33, 2  ;;  %v1100_v14 = vsel %vm1097_vm6, %v8570_v0, %v5464_v32  ;;  %v8572_v30 = vld [vmem:[#allocation50_spill] sm:$0xff]  ;;  %v8576_v0 = vld [vmem:[#allocation21_spill] sm:$0xff]  ;;  %v5886_v61 = vpop.permute.xlu2 %844  ;;  %v234_v41 = vperm.slane %v5012_v20, 3 }
 0x17e   :  { %1962 = vmatpush.msrb.mxu3 %v1539_v47  ;;  %1983 = vmatpush.msrb.mxu0 %v605_v29  ;;  %v1278_v7 = vmul.f32 %v1262_v31, %v1240_v4  ;;  %v1465_v47 = vmul.f32 %v1449_v26, %v354_v27  ;;  %v283_v37 = vsel %vm280_vm3, %v8572_v30, %v8571_v1  ;;  %v8573_v31 = vld [vmem:[#allocation80_spill] sm:$0xff]  ;;  %v8575_v29 = vperm.slane %v4922_v39, 3  ;;  %v8577_v1 = vld [vmem:[#allocation37_spill] sm:$0xff]  ;;  %v8578_v30 = vld [vmem:[#allocation26_spill] sm:$0xff] }
 0x17f   :  { %2005 = vmatpush.msrb.mxu2 %v1429_v62  ;;  %v463_v9 = vmul.f32 %v447_v6, %v425_v60  ;;  %v1029_v32 = vsel %vm8323_vm7, %v8573_v31, %v5516_v51  ;;  %v305_v62 = vperm.slane %v5091_v17, 3  ;;  %v8574_v26 = vld [vmem:[#allocation28_spill] sm:$0xff]  ;;  %v1138_v4 = vmul.f32 %v1122_v59, %v1100_v14  ;;  %v4615_v14 = vld [vmem:[%s8169_s0 + $0x10] sm:$0xff]  ;;  %v8579_v31 = vld [vmem:[#allocation10_spill] sm:$0xff] }
 0x180   :  { %1963 = vmatpush.msrb.mxu3 %v1502_v12  ;;  %1984 = vmatpush.msrb.mxu0 %v534_v2  ;;  %v1355_v12 = vmul.f32 %v8575_v29, %v8574_v26  ;;  %v212_v2 = vsel %vm209_vm2, %v8577_v1, %v8576_v0  ;;  %v1301_v60 = vperm.slane %v4866_v22, 2  ;;  %v1428_v51 = vmul.f32 %v1412_v3, %v283_v37  ;;  %v8582_v29 = vld [vmem:[#allocation3_spill] sm:$0xff]  ;;  %v8619_v17 = vld [vmem:[#allocation36_spill] sm:$0xff] }
 0x181   :  { %1889 = vmatpush.msra.mxu1 %v1278_v7  ;;  %2006 = vmatpush.msrb.mxu2 %v1392_v36  ;;  %v392_v6 = vmul.f32 %v376_v21, %v354_v27  ;;  %v1338_v36 = vperm.slane %v4922_v39, 2  ;;  %v1067_v59 = vmul.f32 %v1051_v19, %v1029_v32  ;;  %v943_v3 = vperm.slane %v8549_v42, 2  ;;  %v8581_v19 = vld [vmem:[#allocation84_spill] sm:$0xff]  ;;  %v5915_v1 = vld [vmem:[%s8171_s2] sm:$0xff] }
 0x182   :  { %1964 = vmatpush.msrb.mxu3 %v1465_v47  ;;  %1985 = vmatpush.msrb.mxu0 %v463_v9  ;;  %v996_v47 = vmul.f32 %v4615_v14, %v980_v18  ;;  %v141_v9 = vsel %vm138_vm1, %v8579_v31, %v8578_v30  ;;  %v8580_v21 = vperm.slane %v4980_v57, 2  ;;  %v321_v26 = vmul.f32 %v305_v62, %v283_v37  ;;  %v8585_v62 = vld [vmem:[#allocation77_spill] sm:$0xff] }
 0x183   :  { %1890 = vmatpush.msra.mxu1 %v1207_v28  ;;  %2007 = vmatpush.msrb.mxu2 %v1355_v12  ;;  %v921_v32 = vsel %vm8288_vm8, %v8581_v19, %v8550_v8  ;;  %v163_v18 = vperm.slane %v4924_v40, 3  ;;  %v8583_v12 = vld [vmem:[#allocation13_spill] sm:$0xff]  ;;  %v872_v0 = vperm.slane %v5382_v58, 2  ;;  %8584 = vst [vmem:[#allocation98_spill] sm:$0xff] %v5915_v1  ;;  %v1354_v37 = vmul.f32 %v1338_v36, %v141_v9 }
 0x184   :  { %v5890_v7 = vpop.permute.xlu0 %1020  ;;  %1965 = vmatpush.msrb.mxu3 %v1428_v51  ;;  %1986 = vmatpush.msrb.mxu0 %v392_v6  ;;  %v5899_v27 = vpop.permute.xlu1 %1093  ;;  %v1391_v28 = vmul.f32 %v8580_v21, %v212_v2  ;;  %v250_v8 = vmul.f32 %v234_v41, %v212_v2  ;;  %vm8586_vm8 = vcmask 56320   ;;  %v92_v51 = vperm.slane %v4821_v11, 3  ;;  %v8587_v31 = vld [vmem:[#allocation93_spill] sm:$0xff] }
 0x185   :  { %1935 = vmatpush.msrb.mxu1 %v1138_v4  ;;  %2008 = vmatpush.msrb.mxu2 %v5793_v44  ;;  %v71_v4 = vsel %vm68_vm0, %v8583_v12, %v8582_v29  ;;  %v850_v44 = vsel %vm8586_vm8, %v8585_v62, %v8553_v55  ;;  %v959_v6 = vmul.f32 %v943_v3, %v921_v32  ;;  %v5929_v55 = vld [vmem:[%s8171_s2 + $0x8] sm:$0xff]  ;;  %vm8340_vm8 = vcmask 719872   ;;  %v8591_v12 = vld [vmem:[#allocation91_spill] sm:$0xff] }
 0x186   :  { %1966 = vmatpush.msrb.mxu3 %v1391_v28  ;;  %1987 = vmatpush.msrb.mxu0 %v321_v26  ;;  %v1317_v14 = vmul.f32 %v1301_v60, %v71_v4  ;;  %v179_v30 = vmul.f32 %v163_v18, %v141_v9  ;;  %v779_v2 = vsel %vm777_vm12, %v8587_v31, %v5543_v10  ;;  %v730_v41 = vperm.slane %v5496_v35, 2  ;;  %v5941_v28 = vpop.permute.xlu2 %1095  ;;  %v8590_v32 = vld [vmem:[#allocation88_spill] sm:$0xff]  ;;  %v8597_v31 = vld [vmem:[#allocation38_spill] sm:$0xff] }
 0x187   :  { %1936 = vmatpush.msrb.mxu1 %v1067_v59  ;;  %v801_v59 = vperm.slane %v5444_v50, 2  ;;  %1871 = vmatmul.f32.vlgmr.msra.gmra.mxu0 %v5915_v1  ;;  %v888_v36 = vmul.f32 %v872_v0, %v850_v44  ;;  %v108_v60 = vmul.f32 %v92_v51, %v71_v4  ;;  %v659_v21 = vperm.slane %v5530_v48, 2  ;;  %8589 = vst [vmem:[#allocation87_spill] sm:$0xff] %v5941_v28  ;;  %v8594_v51 = vld [vmem:[#allocation71_spill] sm:$0xff] }
 0x188   :  { %1967 = vmatpush.msrb.mxu3 %v1354_v37  ;;  %1988 = vmatpush.msrb.mxu0 %v250_v8  ;;  %v517_v29 = vperm.slane %v5590_v56, 2  ;;  %v8592_v37 = vld [vmem:[#allocation97_spill] sm:$0xff]  ;;  %v1414_v28 = vperm.slane %v5059_v63, 4  ;;  %v1124_v23 = vperm.slane %v8542_v33, 4 }
 0x189   :  { %1937 = vmatpush.msrb.mxu1 %v996_v47  ;;  %4517 = vmatmul.msk.f32.vlgmr.msra.gmra.mxu3 %vm8340_vm8, %v5929_v55  ;;  %v8588_v47 = vld [vmem:[#allocation99_spill] sm:$0xff]  ;;  %v817_v3 = vmul.f32 %v801_v59, %v779_v2  ;;  %v675_v18 = vmul.f32 %v659_v21, %v8590_v32  ;;  %v8596_v59 = vld [vmem:[#allocation54_spill] sm:$0xff]  ;;  %v8598_v2 = vld [vmem:[#allocation24_spill] sm:$0xff] }
 0x18a   :  { %1968 = vmatpush.msrb.mxu3 %v1317_v14  ;;  %1989 = vmatpush.msrb.mxu0 %v179_v30  ;;  %v708_v10 = vsel %vm706_vm14, %v8588_v47, %v8557_v46  ;;  %v588_v46 = vperm.slane %v5561_v13, 2  ;;  %v533_v8 = vmul.f32 %v517_v29, %v8592_v37  ;;  %v1600_v47 = vperm.slane %v5380_v16, 5 }
 0x18b   :  { %1938 = vmatpush.msrb.mxu1 %v959_v6  ;;  %1911 = vmatmul.f32.vlgmr.msra.gmra.mxu2 %v5915_v1  ;;  %v746_v19 = vmul.f32 %v730_v41, %v708_v10  ;;  %v8595_v6 = vld [vmem:[#allocation60_spill] sm:$0xff] }
 0x18c   :  { %v5937_v9 = vpop.permute.xlu0 %1022  ;;  %1990 = vmatpush.msrb.mxu0 %v108_v60  ;;  %v5943_v26 = vpop.permute.xlu1 %913  ;;  %4516 = vmatmul.msk.f32.vlgmr.msra.gmra.mxu1 %vm8340_vm8, %v5929_v55  ;;  %v604_v4 = vmul.f32 %v588_v46, %v8591_v12  ;;  %v8600_v41 = vld [vmem:[#allocation16_spill] sm:$0xff]  ;;  %v1599_v60 = vperm.slane %v5380_v16, 4  ;;  %v1562_v12 = vperm.slane %v5418_v5, 4  ;;  %v8616_v16 = vld [vmem:[#allocation41_spill] sm:$0xff] }
 0x18d   :  { %1939 = vmatpush.msrb.mxu1 %v888_v36 }
 0x18e   :  { %v5957_v44 = vpop.permute.xlu2 %1024 }
 0x18f   :  { %1940 = vmatpush.msrb.mxu1 %v817_v3  ;;  %1991 = vmatmul.f32.vlgmr.msrb.gmra.mxu0 %v5915_v1  ;;  %8593 = vst [vmem:[#allocation103_spill] sm:$0xff] %v5957_v44  ;;  %v8617_v44 = vld [vmem:[#allocation40_spill] sm:$0xff] }
 0x191   :  { %1941 = vmatpush.msrb.mxu1 %v746_v19 }
 0x193   :  { %1942 = vmatpush.msrb.mxu1 %v675_v18  ;;  %v1264_v18 = vperm.slane %v5717_v34, 2 }
 0x194   :  { %v5952_v0 = vpop.permute.xlu0 %915  ;;  %v5955_v62 = vpop.permute.xlu1 %771 }
 0x195   :  { %1943 = vmatpush.msrb.mxu1 %v604_v4 }
 0x196   :  { %v5968_v36 = vpop.permute.xlu2 %633 }
 0x197   :  { %1944 = vmatpush.msrb.mxu1 %v533_v8  ;;  %8599 = vst [vmem:[#allocation90_spill] sm:$0xff] %v5968_v36 }
 0x199   :  { %1945 = vmatpush.msrb.mxu1 %v8594_v51  ;;  %v8603_v51 = vld [vmem:[#allocation94_spill] sm:$0xff] }
 0x19b   :  { %1946 = vmatpush.msrb.mxu1 %v8595_v6  ;;  %v1525_v6 = vperm.slane %v8603_v51, 4 }
 0x19c   :  { %v5962_v14 = vpop.permute.xlu0 %700  ;;  %v5964_v30 = vpop.permute.xlu1 %773 }
 0x19d   :  { %1947 = vmatpush.msrb.mxu1 %v8596_v59  ;;  %v8604_v59 = vld [vmem:[#allocation122_spill] sm:$0xff] }
 0x19e   :  { %v5987_v29 = vpop.permute.xlu2 %489 }
 0x19f   :  { %1948 = vmatpush.msrb.mxu1 %v8597_v31  ;;  %v5998_v31 = vsel %vm493_vm13, %v8604_v59, %v5987_v29  ;;  %v8609_v59 = vld [vmem:[#allocation72_spill] sm:$0xff] }
 0x1a0   :  { %8605 = vst [vmem:[#allocation96_spill] sm:$0xff] %v5998_v31  ;;  %v1541_v25 = vmul.f32 %v1525_v6, %v5998_v31  ;;  %v1125_v31 = vperm.slane %v8542_v33, 5 }
 0x1a1   :  { %1949 = vmatpush.msrb.mxu1 %v8598_v2  ;;  %v8606_v2 = vld [vmem:[#allocation117_spill] sm:$0xff] }
 0x1a3   :  { %1950 = vmatpush.msrb.mxu1 %v8600_v41 }
 0x1a4   :  { %1951 = vmatmul.f32.vlgmr.msrb.gmra.mxu1 %v5915_v1  ;;  %v632_v10 = vpop.permute.xlu0 %631  ;;  %v5974_v3 = vpop.permute.xlu1 %702  ;;  %v8615_v1 = vld [vmem:[#allocation5_spill] sm:$0xff] }
 0x1a5   :  { %v5978_v21 = vsel %vm8322_vm9, %v5762_v38, %v632_v10  ;;  %v5982_v19 = vsel %vm8322_vm9, %v632_v10, %v5968_v36  ;;  %v8602_v38 = vld [vmem:[#allocation108_spill] sm:$0xff]  ;;  %vm8628_vm9 = vcmask 7168  }
 0x1a6   :  { %8601 = vst [vmem:[#allocation74_spill] sm:$0xff] %v5982_v19  ;;  %v1615_v46 = vmul.f32 %v1599_v60, %v5978_v21  ;;  %v1616_v32 = vmul.f32 %v1600_v47, %v5982_v19  ;;  %v4644_v47 = vmov 0   ;;  %v1303_v19 = vperm.slane %v4866_v22, 4 }
 0x1a7   :  { %4603 = vset.pattern.permute.xlu1 %v4644_v47  ;;  %4604 = vset.pattern.permute.xlu0 %v4644_v47  ;;  %v8614_v47 = vld [vmem:[#allocation17_spill] sm:$0xff] }
 0x1a8   :  { %2040 = vmatpush.msra.mxu1 %v1615_v46  ;;  %2080 = vmatpush.msra.mxu0 %v1616_v32  ;;  %v1488_v46 = vperm.slane %v5205_v49, 4  ;;  %v1845_v32 = vld [vmem:[%s8172_s3] sm:$0xff]  ;;  %v6026_v36 = vsel %vm68_vm0, %v8615_v1, %v8614_v47  ;;  %v1194_v47 = vperm.slane %v5788_v43, 3  ;;  %s8757_s3 = smov 63  }
 0x1a9   :  { %1848 = vperm.xlu1 %4603, %v1845_v32   ;;  %v1340_v32 = vperm.slane %v4922_v39, 4  ;;  %v8618_v1 = vld [vmem:[#allocation55_spill] sm:$0xff] }
 0x1aa   :  { %v6042_v20 = vsel %vm280_vm3, %v8619_v17, %v8618_v1 }
 0x1ac   :  { %v1230_v4 = vpop.permute.xlu0 %1229  ;;  %v5990_v37 = vpop.permute.xlu1 %560 }
 0x1ad   :  { %v1242_v8 = vsel %vm1239_vm15, %v8602_v38, %v1230_v4  ;;  %v6003_v41 = vsel %vm564_vm11, %v8606_v2, %v5990_v37  ;;  %v8608_v38 = vld [vmem:[#allocation73_spill] sm:$0xff]  ;;  %v1451_v2 = vperm.slane %v5147_v24, 4 }
 0x1ae   :  { %8607 = vst [vmem:[#allocation64_spill] sm:$0xff] %v6003_v41  ;;  %v1280_v60 = vmul.f32 %v1264_v18, %v1242_v8  ;;  %v1578_v10 = vmul.f32 %v1562_v12, %v6003_v41  ;;  %v6013_v52 = vsel %vm422_vm5, %v8609_v59, %v8608_v38  ;;  %v8611_v18 = vld [vmem:[#allocation49_spill] sm:$0xff]  ;;  %v8612_v8 = vld [vmem:[#allocation63_spill] sm:$0xff]  ;;  %v1377_v59 = vperm.slane %v4980_v57, 4 }
 0x1af   :  { %8610 = vst [vmem:[#allocation58_spill] sm:$0xff] %v6013_v52  ;;  %v6019_v12 = vsel %vm351_vm4, %v8612_v8, %v8611_v18  ;;  %v6034_v8 = vsel %vm209_vm2, %v8617_v44, %v8616_v16  ;;  %v1504_v6 = vmul.f32 %v1488_v46, %v6013_v52  ;;  %v6050_v52 = vpop.permute.xlu2 %1160  ;;  %v8623_v16 = vld [vmem:[#allocation14_spill] sm:$0xff]  ;;  %v8626_v41 = vld [vmem:[#allocation27_spill] sm:$0xff] }
 0x1b0   :  { %1969 = vmatpush.msrb.mxu3 %v1280_v60  ;;  %8613 = vst [vmem:[#allocation70_spill] sm:$0xff] %v6019_v12  ;;  %2041 = vmatpush.msra.mxu1 %v1578_v10  ;;  %v1193_v60 = vperm.slane %v5788_v43, 2  ;;  %v1265_v10 = vperm.slane %v5717_v34, 3  ;;  %v1467_v44 = vmul.f32 %v1451_v2, %v6019_v12  ;;  %v1053_v34 = vperm.slane %v5312_v15, 4 }
 0x1b1   :  { %8621 = vst [vmem:[#allocation52_spill] sm:$0xff] %v6050_v52 }
 0x1b2   :  { %2042 = vmatpush.msra.mxu1 %v1541_v25  ;;  %v8620_v25 = vld [vmem:[#allocation89_spill] sm:$0xff] }
 0x1b3   :  { %v1102_v46 = vsel %vm1097_vm6, %v8620_v25, %v5847_v53  ;;  %v982_v25 = vperm.slane %v8544_v45, 4 }
 0x1b4   :  { %v1159_v39 = vpop.permute.xlu0 %1158  ;;  %v6052_v57 = vpop.permute.xlu1 %1231  ;;  %2043 = vmatpush.msra.mxu1 %v1504_v6  ;;  %v1103_v6 = vsel %vm1097_vm6, %v5847_v53, %v5899_v27  ;;  %v1032_v53 = vsel %vm8323_vm7, %v5890_v7, %v5937_v9 }
 0x1b5   :  { %8622 = vst [vmem:[#allocation42_spill] sm:$0xff] %v6052_v57  ;;  %v1171_v17 = vsel %vm1168_vm10, %v8623_v16, %v1159_v39  ;;  %v1243_v2 = vsel %vm1239_vm15, %v1230_v4, %v6052_v57  ;;  %v1172_v12 = vsel %vm1168_vm10, %v1159_v39, %v6050_v52  ;;  %v1031_v16 = vsel %vm8323_vm7, %v8624_v54, %v5890_v7 }
 0x1b6   :  { %v1209_v33 = vmul.f32 %v1193_v60, %v1171_v17  ;;  %2044 = vmatpush.msra.mxu1 %v1467_v44  ;;  %v1281_v43 = vmul.f32 %v1265_v10, %v1243_v2  ;;  %v1430_v60 = vmul.f32 %v1414_v28, %v6042_v20  ;;  %v8625_v17 = vld [vmem:[#allocation12_spill] sm:$0xff]  ;;  %v1140_v39 = vmul.f32 %v1124_v23, %v1102_v46  ;;  %v4616_v23 = vld [vmem:[%s8169_s0 + $0x20] sm:$0xff]  ;;  %v8627_v46 = vld [vmem:[#allocation109_spill] sm:$0xff] }
 0x1b7   :  { %v6073_v4 = vsel %vm138_vm1, %v8626_v41, %v8625_v17  ;;  %v1054_v57 = vperm.slane %v5312_v15, 5  ;;  %v983_v52 = vperm.slane %v8544_v45, 5  ;;  %v1210_v54 = vmul.f32 %v1194_v47, %v1172_v12  ;;  %v8629_v47 = vld [vmem:[#allocation116_spill] sm:$0xff] }
 0x1b8   :  { %1970 = vmatpush.msrb.mxu3 %v1209_v33  ;;  %2009 = vmatpush.msrb.mxu2 %v1281_v43  ;;  %v1393_v28 = vmul.f32 %v1377_v59, %v6034_v8  ;;  %v1141_v10 = vmul.f32 %v1125_v31, %v1103_v6  ;;  %v1069_v44 = vmul.f32 %v1053_v34, %v1031_v16  ;;  %v945_v41 = vperm.slane %v8549_v42, 4  ;;  %v8630_v16 = vld [vmem:[#allocation95_spill] sm:$0xff] }
 0x1b9   :  { %2045 = vmatpush.msra.mxu1 %v1430_v60  ;;  %v998_v33 = vmul.f32 %v4616_v23, %v982_v25  ;;  %v923_v2 = vsel %vm8628_vm9, %v8627_v46, %v5943_v26  ;;  %v1356_v43 = vmul.f32 %v1340_v32, %v6073_v4  ;;  %v1319_v7 = vmul.f32 %v1303_v19, %v6026_v36  ;;  %v8631_v60 = vld [vmem:[#allocation113_spill] sm:$0xff] }
 0x1ba   :  { %2015 = vmatpush.msra.mxu3 %v1140_v39  ;;  %2010 = vmatpush.msrb.mxu2 %v1210_v54  ;;  %v1563_v31 = vperm.slane %v5418_v5, 5  ;;  %v1070_v12 = vmul.f32 %v1054_v57, %v1032_v53  ;;  %v999_v59 = vmul.f32 %v8629_v47, %v983_v52  ;;  %v874_v25 = vperm.slane %v5382_v58, 4 }
 0x1bb   :  { %2046 = vmatpush.msra.mxu1 %v1393_v28  ;;  %v946_v6 = vperm.slane %v8549_v42, 5  ;;  %vm8632_vm9 = vcmask 56320   ;;  %vm8633_vm7 = vcmask 7168   ;;  %4518 = vmatmul.msk.f32.vlgmr.msrb.gmra.mxu3 %vm8340_vm8, %v5929_v55  ;;  %v961_v52 = vmul.f32 %v945_v41, %v923_v2  ;;  %v8636_v28 = vld [vmem:[#allocation118_spill] sm:$0xff] }
 0x1bc   :  { %2016 = vmatpush.msra.mxu3 %v1069_v44  ;;  %2055 = vmatpush.msra.mxu2 %v1141_v10  ;;  %v6091_v34 = vpop.permute.xlu0 %562  ;;  %v852_v39 = vsel %vm8632_vm9, %v8631_v60, %v8630_v16  ;;  %v924_v19 = vsel %vm8633_vm7, %v5943_v26, %v5952_v0  ;;  %v6102_v32 = vpop.permute.xlu1 %917  ;;  %v803_v53 = vperm.slane %v5444_v50, 4  ;;  %v875_v54 = vperm.slane %v5382_v58, 5  ;;  %vm8635_vm7 = vmmov %vm8632_vm9  ;;  %v8637_v41 = vld [vmem:[#allocation106_spill] sm:$0xff] }
 0x1bd   :  { %2047 = vmatpush.msra.mxu1 %v1356_v43  ;;  %v6107_v57 = vsel %vm564_vm11, %v5990_v37, %v6091_v34  ;;  %v853_v26 = vsel %vm8635_vm7, %v8630_v16, %v5886_v61  ;;  %v781_v10 = vsel %vm777_vm12, %v8636_v28, %v5955_v62  ;;  %4519 = vmatmul.msk.f32.vlgmr.msrb.gmra.mxu2 %vm8340_vm8, %v5929_v55  ;;  %v804_v2 = vperm.slane %v5444_v50, 5  ;;  %v8640_v28 = vld [vmem:[#allocation46_spill] sm:$0xff] }
 0x1be   :  { %8634 = vst [vmem:[#allocation62_spill] sm:$0xff] %v6107_v57  ;;  %2017 = vmatpush.msra.mxu3 %v998_v33  ;;  %2056 = vmatpush.msra.mxu2 %v1070_v12  ;;  %v1579_v37 = vmul.f32 %v1563_v31, %v6107_v57  ;;  %v890_v44 = vmul.f32 %v874_v25, %v852_v39  ;;  %v732_v33 = vperm.slane %v5496_v35, 4  ;;  %v661_v43 = vperm.slane %v5530_v48, 4  ;;  %v6131_v31 = vpop.permute.xlu2 %775 }
 0x1bf   :  { %2048 = vmatpush.msra.mxu1 %v1319_v7  ;;  %v962_v23 = vmul.f32 %v946_v6, %v924_v19  ;;  %v710_v46 = vsel %vm706_vm14, %v8637_v41, %v5962_v14  ;;  %v782_v7 = vsel %vm777_vm12, %v5955_v62, %v5964_v30  ;;  %v819_v12 = vmul.f32 %v803_v53, %v781_v10 }
 0x1c0   :  { %2018 = vmatpush.msra.mxu3 %v961_v52  ;;  %2057 = vmatpush.msra.mxu2 %v999_v59  ;;  %v891_v47 = vmul.f32 %v875_v54, %v853_v26  ;;  %v733_v59 = vperm.slane %v5496_v35, 5  ;;  %v1526_v25 = vperm.slane %v8603_v51, 5  ;;  %v590_v6 = vperm.slane %v5561_v13, 4  ;;  %v8638_v54 = vld [vmem:[#allocation61_spill] sm:$0xff] }
 0x1c1   :  { %2081 = vmatpush.msra.mxu0 %v1579_v37  ;;  %v711_v16 = vsel %vm706_vm14, %v5962_v14, %v5974_v3  ;;  %v748_v60 = vmul.f32 %v732_v33, %v710_v46  ;;  %v820_v19 = vmul.f32 %v804_v2, %v782_v7  ;;  %v662_v52 = vperm.slane %v5530_v48, 5  ;;  %v8644_v2 = vld [vmem:[#allocation33_spill] sm:$0xff]  ;;  %v8668_v48 = vld [vmem:[#allocation87_spill] sm:$0xff] }
 0x1c2   :  { %2019 = vmatpush.msra.mxu3 %v890_v44  ;;  %2058 = vmatpush.msra.mxu2 %v962_v23  ;;  %v1489_v53 = vperm.slane %v5205_v49, 5  ;;  %v6148_v26 = vsel %vm422_vm5, %v8608_v38, %v8638_v54  ;;  %v677_v10 = vmul.f32 %v661_v43, %v8640_v28  ;;  %v519_v14 = vperm.slane %v5590_v56, 4  ;;  %v8642_v38 = vld [vmem:[#allocation66_spill] sm:$0xff]  ;;  %v8649_v28 = vld [vmem:[#allocation69_spill] sm:$0xff] }
 0x1c3   :  { %8639 = vst [vmem:[#allocation44_spill] sm:$0xff] %v6148_v26  ;;  %v749_v44 = vmul.f32 %v733_v59, %v711_v16  ;;  %v591_v33 = vperm.slane %v5561_v13, 5  ;;  %v1452_v41 = vperm.slane %v5147_v24, 5  ;;  %v6163_v46 = vsel %vm351_vm4, %v8611_v18, %v8642_v38  ;;  %v8647_v16 = vld [vmem:[#allocation82_spill] sm:$0xff]  ;;  %v8669_v38 = vld [vmem:[#allocation65_spill] sm:$0xff] }
 0x1c4   :  { %2020 = vmatpush.msra.mxu3 %v819_v12  ;;  %2059 = vmatpush.msra.mxu2 %v891_v47  ;;  %v6139_v62 = vpop.permute.xlu1 %846  ;;  %8643 = vst [vmem:[#allocation51_spill] sm:$0xff] %v6163_v46  ;;  %v606_v43 = vmul.f32 %v590_v6, %v8644_v2  ;;  %v678_v7 = vmul.f32 %v662_v52, %v5978_v21  ;;  %v520_v47 = vperm.slane %v5590_v56, 5  ;;  %v1415_v59 = vperm.slane %v5059_v63, 5  ;;  %v8648_v21 = vld [vmem:[#allocation64_spill] sm:$0xff]  ;;  %v8651_v2 = vld [vmem:[#allocation18_spill] sm:$0xff]  ;;  %v8660_v56 = vld [vmem:[#allocation31_spill] sm:$0xff] }
 0x1c5   :  { %v6141_v39 = vpop.permute.xlu0 %491  ;;  %v1505_v12 = vmul.f32 %v1489_v53, %v6148_v26  ;;  %v535_v6 = vmul.f32 %v519_v14, %v8647_v16  ;;  %v607_v52 = vmul.f32 %v591_v33, %v8648_v21  ;;  %v1468_v53 = vmul.f32 %v1452_v41, %v6163_v46  ;;  %v8653_v14 = vld [vmem:[#allocation25_spill] sm:$0xff]  ;;  %v8656_v41 = vld [vmem:[#allocation19_spill] sm:$0xff] }
 0x1c6   :  { %v6155_v37 = vsel %vm493_vm13, %v5987_v29, %v6141_v39  ;;  %2021 = vmatpush.msra.mxu3 %v748_v60  ;;  %2060 = vmatpush.msra.mxu2 %v820_v19  ;;  %v1304_v29 = vperm.slane %v4866_v22, 5  ;;  %v165_v60 = vperm.slane %v4924_v40, 5  ;;  %v94_v19 = vperm.slane %v4821_v11, 5  ;;  %v8655_v33 = vld [vmem:[#allocation29_spill] sm:$0xff]  ;;  %v8657_v11 = vld [vmem:[#allocation79_spill] sm:$0xff]  ;;  %v8663_v22 = vld [vmem:[#allocation76_spill] sm:$0xff] }
 0x1c7   :  { %8641 = vst [vmem:[#allocation78_spill] sm:$0xff] %v6155_v37  ;;  %v1542_v23 = vmul.f32 %v1526_v25, %v6155_v37  ;;  %v8645_v25 = vld [vmem:[#allocation56_spill] sm:$0xff]  ;;  %v1341_v21 = vperm.slane %v8656_v41, 5  ;;  %v1195_v40 = vperm.slane %v8657_v11, 4  ;;  %vm8672_vm9 = vcmask 1039360  }
 0x1c8   :  { %2022 = vmatpush.msra.mxu3 %v677_v10  ;;  %2061 = vmatpush.msra.mxu2 %v749_v44  ;;  %v6174_v18 = vsel %vm280_vm3, %v8618_v1, %v8645_v25  ;;  %v449_v10 = vperm.slane %v8649_v28, 5  ;;  %v8650_v44 = vld [vmem:[#allocation121_spill] sm:$0xff]  ;;  %v8661_v41 = vld [vmem:[#allocation52_spill] sm:$0xff]  ;;  %vm8681_vm7 = vcmask 449536  }
 0x1c9   :  { %2082 = vmatpush.msra.mxu0 %v1542_v23  ;;  %8646 = vst [vmem:[#allocation50_spill] sm:$0xff] %v6174_v18  ;;  %v1266_v23 = vperm.slane %v8650_v44, 4  ;;  %v8652_v1 = vld [vmem:[#allocation17_spill] sm:$0xff]  ;;  %v1431_v57 = vmul.f32 %v1415_v59, %v6174_v18  ;;  %v8666_v18 = vld [vmem:[#allocation58_spill] sm:$0xff] }
 0x1ca   :  { %2023 = vmatpush.msra.mxu3 %v606_v43  ;;  %2062 = vmatpush.msra.mxu2 %v678_v7  ;;  %v6186_v26 = vsel %vm68_vm0, %v8652_v1, %v8651_v2  ;;  %v8654_v43 = vld [vmem:[#allocation41_spill] sm:$0xff]  ;;  %v6193_v7 = vpop.permute.xlu2 %1162  ;;  %v8658_v1 = vld [vmem:[#allocation96_spill] sm:$0xff] }
 0x1cb   :  { %2083 = vmatpush.msra.mxu0 %v1505_v12  ;;  %v6191_v16 = vsel %vm209_vm2, %v8654_v43, %v8653_v14  ;;  %v1378_v12 = vperm.slane %v8655_v33, 5  ;;  %v536_v28 = vmul.f32 %v520_v47, %v8658_v1  ;;  %v8659_v43 = vld [vmem:[#allocation57_spill] sm:$0xff]  ;;  %v1173_v33 = vsel %vm1168_vm10, %v8661_v41, %v6193_v7  ;;  %v8665_v1 = vld [vmem:[#allocation75_spill] sm:$0xff] }
 0x1cc   :  { %2024 = vmatpush.msra.mxu3 %v535_v6  ;;  %2063 = vmatpush.msra.mxu2 %v607_v52  ;;  %v1234_v46 = vpop.permute.xlu1 %1233  ;;  %v378_v2 = vperm.slane %v8659_v43, 5  ;;  %v6206_v6 = vsel %vm138_vm1, %v8625_v17, %v8660_v56  ;;  %v8662_v52 = vld [vmem:[#allocation42_spill] sm:$0xff]  ;;  %v1126_v59 = vperm.slane %v8665_v1, 6  ;;  %v465_v43 = vmul.f32 %v449_v10, %v8666_v18  ;;  %v8667_v17 = vld [vmem:[#allocation48_spill] sm:$0xff] }
 0x1cd   :  { %v6198_v37 = vpop.permute.xlu0 %704  ;;  %2084 = vmatpush.msra.mxu0 %v1468_v53  ;;  %v1244_v14 = vsel %vm1239_vm15, %v8662_v52, %v1234_v46  ;;  %v8664_v53 = vld [vmem:[#allocation35_spill] sm:$0xff]  ;;  %v307_v56 = vperm.slane %v8667_v17, 5  ;;  %v1104_v41 = vsel %vm1097_vm6, %v5899_v27, %v8668_v48  ;;  %v1394_v52 = vmul.f32 %v1378_v12, %v6191_v16  ;;  %v8674_v12 = vld [vmem:[#allocation45_spill] sm:$0xff] }
 0x1ce   :  { %2025 = vmatpush.msra.mxu3 %v8663_v22  ;;  %v236_v47 = vperm.slane %v8664_v53, 5  ;;  %2064 = vmatpush.msra.mxu2 %v536_v28  ;;  %v1282_v13 = vmul.f32 %v1266_v23, %v1244_v14  ;;  %v1320_v22 = vmul.f32 %v1304_v29, %v6186_v26  ;;  %v6225_v53 = vmul.f32 %v94_v19, %v6026_v36  ;;  %v8671_v14 = vld [vmem:[#allocation103_spill] sm:$0xff] }
 0x1cf   :  { %2085 = vmatpush.msra.mxu0 %v1431_v57  ;;  %v1211_v28 = vmul.f32 %v1195_v40, %v1173_v33  ;;  %v8670_v57 = vld [vmem:[#allocation70_spill] sm:$0xff]  ;;  %v1055_v10 = vperm.slane %v5312_v15, 6  ;;  %v984_v23 = vperm.slane %v8544_v45, 6  ;;  %v1033_v27 = vsel %vm8672_vm9, %v5937_v9, %v8671_v14 }
 0x1d0   :  { %2026 = vmatpush.msra.mxu3 %v8669_v38  ;;  %2065 = vmatpush.msra.mxu2 %v465_v43  ;;  %v394_v18 = vmul.f32 %v378_v2, %v8670_v57  ;;  %v8673_v38 = vld [vmem:[#allocation53_spill] sm:$0xff]  ;;  %v1357_v29 = vmul.f32 %v1341_v21, %v6206_v6  ;;  %v181_v36 = vmul.f32 %v165_v60, %v6073_v4  ;;  %v1416_v40 = vperm.slane %v5059_v63, 6  ;;  %v8675_v43 = vld [vmem:[#allocation67_spill] sm:$0xff]  ;;  %v8676_v60 = vld [vmem:[#allocation86_spill] sm:$0xff] }
 0x1d1   :  { %2049 = vmatpush.msra.mxu1 %v1282_v13  ;;  %2086 = vmatpush.msra.mxu0 %v1394_v52  ;;  %v1142_v13 = vmul.f32 %v1126_v59, %v1104_v41  ;;  %v323_v19 = vmul.f32 %v307_v56, %v6042_v20  ;;  %v1267_v2 = vperm.slane %v8650_v44, 5  ;;  %v252_v33 = vmul.f32 %v236_v47, %v6034_v8  ;;  %v8677_v59 = vld [vmem:[#allocation43_spill] sm:$0xff]  ;;  %v8679_v57 = vld [vmem:[#allocation110_spill] sm:$0xff] }
 0x1d2   :  { %2027 = vmatpush.msra.mxu3 %v8673_v38  ;;  %2066 = vmatpush.msra.mxu2 %v394_v18  ;;  %v6243_v9 = vsel %vm280_vm3, %v8645_v25, %v8674_v12  ;;  %v6248_v4 = vsel %vm422_vm5, %v8638_v54, %v8675_v43  ;;  %v1602_v21 = vperm.slane %v8676_v60, 7  ;;  %v1490_v20 = vperm.slane %v5205_v49, 6  ;;  %v8678_v54 = vld [vmem:[#allocation112_spill] sm:$0xff]  ;;  %v8680_v18 = vld [vmem:[#allocation90_spill] sm:$0xff]  ;;  %v8715_v63 = vld [vmem:[#allocation19_spill] sm:$0xff] }
 0x1d3   :  { %2050 = vmatpush.msra.mxu1 %v1211_v28  ;;  %2087 = vmatpush.msra.mxu0 %v1357_v29  ;;  %v1565_v56 = vperm.slane %v5418_v5, 7  ;;  %v1601_v8 = vperm.slane %v8676_v60, 6  ;;  %v1071_v41 = vmul.f32 %v1055_v10, %v1033_v27  ;;  %v1000_v52 = vmul.f32 %v8678_v54, %v984_v23  ;;  %v8684_v60 = vld [vmem:[#allocation114_spill] sm:$0xff]  ;;  %v8688_v54 = vld [vmem:[#allocation119_spill] sm:$0xff] }
 0x1d4   :  { %2028 = vmatpush.msra.mxu3 %v8677_v59  ;;  %2067 = vmatpush.msra.mxu2 %v323_v19  ;;  %v6255_v25 = vpop.permute.xlu1 %1164  ;;  %v1528_v28 = vperm.slane %v8603_v51, 7  ;;  %v6264_v38 = vsel %vm8681_vm7, %v8680_v18, %v8679_v57  ;;  %v8682_v19 = vld [vmem:[#allocation30_spill] sm:$0xff]  ;;  %vm8683_vm9 = vcmask 7168   ;;  %v1196_v27 = vperm.slane %v8657_v11, 5  ;;  %v8685_v59 = vld [vmem:[#allocation7_spill] sm:$0xff] }
 0x1d5   :  { %2095 = vmatpush.msrb.mxu1 %v1142_v13  ;;  %v6257_v47 = vpop.permute.xlu0 %1235  ;;  %2088 = vmatpush.msra.mxu0 %v1320_v22  ;;  %v947_v13 = vperm.slane %v8549_v42, 6  ;;  %v925_v10 = vsel %vm8683_vm9, %v5952_v0, %v6102_v32  ;;  %v1564_v12 = vperm.slane %v5418_v5, 6  ;;  %v1127_v43 = vperm.slane %v8665_v1, 7  ;;  %v8689_v57 = vld [vmem:[#allocation98_spill] sm:$0xff] }
 0x1d6   :  { %v1245_v29 = vsel %vm1239_vm15, %v1234_v46, %v6257_v47  ;;  %2029 = vmatpush.msra.mxu3 %v8682_v19  ;;  %2068 = vmatpush.msra.mxu2 %v252_v33  ;;  %v6279_v46 = vsel %vm564_vm11, %v6091_v34, %v8684_v60  ;;  %v1174_v22 = vsel %vm1168_vm10, %v6193_v7, %v6255_v25  ;;  %v876_v0 = vperm.slane %v5382_v58, 6  ;;  %v8687_v7 = vld [vmem:[#allocation81_spill] sm:$0xff] }
 0x1d7   :  { %v1283_v23 = vmul.f32 %v1267_v2, %v1245_v29  ;;  %2096 = vmatpush.msrb.mxu1 %v1071_v41  ;;  %v1617_v5 = vmul.f32 %v1601_v8, %v6264_v38  ;;  %vm8686_vm7 = vcmask 56320   ;;  %v1527_v34 = vperm.slane %v8603_v51, 6 }
 0x1d8   :  { %2030 = vmatpush.msra.mxu3 %v8685_v59  ;;  %4520 = vmatmul.msk.f32.vlgmr.msra.gmra.mxu1 %vm8340_vm8, %v5929_v55  ;;  %v854_v1 = vsel %vm8686_vm7, %v5886_v61, %v6139_v62  ;;  %v1056_v2 = vperm.slane %v5312_v15, 7  ;;  %v1114_v33 = vsel %vm1097_vm6, %v8668_v48, %v8687_v7  ;;  %v805_v41 = vperm.slane %v5444_v50, 6 }
 0x1d9   :  { %2069 = vmatpush.msra.mxu2 %v181_v36  ;;  %2097 = vmatpush.msrb.mxu1 %v1000_v52  ;;  %v6301_v8 = vsel %vm493_vm13, %v6141_v39, %v8688_v54  ;;  %v963_v61 = vmul.f32 %v947_v13, %v925_v10  ;;  %v783_v51 = vsel %vm777_vm12, %v5964_v30, %v6131_v31  ;;  %v985_v36 = vperm.slane %v8544_v45, 7  ;;  %v8690_v52 = vld [vmem:[#allocation111_spill] sm:$0xff]  ;;  %v8691_v39 = vld [vmem:[#allocation85_spill] sm:$0xff] }
 0x1da   :  { %2031 = vmatmul.f32.vlgmr.msra.gmra.mxu3 %v8689_v57  ;;  %2089 = vmatpush.msra.mxu0 %v1283_v23  ;;  %v1212_v15 = vmul.f32 %v1196_v27, %v1174_v22  ;;  %v1580_v48 = vmul.f32 %v1564_v12, %v6279_v46  ;;  %v1618_v18 = vmul.f32 %v1602_v21, %v8690_v52  ;;  %vm8692_vm9 = vcmask 1039360   ;;  %v8693_v10 = vld [vmem:[#allocation39_spill] sm:$0xff]  ;;  %v8694_v23 = vld [vmem:[#allocation66_spill] sm:$0xff]  ;;  %v8707_v52 = vld [vmem:[#allocation29_spill] sm:$0xff] }
 0x1db   :  { %2120 = vmatpush.msrb.mxu3 %v1617_v5  ;;  %2070 = vmatpush.msra.mxu2 %v6225_v53  ;;  %v1043_v29 = vsel %vm8692_vm9, %v8671_v14, %v8691_v39  ;;  %v734_v19 = vperm.slane %v5496_v35, 6  ;;  %v892_v30 = vmul.f32 %v876_v0, %v854_v1  ;;  %v1143_v13 = vmul.f32 %v1127_v43, %v1114_v33  ;;  %v8695_v27 = vld [vmem:[#allocation115_spill] sm:$0xff]  ;;  %v8696_v43 = vld [vmem:[#allocation100_spill] sm:$0xff] }
 0x1dc   :  { %2098 = vmatpush.msrb.mxu1 %v963_v61  ;;  %2071 = vmatmul.f32.vlgmr.msra.gmra.mxu2 %v8689_v57  ;;  %v712_v53 = vsel %vm706_vm14, %v5974_v3, %v6198_v37  ;;  %v1543_v45 = vmul.f32 %v1527_v34, %v6301_v8  ;;  %v1453_v21 = vperm.slane %v5147_v24, 6  ;;  %v6324_v14 = vsel %vm351_vm4, %v8694_v23, %v8693_v10  ;;  %v4617_v24 = vld [vmem:[%s8169_s0 + $0x38] sm:$0xff]  ;;  %v8698_v34 = vld [vmem:[#allocation83_spill] sm:$0xff] }
 0x1dd   :  { %2090 = vmatpush.msra.mxu0 %v1212_v15  ;;  %2121 = vmatpush.msrb.mxu3 %v1580_v48  ;;  %v1581_v12 = vmul.f32 %v1565_v56, %v8695_v27  ;;  %v821_v60 = vmul.f32 %v805_v41, %v783_v51  ;;  %v663_v22 = vperm.slane %v8696_v43, 6  ;;  %v1072_v3 = vmul.f32 %v1056_v2, %v1043_v29  ;;  %v8697_v56 = vld [vmem:[#allocation120_spill] sm:$0xff]  ;;  %v8701_v54 = vld [vmem:[#allocation11_spill] sm:$0xff]  ;;  %v8703_v51 = vld [vmem:[#allocation25_spill] sm:$0xff] }
 0x1de   :  { %2160 = vmatpush.msrb.mxu2 %v1618_v18  ;;  %2099 = vmatpush.msrb.mxu1 %v892_v30  ;;  %v1506_v59 = vmul.f32 %v1490_v20, %v6248_v4  ;;  %v1001_v0 = vmul.f32 %v4617_v24, %v985_v36  ;;  %v948_v5 = vperm.slane %v8549_v42, 7  ;;  %v1544_v1 = vmul.f32 %v1528_v28, %v8697_v56  ;;  %v8700_v20 = vld [vmem:[#allocation102_spill] sm:$0xff]  ;;  %v8702_v42 = vld [vmem:[#allocation32_spill] sm:$0xff]  ;;  %v8704_v15 = vld [vmem:[#allocation101_spill] sm:$0xff] }
 0x1df   :  { %2135 = vmatpush.msrb.mxu0 %v1143_v13  ;;  %2122 = vmatpush.msrb.mxu3 %v1543_v45  ;;  %vm8699_vm7 = vcmask 7168   ;;  %v750_v33 = vmul.f32 %v734_v19, %v712_v53  ;;  %v1469_v49 = vmul.f32 %v1453_v21, %v6324_v14  ;;  %v592_v2 = vperm.slane %v8700_v20, 6  ;;  %v8706_v48 = vld [vmem:[#allocation74_spill] sm:$0xff]  ;;  %v8708_v19 = vld [vmem:[#allocation105_spill] sm:$0xff]  ;;  %v8711_v45 = vld [vmem:[#allocation8_spill] sm:$0xff] }
 0x1e0   :  { %v926_v7 = vsel %vm8699_vm7, %v6102_v32, %v8698_v34  ;;  %2161 = vmatpush.msrb.mxu2 %v1581_v12  ;;  %2100 = vmatpush.msrb.mxu1 %v821_v60  ;;  %v877_v41 = vperm.slane %v5382_v58, 7  ;;  %v1305_v61 = vperm.slane %v8701_v54, 6  ;;  %v6346_v28 = vsel %vm209_vm2, %v8703_v51, %v8702_v42  ;;  %v8709_v13 = vld [vmem:[#allocation9_spill] sm:$0xff]  ;;  %v8710_v53 = vld [vmem:[#allocation18_spill] sm:$0xff]  ;;  %v8712_v21 = vld [vmem:[#allocation31_spill] sm:$0xff] }
 0x1e1   :  { %2136 = vmatpush.msrb.mxu0 %v1072_v3  ;;  %2123 = vmatpush.msrb.mxu3 %v1506_v59  ;;  %vm8705_vm9 = vcmask 56320   ;;  %v679_v36 = vmul.f32 %v663_v22, %v8706_v48  ;;  %v1379_v18 = vperm.slane %v8707_v52, 6  ;;  %v806_v39 = vperm.slane %v5444_v50, 7  ;;  %v8713_v50 = vld [vmem:[#allocation104_spill] sm:$0xff]  ;;  %v8716_v60 = vld [vmem:[#allocation62_spill] sm:$0xff]  ;;  %v8717_v59 = vld [vmem:[#allocation69_spill] sm:$0xff] }
 0x1e2   :  { %v855_v32 = vsel %vm8705_vm9, %v6139_v62, %v8704_v15  ;;  %2162 = vmatpush.msrb.mxu2 %v1544_v1  ;;  %2101 = vmatpush.msrb.mxu1 %v750_v33  ;;  %v964_v58 = vmul.f32 %v948_v5, %v926_v7  ;;  %v1432_v29 = vmul.f32 %v1416_v40, %v6243_v9  ;;  %v521_v30 = vperm.slane %v8708_v19, 6  ;;  %v8714_v27 = vld [vmem:[#allocation68_spill] sm:$0xff]  ;;  %v8720_v1 = vld [vmem:[#allocation57_spill] sm:$0xff]  ;;  %v8721_v7 = vld [vmem:[#allocation78_spill] sm:$0xff] }
 0x1e3   :  { %2137 = vmatpush.msrb.mxu0 %v1001_v0  ;;  %2124 = vmatpush.msrb.mxu3 %v1469_v49  ;;  %v6361_v62 = vsel %vm68_vm0, %v8710_v53, %v8709_v13  ;;  %v6366_v10 = vsel %vm138_vm1, %v8712_v21, %v8711_v45  ;;  %v784_v23 = vsel %vm777_vm12, %v6131_v31, %v8713_v50  ;;  %v1342_v40 = vperm.slane %v8715_v63, 6  ;;  %v8718_v0 = vld [vmem:[#allocation107_spill] sm:$0xff]  ;;  %v8727_v53 = vld [vmem:[#allocation6_spill] sm:$0xff] }
 0x1e4   :  { %2163 = vmatpush.msrb.mxu2 %v8714_v27  ;;  %2102 = vmatpush.msrb.mxu1 %v679_v36  ;;  %v735_v12 = vperm.slane %v5496_v35, 7  ;;  %v608_v22 = vmul.f32 %v592_v2, %v8716_v60  ;;  %v893_v3 = vmul.f32 %v877_v41, %v855_v32  ;;  %v450_v24 = vperm.slane %v8717_v59, 6  ;;  %v8719_v31 = vld [vmem:[#allocation59_spill] sm:$0xff]  ;;  %v1238_v2 = vpop.permute.xlu2 %1237  ;;  %v8729_v27 = vld [vmem:[#allocation20_spill] sm:$0xff] }
 0x1e5   :  { %2138 = vmatpush.msrb.mxu0 %v964_v58  ;;  %2125 = vmatpush.msrb.mxu3 %v1432_v29  ;;  %v713_v5 = vsel %vm706_vm14, %v6198_v37, %v8718_v0  ;;  %v1395_v56 = vmul.f32 %v1379_v18, %v6346_v28  ;;  %v379_v35 = vperm.slane %v8720_v1, 6  ;;  %v822_v34 = vmul.f32 %v806_v39, %v784_v23  ;;  %v1167_v37 = vpop.permute.xlu0 %1166  ;;  %v8722_v54 = vld [vmem:[#allocation47_spill] sm:$0xff]  ;;  %v8724_v58 = vld [vmem:[#allocation34_spill] sm:$0xff] }
 0x1e6   :  { %4521 = vmatmul.msk.f32.vlgmr.msra.gmra.mxu0 %vm8340_vm8, %v5929_v55  ;;  %2164 = vmatpush.msrb.mxu2 %v8719_v31  ;;  %v537_v33 = vmul.f32 %v521_v30, %v8721_v7  ;;  %v664_v49 = vperm.slane %v8696_v43, 7  ;;  %v1268_v41 = vperm.slane %v8650_v44, 6  ;;  %v1358_v42 = vmul.f32 %v1342_v40, %v6366_v10  ;;  %v8723_v43 = vld [vmem:[#allocation44_spill] sm:$0xff]  ;;  %v8726_v30 = vld [vmem:[#allocation35_spill] sm:$0xff]  ;;  %v8730_v40 = vld [vmem:[#allocation22_spill] sm:$0xff] }
 0x1e7   :  { %2103 = vmatpush.msrb.mxu1 %v608_v22  ;;  %2139 = vmatpush.msrb.mxu0 %v893_v3  ;;  %v1321_v51 = vmul.f32 %v1305_v61, %v6361_v62  ;;  %v308_v15 = vperm.slane %v8667_v17, 6  ;;  %v751_v32 = vmul.f32 %v735_v12, %v713_v5  ;;  %v1246_v48 = vsel %vm1239_vm15, %v6257_v47, %v1238_v2  ;;  %v8725_v61 = vld [vmem:[#allocation51_spill] sm:$0xff]  ;;  %v8733_v5 = vld [vmem:[#allocation4_spill] sm:$0xff] }
 0x1e8   :  { %2126 = vmatpush.msrb.mxu3 %v1395_v56  ;;  %2165 = vmatpush.msrb.mxu2 %v8722_v54  ;;  %v466_v36 = vmul.f32 %v450_v24, %v8723_v43  ;;  %v593_v52 = vperm.slane %v8700_v20, 7  ;;  %v1269_v18 = vperm.slane %v8650_v44, 7  ;;  %v1197_v39 = vperm.slane %v8657_v11, 6  ;;  %v8728_v23 = vld [vmem:[#allocation23_spill] sm:$0xff] }
 0x1e9   :  { %2104 = vmatpush.msrb.mxu1 %v537_v33  ;;  %2140 = vmatpush.msrb.mxu0 %v822_v34  ;;  %v395_v29 = vmul.f32 %v379_v35, %v8725_v61  ;;  %v237_v13 = vperm.slane %v8726_v30, 6  ;;  %v1256_v47 = vsel %vm1239_vm15, %v1238_v2, %v8727_v53  ;;  %v1175_v45 = vsel %vm1168_vm10, %v6255_v25, %v1167_v37  ;;  %v8731_v25 = vld [vmem:[#allocation50_spill] sm:$0xff]  ;;  %v2237_v34 = vld [vmem:[%s8173_s4] sm:$0xff] }
 0x1ea   :  { %2127 = vmatpush.msrb.mxu3 %v1358_v42  ;;  %2166 = vmatpush.msrb.mxu2 %v8724_v58  ;;  %v680_v20 = vmul.f32 %v664_v49, %v6264_v38  ;;  %v522_v44 = vperm.slane %v8708_v19, 7  ;;  %v1284_v21 = vmul.f32 %v1268_v41, %v1246_v48  ;;  %v1198_v50 = vperm.slane %v8657_v11, 7  ;;  %v8732_v11 = vld [vmem:[#allocation15_spill] sm:$0xff] }
 0x1eb   :  { %2105 = vmatpush.msrb.mxu1 %v466_v36  ;;  %2141 = vmatpush.msrb.mxu0 %v751_v32  ;;  %v166_v63 = vperm.slane %v8729_v27, 6  ;;  %v1185_v12 = vsel %vm1168_vm10, %v1167_v37, %v8730_v40  ;;  %v324_v60 = vmul.f32 %v308_v15, %v8731_v25  ;;  %v609_v22 = vmul.f32 %v593_v52, %v6279_v46 }
 0x1ec   :  { %2128 = vmatpush.msrb.mxu3 %v1321_v51  ;;  %2167 = vmatpush.msrb.mxu2 %v8728_v23  ;;  %v451_v38 = vperm.slane %v8717_v59, 7  ;;  %v1285_v19 = vmul.f32 %v1269_v18, %v1256_v47  ;;  %v1213_v3 = vmul.f32 %v1197_v39, %v1175_v45  ;;  %v253_v24 = vmul.f32 %v237_v13, %v6191_v16 }
 0x1ed   :  { %2106 = vmatpush.msrb.mxu1 %v395_v29  ;;  %2142 = vmatpush.msrb.mxu0 %v680_v20  ;;  %v538_v0 = vmul.f32 %v522_v44, %v6301_v8  ;;  %v95_v31 = vperm.slane %v8733_v5, 6  ;;  %v380_v56 = vperm.slane %v8720_v1, 7  ;;  %v1214_v35 = vmul.f32 %v1198_v50, %v1185_v12 }
 0x1ee   :  { %2129 = vmatpush.msrb.mxu3 %v1284_v21  ;;  %2168 = vmatpush.msrb.mxu2 %v8732_v11  ;;  %v182_v46 = vmul.f32 %v166_v63, %v6206_v6  ;;  %v467_v59 = vmul.f32 %v451_v38, %v6248_v4  ;;  %v309_v16 = vperm.slane %v8667_v17, 7  ;;  %v238_v6 = vperm.slane %v8726_v30, 7 }
 0x1ef   :  { %2107 = vmatpush.msrb.mxu1 %v324_v60  ;;  %2143 = vmatpush.msrb.mxu0 %v609_v22  ;;  %v111_v8 = vmul.f32 %v95_v31, %v6186_v26  ;;  %v396_v1 = vmul.f32 %v380_v56, %v6324_v14  ;;  %v167_v4 = vperm.slane %v8729_v27, 7  ;;  %v96_v26 = vperm.slane %v8733_v5, 7 }
 0x1f0   :  { %2130 = vmatpush.msrb.mxu3 %v1213_v3  ;;  %2169 = vmatpush.msrb.mxu2 %v1285_v19  ;;  %v325_v17 = vmul.f32 %v309_v16, %v6243_v9  ;;  %v254_v7 = vmul.f32 %v238_v6, %v6346_v28  ;;  %v4645_v38 = vmov 1024.0  }
 0x1f1   :  { %2108 = vmatpush.msrb.mxu1 %v253_v24  ;;  %2144 = vmatpush.msrb.mxu0 %v538_v0  ;;  %v183_v14 = vmul.f32 %v167_v4, %v6366_v10  ;;  %v112_v33 = vmul.f32 %v96_v26, %v6361_v62  ;;  %4605 = vrcp.f32 %v4645_v38 }
 0x1f2   :  { %4522 = vmatmul.msk.f32.vlgmr.msrb.gmra.mxu3 %vm8340_vm8, %v5929_v55  ;;  %2170 = vmatpush.msrb.mxu2 %v1214_v35 }
 0x1f3   :  { %2109 = vmatpush.msrb.mxu1 %v182_v46  ;;  %2145 = vmatpush.msrb.mxu0 %v467_v59 }
 0x1f4   :  { %2240 = vperm.xlu1 %4603, %v2237_v34   ;;  %4523 = vmatmul.msk.f32.vlgmr.msrb.gmra.mxu2 %vm8340_vm8, %v5929_v55  ;;  %v2251_v55 = vld [vmem:[%s8174_s5] sm:$0xff]  ;;  %s8738_s5 = smov 72  }
 0x1f5   :  { %2110 = vmatpush.msrb.mxu1 %v111_v8  ;;  %2146 = vmatpush.msrb.mxu0 %v396_v1 }
 0x1f6   :  { %2111 = vmatmul.f32.vlgmr.msrb.gmra.mxu1 %v8689_v57 }
 0x1f7   :  { %2147 = vmatpush.msrb.mxu0 %v325_v17  ;;  %v4606_v19 = vpop.eup %4605 }
 0x1f8   :  { %v2185_v3 = vmul.f32 1024.0, %v4606_v19  ;;  %vm2189_vm7 = vweird.f32 %v4606_v19 }
 0x1f9   :  { %2148 = vmatpush.msrb.mxu0 %v254_v7 }
 0x1fa   :  { %v2186_v11 = vsub.f32 1.0, %v2185_v3 }
 0x1fb   :  { %2149 = vmatpush.msrb.mxu0 %v183_v14 }
 0x1fc   :  { %2254 = vperm.xlu1 %4603, %v2251_v55   ;;  %v2187_v24 = vmul.f32 %v4606_v19, %v2186_v11 }
 0x1fd   :  { %2150 = vmatpush.msrb.mxu0 %v112_v33 }
 0x1fe   :  { %2151 = vmatmul.f32.vlgmr.msrb.gmra.mxu0 %v8689_v57  ;;  %v2188_v0 = vadd.f32 %v4606_v19, %v2187_v24 }
 0x200   :  { %v6443_v5 = vsel %vm2189_vm7, %v4606_v19, %v2188_v0 }
 0x201   :  { %8734 = vst [vmem:[#allocation80_spill] sm:$0xff] %v6443_v5 }
 0x204   :  { %v1872_v28 = vpop.f32.mrf.mxu0 }
 0x209   :  { %v1892_v9 = vpop.f32.mrf.mxu1 }
 0x20c   :  { %v1932_v49 = vpop.f32.mrf.mxu3  ;;  %v1992_v43 = vpop.f32.mrf.mxu0 }
 0x20e   :  { %v1912_v2 = vpop.f32.mrf.mxu2 }
 0x21b   :  { %v1849_v41 = vpop.permute.xlu1 %1848 }
 0x21c   :  { %v1873_v42 = vadd.f32 %v1872_v28, %v1849_v41  ;;  %v1913_v10 = vadd.f32 %v1912_v2, %v1849_v41  ;;  %v1993_v39 = vadd.f32 %v1992_v43, %v1849_v41 }
 0x21e   :  { %v1893_v32 = vadd.f32 %v1892_v9, %v1873_v42  ;;  %v1933_v48 = vadd.f32 %v1932_v49, %v1913_v10 }
 0x220   :  { %v2175_v18 = vadd.f32 %v1933_v48, %v1893_v32 }
 0x221   :  { %v1952_v37 = vpop.f32.mrf.mxu1 }
 0x222   :  { %v1953_v15 = vadd.f32 %v1952_v37, %v1849_v41 }
 0x23e   :  { %v1972_v54 = vpop.f32.mrf.mxu3 }
 0x23f   :  { %v1973_v52 = vadd.f32 %v1972_v54, %v1953_v15 }
 0x240   :  { %v2012_v51 = vpop.f32.mrf.mxu2 }
 0x241   :  { %v2176_v61 = vadd.f32 %v2175_v18, %v1973_v52  ;;  %v2013_v29 = vadd.f32 %v2012_v51, %v1993_v39 }
 0x243   :  { %v2177_v45 = vadd.f32 %v2176_v61, %v2013_v29 }
 0x255   :  { %v2052_v36 = vpop.f32.mrf.mxu1 }
 0x25d   :  { %v2032_v62 = vpop.f32.mrf.mxu3 }
 0x25e   :  { %v2033_v57 = vadd.f32 %v2032_v62, %v1849_v41 }
 0x25f   :  { %v2072_v58 = vpop.f32.mrf.mxu2 }
 0x260   :  { %v2053_v53 = vadd.f32 %v2052_v36, %v2033_v57  ;;  %v2073_v47 = vadd.f32 %v2072_v58, %v1849_v41 }
 0x262   :  { %v2178_v21 = vadd.f32 %v2177_v45, %v2053_v53 }
 0x263   :  { %v2092_v30 = vpop.f32.mrf.mxu0 }
 0x264   :  { %v2093_v50 = vadd.f32 %v2092_v30, %v2073_v47 }
 0x266   :  { %v2179_v40 = vadd.f32 %v2178_v21, %v2093_v50  ;;  %v2241_v36 = vpop.permute.xlu1 %2240 }
 0x26e   :  { %v2255_v30 = vpop.permute.xlu1 %2254 }
 0x273   :  { %v2112_v13 = vpop.f32.mrf.mxu1 }
 0x274   :  { %v2113_v20 = vadd.f32 %v2112_v13, %v1849_v41 }
 0x275   :  { %v2132_v44 = vpop.f32.mrf.mxu3 }
 0x276   :  { %v2133_v23 = vadd.f32 %v2132_v44, %v2113_v20 }
 0x277   :  { %v2172_v63 = vpop.f32.mrf.mxu2 }
 0x278   :  { %v2180_v25 = vadd.f32 %v2179_v40, %v2133_v23 }
 0x27b   :  { %v2152_v27 = vpop.f32.mrf.mxu0 }
 0x27c   :  { %v2153_v12 = vadd.f32 %v2152_v27, %v1849_v41 }
 0x27e   :  { %v2173_v60 = vadd.f32 %v2172_v63, %v2153_v12 }
 0x280   :  { %v2181_v22 = vadd.f32 %v2180_v25, %v2173_v60 }
 0x282   :  { %2182 = vadd.xlane.f32.xlu2 %v2181_v22 }
 0x2f5   :  { %v2183_v31 = vpop.xlane.xlu2 %2182 }
 0x2f6   :  { %v2191_v56 = vmul.f32 %v6443_v5, %v2183_v31 }
 0x2f8   :  { %v2192_v35 = vsub.f32 %v1893_v32, %v2191_v56  ;;  %v2193_v46 = vsub.f32 %v1933_v48, %v2191_v56  ;;  %v2194_v59 = vsub.f32 %v1973_v52, %v2191_v56  ;;  %v2195_v34 = vsub.f32 %v2013_v29, %v2191_v56 }
 0x2f9   :  { %v2196_v1 = vsub.f32 %v2053_v53, %v2191_v56  ;;  %v2197_v4 = vsub.f32 %v2093_v50, %v2191_v56  ;;  %v2198_v14 = vsub.f32 %v2133_v23, %v2191_v56  ;;  %v2199_v9 = vsub.f32 %v2173_v60, %v2191_v56 }
 0x2fa   :  { %v2200_v16 = vmul.f32 %v2192_v35, %v2192_v35  ;;  %v2201_v8 = vmul.f32 %v2193_v46, %v2193_v46  ;;  %v2202_v6 = vmul.f32 %v2194_v59, %v2194_v59  ;;  %v2203_v7 = vmul.f32 %v2195_v34, %v2195_v34 }
 0x2fb   :  { %v2204_v55 = vmul.f32 %v2196_v1, %v2196_v1  ;;  %v2205_v49 = vmul.f32 %v2197_v4, %v2197_v4  ;;  %v2206_v28 = vmul.f32 %v2198_v14, %v2198_v14  ;;  %v2207_v37 = vmul.f32 %v2199_v9, %v2199_v9 }
 0x2fc   :  { %v2208_v17 = vadd.f32 %v2201_v8, %v2200_v16 }
 0x2fe   :  { %v2209_v26 = vadd.f32 %v2208_v17, %v2202_v6  ;;  %v4560_v17 = vld [vmem:[%s8170_s1 + $0x83] ss:$8 sm:$0xf] }
 0x300   :  { %v2210_v33 = vadd.f32 %v2209_v26, %v2203_v7 }
 0x302   :  { %v2211_v2 = vadd.f32 %v2210_v33, %v2204_v55  ;;  %v4559_v55 = vld [vmem:[%s8170_s1 + $0x82] ss:$8 sm:$0xf0] }
 0x304   :  { %v2212_v41 = vadd.f32 %v2211_v2, %v2205_v49 }
 0x306   :  { %v2213_v54 = vadd.f32 %v2212_v41, %v2206_v28  ;;  %v4524_v41 = vld [vmem:[%s8170_s1 + $0x1] ss:$8 sm:$0xf] }
 0x308   :  { %v2214_v42 = vadd.f32 %v2213_v54, %v2207_v37  ;;  %v4525_v37 = vld [vmem:[%s8170_s1 + $0x1] ss:$8 sm:$0xf0] }
 0x30a   :  { %2215 = vadd.xlane.f32.xlu0 %v2214_v42 }
 0x37d   :  { %v2216_v10 = vpop.xlane.xlu0 %2215 }
 0x37e   :  { %v2217_v51 = vmul.f32 %v2216_v10, %v6443_v5 }
 0x380   :  { %v2218_v15 = vadd.f32 1e-05, %v2217_v51 }
 0x382   :  { %4607 = vrsqrt.f32 %v2218_v15  ;;  %vm2225_vm7 = vweird.f32 %v2218_v15 }
 0x388   :  { %v4608_v32 = vpop.eup %4607 }
 0x389   :  { %v2220_v48 = vmul.f32 %v4608_v32, %v2218_v15  ;;  %vm2226_vm9 = vweird.f32 %v4608_v32  ;;  %v2314_v15 = vld [vmem:[%s8170_s1] ss:$8 sm:$0xf] }
 0x38a   :  { %vm2227_vm8 = vmor %vm2225_vm7, %vm2226_vm9  ;;  %vm8807_vm9 = vcmask 7168   ;;  %vm8808_vm7 = vcmask 56320  }
 0x38b   :  { %v2221_v43 = vmul.f32 %v4608_v32, %v2220_v48 }
 0x38d   :  { %v2222_v62 = vmul.f32 0.5, %v2221_v43 }
 0x38f   :  { %v2223_v52 = vsub.f32 1.5, %v2222_v62 }
 0x391   :  { %v2224_v18 = vmul.f32 %v4608_v32, %v2223_v52 }
 0x393   :  { %v2228_v39 = vsel %vm2227_vm8, %v4608_v32, %v2224_v18  ;;  %v2315_v32 = vld [vmem:[%s8170_s1] ss:$8 sm:$0xf0] }
 0x394   :  { %v2231_v57 = vmul.f32 %v2228_v39, %v2194_v59  ;;  %v2233_v58 = vmul.f32 %v2228_v39, %v2196_v1  ;;  %v2236_v61 = vmul.f32 %v2228_v39, %v2199_v9  ;;  %v2229_v13 = vmul.f32 %v2228_v39, %v2192_v35 }
 0x395   :  { %v2230_v63 = vmul.f32 %v2228_v39, %v2193_v46  ;;  %v2232_v40 = vmul.f32 %v2228_v39, %v2195_v34  ;;  %v2234_v38 = vmul.f32 %v2228_v39, %v2197_v4  ;;  %v2235_v19 = vmul.f32 %v2228_v39, %v2198_v14  ;;  %v4561_v4 = vld [vmem:[%s8170_s1 + $0x83] ss:$8 sm:$0xf0]  ;;  %v4558_v14 = vld [vmem:[%s8170_s1 + $0x82] ss:$8 sm:$0xf] }
 0x396   :  { %v2245_v29 = vmul.f32 %v2241_v36, %v2231_v57  ;;  %v2247_v53 = vmul.f32 %v2241_v36, %v2233_v58  ;;  %v2250_v47 = vmul.f32 %v2241_v36, %v2236_v61  ;;  %v2243_v50 = vmul.f32 %v2241_v36, %v2229_v13 }
 0x397   :  { %v2244_v25 = vmul.f32 %v2241_v36, %v2230_v63  ;;  %v2246_v60 = vmul.f32 %v2241_v36, %v2232_v40  ;;  %v2248_v24 = vmul.f32 %v2241_v36, %v2234_v38  ;;  %v2249_v0 = vmul.f32 %v2241_v36, %v2235_v19 }
 0x398   :  { %v2259_v45 = vadd.f32 %v2255_v30, %v2245_v29  ;;  %v2261_v20 = vadd.f32 %v2255_v30, %v2247_v53  ;;  %v2264_v44 = vadd.f32 %v2255_v30, %v2250_v47  ;;  %v2257_v12 = vadd.f32 %v2255_v30, %v2243_v50 }
 0x399   :  { %v2258_v3 = vadd.f32 %v2255_v30, %v2244_v25  ;;  %v2260_v11 = vadd.f32 %v2255_v30, %v2246_v60  ;;  %v2262_v35 = vadd.f32 %v2255_v30, %v2248_v24  ;;  %v2263_v46 = vadd.f32 %v2255_v30, %v2249_v0 }
 0x39a   :  { %v6447_v21 = vmax.f32 %v2259_v45, 0.0  ;;  %v6449_v23 = vmax.f32 %v2261_v20, 0.0  ;;  %v6451_v27 = vmax.f32 %v2264_v44, 0.0  ;;  %v6459_v22 = vmax.f32 %v2257_v12, 0.0 }
 0x39b   :  { %v6467_v31 = vmax.f32 %v2258_v3, 0.0  ;;  %v6469_v56 = vmax.f32 %v2260_v11, 0.0  ;;  %v6477_v59 = vmax.f32 %v2262_v35, 0.0  ;;  %v6479_v34 = vmax.f32 %v2263_v46, 0.0 }
 0x39c   :  { %8735 = vst [vmem:[#allocation28_spill] sm:$0xff] %v6447_v21  ;;  %2288 = vrot.lane.b32.xlu2 %v6447_v21, %s4627_s19  ;;  %2274 = vrot.lane.b32.xlu1 %v6451_v27, %s4627_s19  ;;  %v6577_v33 = vor.u32 %v4561_v4, %v4560_v17  ;;  %v6579_v9 = vor.u32 %v4559_v55, %v4558_v14 }
 0x39d   :  { %8736 = vst [vmem:[#allocation21_spill] sm:$0xff] %v6449_v23  ;;  %2292 = vrot.lane.b32.xlu0 %v6449_v23, %s4627_s19  ;;  %v6623_v36 = vor.u32 %v4525_v37, %v4524_v41  ;;  %v6625_v62 = vor.u32 %v2315_v32, %v2314_v15  ;;  %v4526_v37 = vld [vmem:[%s8170_s1 + $0x2] ss:$8 sm:$0xf] }
 0x39e   :  { %8737 = vst [vmem:[#allocation37_spill] sm:$0xff] %v6451_v27  ;;  %v3537_v49 = vperm.slane %v6577_v33, 7  ;;  %v3501_v28 = vperm.slane %v6579_v9, 7  ;;  %v3532_v18 = vperm.slane %v6577_v33, 2  ;;  %v3535_v44 = vperm.slane %v6577_v33, 5 }
 0x39f   :  { %8739 = vst [vmem:[#allocation26_spill] sm:$0xff] %v6477_v59  ;;  %v2390_v52 = vperm.slane %v6623_v36, 3  ;;  %v2320_v39 = vperm.slane %v6625_v62, 2  ;;  %v2393_v45 = vperm.slane %v6623_v36, 6  ;;  %v2394_v20 = vperm.slane %v6623_v36, 7 }
 0x3a0   :  { %8740 = vst [vmem:[#allocation10_spill] sm:$0xff] %v6479_v34  ;;  %v3536_v50 = vperm.slane %v6577_v33, 6  ;;  %v2321_v40 = vperm.slane %v6625_v62, 3  ;;  %v2322_v12 = vperm.slane %v6625_v62, 4  ;;  %v3496_v25 = vperm.slane %v6579_v9, 2 }
 0x3a1   :  { %v3497_v60 = vperm.slane %v6579_v9, 3  ;;  %v4527_v15 = vld [vmem:[%s8170_s1 + $0x2] ss:$8 sm:$0xf0] }
 0x3a4   :  { %2350 = vrot.lane.b32.xlu2 %v6451_v27, %s8738_s5  ;;  %2284 = vrot.lane.b32.xlu1 %v6459_v22, %s4627_s19 }
 0x3a5   :  { %2353 = vrot.lane.b32.xlu0 %v6459_v22, %s8738_s5 }
 0x3ac   :  { %2357 = vrot.lane.b32.xlu2 %v6447_v21, %s8738_s5  ;;  %2286 = vrot.lane.b32.xlu1 %v6467_v31, %s4627_s19 }
 0x3ad   :  { %2359 = vrot.lane.b32.xlu0 %v6469_v56, %s8738_s5 }
 0x3b4   :  { %2363 = vrot.lane.b32.xlu2 %v6477_v59, %s8738_s5  ;;  %2290 = vrot.lane.b32.xlu1 %v6469_v56, %s4627_s19 }
 0x3b5   :  { %2365 = vrot.lane.b32.xlu0 %v6479_v34, %s8738_s5 }
 0x3bc   :  { %2422 = vrot.lane.b32.xlu2 %v6459_v22, %s8741_s11  ;;  %2294 = vrot.lane.b32.xlu1 %v6477_v59, %s4627_s19 }
 0x3bd   :  { %2424 = vrot.lane.b32.xlu0 %v6467_v31, %s8741_s11 }
 0x3c4   :  { %2428 = vrot.lane.b32.xlu2 %v6469_v56, %s8741_s11  ;;  %2296 = vrot.lane.b32.xlu1 %v6479_v34, %s4627_s19  ;;  %s8776_s19 = smov 65  }
 0x3c5   :  { %2430 = vrot.lane.b32.xlu0 %v6449_v23, %s8741_s11 }
 0x3cc   :  { %2434 = vrot.lane.b32.xlu2 %v6479_v34, %s8741_s11  ;;  %2355 = vrot.lane.b32.xlu1 %v6467_v31, %s8738_s5 }
 0x3cd   :  { %3283 = vrot.lane.b32.xlu0 %v6459_v22, %s4634_s25 }
 0x3d4   :  { %3214 = vrot.lane.b32.xlu2 %v6459_v22, %s4633_s24  ;;  %2361 = vrot.lane.b32.xlu1 %v6449_v23, %s8738_s5 }
 0x3d5   :  { %3216 = vrot.lane.b32.xlu0 %v6467_v31, %s4633_s24 }
 0x3dc   :  { %3218 = vrot.lane.b32.xlu2 %v6447_v21, %s4633_s24  ;;  %2419 = vrot.lane.b32.xlu1 %v6451_v27, %s8741_s11 }
 0x3dd   :  { %3109 = vrot.lane.b32.xlu0 %v6451_v27, %s4635_s20 }
 0x3e4   :  { %3040 = vrot.lane.b32.xlu2 %v6451_v27, %s4637_s28  ;;  %2426 = vrot.lane.b32.xlu1 %v6447_v21, %s8741_s11 }
 0x3e5   :  { %3043 = vrot.lane.b32.xlu0 %v6459_v22, %s4637_s28 }
 0x3ec   :  { %2971 = vrot.lane.b32.xlu2 %v6451_v27, %s4638_s17  ;;  %2432 = vrot.lane.b32.xlu1 %v6477_v59, %s8741_s11  ;;  %s8767_s11 = smov 64  }
 0x3ed   :  { %2974 = vrot.lane.b32.xlu0 %v6459_v22, %s4638_s17 }
 0x3f4   :  { %2902 = vrot.lane.b32.xlu2 %v6451_v27, %s4640_s14  ;;  %3285 = vrot.lane.b32.xlu1 %v6467_v31, %s4634_s25 }
 0x3f5   :  { %2905 = vrot.lane.b32.xlu0 %v6459_v22, %s4640_s14 }
 0x3f6   :  { %v6535_v16 = vpop.permute.xlu2 %2288 }
 0x3fc   :  { %3289 = vrot.lane.b32.xlu2 %v6469_v56, %s4634_s25  ;;  %3287 = vrot.lane.b32.xlu1 %v6447_v21, %s4634_s25 }
 0x3fd   :  { %2833 = vrot.lane.b32.xlu0 %v6451_v27, %s4636_s21 }
 0x3fe   :  { %v6543_v8 = vpop.permute.xlu2 %2350 }
 0x404   :  { %2907 = vrot.lane.b32.xlu2 %v6467_v31, %s4640_s14  ;;  %3112 = vrot.lane.b32.xlu1 %v6459_v22, %s4635_s20 }
 0x405   :  { %3220 = vrot.lane.b32.xlu0 %v6469_v56, %s4633_s24 }
 0x406   :  { %v6551_v1 = vpop.permute.xlu2 %2357 }
 0x40c   :  { %2838 = vrot.lane.b32.xlu2 %v6467_v31, %s4636_s21  ;;  %3114 = vrot.lane.b32.xlu1 %v6467_v31, %s4635_s20 }
 0x40d   :  { %2764 = vrot.lane.b32.xlu0 %v6451_v27, %s4639_s22 }
 0x40e   :  { %v6559_v6 = vpop.permute.xlu2 %2363  ;;  %v6567_v7 = vpop.permute.xlu1 %2274 }
 0x40f   :  { %v6569_v26 = vpop.permute.xlu0 %2292 }
 0x414   :  { %3222 = vrot.lane.b32.xlu2 %v6449_v23, %s4633_s24  ;;  %3045 = vrot.lane.b32.xlu1 %v6467_v31, %s4637_s28 }
 0x415   :  { %2769 = vrot.lane.b32.xlu0 %v6467_v31, %s4639_s22 }
 0x416   :  { %v6588_v2 = vpop.permute.xlu2 %2422  ;;  %v6599_v42 = vpop.permute.xlu1 %2284 }
 0x417   :  { %v6597_v54 = vpop.permute.xlu0 %2353  ;;  %v6609_v51 = vsel %vm68_vm0, %v6567_v7, %v6599_v42 }
 0x418   :  { %v6604_v10 = vsel %vm138_vm1, %v6543_v8, %v6597_v54  ;;  %8743 = vst [vmem:[#allocation3_spill] sm:$0xff] %v6609_v51  ;;  %v6621_v43 = vmul.f32 %v3501_v28, %v6609_v51  ;;  %v3498_v28 = vperm.slane %v6579_v9, 4 }
 0x419   :  { %8742 = vst [vmem:[#allocation84_spill] sm:$0xff] %v6604_v10  ;;  %v6618_v48 = vmul.f32 %v3537_v49, %v6604_v10 }
 0x41a   :  { %8745 = vst [vmem:[#allocation77_spill] sm:$0xff] %v6621_v43 }
 0x41b   :  { %8744 = vst [vmem:[#allocation13_spill] sm:$0xff] %v6618_v48 }
 0x41c   :  { %2695 = vrot.lane.b32.xlu2 %v6451_v27, %s4641_s15  ;;  %2976 = vrot.lane.b32.xlu1 %v6467_v31, %s4638_s17 }
 0x41d   :  { %2698 = vrot.lane.b32.xlu0 %v6459_v22, %s4641_s15 }
 0x41e   :  { %v6636_v57 = vpop.permute.xlu2 %2428  ;;  %v6640_v61 = vpop.permute.xlu1 %2286 }
 0x41f   :  { %v6638_v58 = vpop.permute.xlu0 %2359  ;;  %v6648_v30 = vsel %vm68_vm0, %v6640_v61, %v6535_v16 }
 0x420   :  { %v2369_v29 = vsel %vm138_vm1, %v6551_v1, %v6638_v58  ;;  %v6655_v47 = vmul.f32 %v2320_v39, %v6648_v30  ;;  %v4563_v39 = vld [vmem:[%s8170_s1 + $0x84] ss:$8 sm:$0xf0] }
 0x421   :  { %v6650_v13 = vmul.f32 %v2390_v52, %v2369_v29  ;;  %v6652_v53 = vmul.f32 %v3532_v18, %v2369_v29  ;;  %v4562_v18 = vld [vmem:[%s8170_s1 + $0x84] ss:$8 sm:$0xf] }
 0x422   :  { %8748 = vst [vmem:[#allocation88_spill] sm:$0xff] %v6655_v47 }
 0x423   :  { %8746 = vst [vmem:[#allocation93_spill] sm:$0xff] %v6650_v13 }
 0x424   :  { %8747 = vst [vmem:[#allocation99_spill] sm:$0xff] %v6652_v53  ;;  %2700 = vrot.lane.b32.xlu2 %v6467_v31, %s4641_s15  ;;  %2836 = vrot.lane.b32.xlu1 %v6459_v22, %s4636_s21  ;;  %v4534_v53 = vld [vmem:[%s8170_s1 + $0x6] ss:$8 sm:$0xf] }
 0x425   :  { %2771 = vrot.lane.b32.xlu0 %v6447_v21, %s4639_s22 }
 0x426   :  { %v6667_v63 = vpop.permute.xlu2 %2434  ;;  %v2291_v19 = vpop.permute.xlu1 %2290 }
 0x427   :  { %v2366_v38 = vpop.permute.xlu0 %2365  ;;  %v2300_v24 = vsel %vm68_vm0, %v6535_v16, %v2291_v19  ;;  %v2301_v0 = vsel %vm68_vm0, %v2291_v19, %v6569_v26  ;;  %v2323_v16 = vperm.slane %v6625_v62, 5  ;;  %v3499_v19 = vperm.slane %v6579_v9, 5 }
 0x428   :  { %v2372_v3 = vsel %vm138_vm1, %v6559_v6, %v2366_v38  ;;  %v2373_v11 = vsel %vm138_vm1, %v2366_v38, %v6543_v8  ;;  %v6689_v14 = vmul.f32 %v2321_v40, %v2300_v24  ;;  %v6691_v55 = vmul.f32 %v2322_v12, %v2301_v0 }
 0x429   :  { %v6681_v35 = vmul.f32 %v2393_v45, %v2372_v3  ;;  %v6683_v46 = vmul.f32 %v2394_v20, %v2373_v11  ;;  %v6685_v17 = vmul.f32 %v3535_v44, %v2372_v3  ;;  %v6687_v4 = vmul.f32 %v3536_v50, %v2373_v11 }
 0x42a   :  { %8753 = vst [vmem:[#allocation54_spill] sm:$0xff] %v6689_v14  ;;  %v6693_v49 = vmul.f32 %v3496_v25, %v2300_v24  ;;  %v6695_v8 = vmul.f32 %v3497_v60, %v2301_v0  ;;  %v6732_v50 = vor.u32 %v4527_v15, %v4526_v37  ;;  %v6734_v40 = vor.u32 %v4563_v39, %v4562_v18 }
 0x42b   :  { %8749 = vst [vmem:[#allocation91_spill] sm:$0xff] %v6681_v35  ;;  %v2324_v25 = vperm.slane %v6625_v62, 6  ;;  %v2325_v60 = vperm.slane %v6625_v62, 7  ;;  %v3500_v3 = vperm.slane %v6579_v9, 6 }
 0x42c   :  { %8750 = vst [vmem:[#allocation97_spill] sm:$0xff] %v6683_v46  ;;  %2629 = vrot.lane.b32.xlu2 %v6459_v22, %s8757_s3  ;;  %3291 = vrot.lane.b32.xlu1 %v6449_v23, %s4634_s25  ;;  %v2460_v12 = vperm.slane %v6732_v50, 4 }
 0x42d   :  { %8751 = vst [vmem:[#allocation71_spill] sm:$0xff] %v6685_v17  ;;  %3047 = vrot.lane.b32.xlu0 %v6447_v21, %s4637_s28 }
 0x42e   :  { %8752 = vst [vmem:[#allocation60_spill] sm:$0xff] %v6687_v4  ;;  %v6705_v41 = vpop.permute.xlu2 %3214  ;;  %v2295_v52 = vpop.permute.xlu1 %2294 }
 0x42f   :  { %8754 = vst [vmem:[#allocation38_spill] sm:$0xff] %v6691_v55  ;;  %v6713_v32 = vpop.permute.xlu0 %2424  ;;  %v2302_v45 = vsel %vm68_vm0, %v6569_v26, %v2295_v52  ;;  %v3569_v26 = vperm.slane %v6734_v40, 3 }
 0x430   :  { %8755 = vst [vmem:[#allocation24_spill] sm:$0xff] %v6693_v49  ;;  %v6724_v29 = vsel %vm209_vm2, %v6588_v2, %v6713_v32  ;;  %v6728_v20 = vmul.f32 %v2323_v16, %v2302_v45  ;;  %v6730_v44 = vmul.f32 %v3498_v28, %v2302_v45 }
 0x431   :  { %8756 = vst [vmem:[#allocation16_spill] sm:$0xff] %v6695_v8 }
 0x432   :  { %8758 = vst [vmem:[#allocation108_spill] sm:$0xff] %v6705_v41 }
 0x433   :  { %8759 = vst [vmem:[#allocation94_spill] sm:$0xff] %v6728_v20 }
 0x434   :  { %8760 = vst [vmem:[#allocation122_spill] sm:$0xff] %v6730_v44  ;;  %2631 = vrot.lane.b32.xlu2 %v6467_v31, %s8757_s3  ;;  %2767 = vrot.lane.b32.xlu1 %v6459_v22, %s4639_s22  ;;  %v4550_v44 = vld [vmem:[%s8170_s1 + $0x46] ss:$8 sm:$0xf] }
 0x435   :  { %2702 = vrot.lane.b32.xlu0 %v6447_v21, %s4641_s15 }
 0x436   :  { %v6746_v38 = vpop.permute.xlu2 %3218  ;;  %v2297_v24 = vpop.permute.xlu1 %2296 }
 0x437   :  { %v6750_v11 = vpop.permute.xlu0 %2430  ;;  %v2303_v16 = vsel %vm68_vm0, %v2295_v52, %v2297_v24  ;;  %v2304_v28 = vsel %vm68_vm0, %v2297_v24, %v6567_v7  ;;  %v2389_v7 = vperm.slane %v6623_v36, 2 }
 0x438   :  { %v2439_v0 = vsel %vm209_vm2, %v6636_v57, %v6750_v11  ;;  %v6762_v18 = vmul.f32 %v2324_v25, %v2303_v16  ;;  %v6764_v39 = vmul.f32 %v2325_v60, %v2304_v28  ;;  %v6766_v45 = vmul.f32 %v3499_v19, %v2303_v16 }
 0x439   :  { %v6758_v37 = vmul.f32 %v2460_v12, %v2439_v0  ;;  %v6760_v15 = vmul.f32 %v3569_v26, %v2439_v0  ;;  %v6768_v5 = vmul.f32 %v3500_v3, %v2304_v28  ;;  %v2391_v3 = vperm.slane %v6623_v36, 4 }
 0x43a   :  { %8763 = vst [vmem:[#allocation72_spill] sm:$0xff] %v6762_v18  ;;  %v3534_v0 = vperm.slane %v6577_v33, 4 }
 0x43b   :  { %8761 = vst [vmem:[#allocation117_spill] sm:$0xff] %v6758_v37 }
 0x43c   :  { %8762 = vst [vmem:[#allocation73_spill] sm:$0xff] %v6760_v15  ;;  %2560 = vrot.lane.b32.xlu2 %v6459_v22, %s8767_s11  ;;  %2840 = vrot.lane.b32.xlu1 %v6447_v21, %s4636_s21 }
 0x43d   :  { %8764 = vst [vmem:[#allocation49_spill] sm:$0xff] %v6764_v39  ;;  %2978 = vrot.lane.b32.xlu0 %v6447_v21, %s4638_s17 }
 0x43e   :  { %8765 = vst [vmem:[#allocation63_spill] sm:$0xff] %v6766_v45  ;;  %v6777_v52 = vpop.permute.xlu2 %3040  ;;  %v2356_v26 = vpop.permute.xlu1 %2355 }
 0x43f   :  { %8766 = vst [vmem:[#allocation5_spill] sm:$0xff] %v6768_v5  ;;  %v6779_v12 = vpop.permute.xlu0 %3283  ;;  %v6783_v25 = vsel %vm138_vm1, %v6597_v54, %v2356_v26  ;;  %v6787_v60 = vsel %vm138_vm1, %v2356_v26, %v6551_v1  ;;  %v2392_v54 = vperm.slane %v6623_v36, 5  ;;  %v3533_v1 = vperm.slane %v6577_v33, 3 }
 0x440   :  { %8768 = vst [vmem:[#allocation40_spill] sm:$0xff] %v6777_v52  ;;  %v6790_v19 = vmul.f32 %v2389_v7, %v6787_v60  ;;  %v2458_v5 = vperm.slane %v6732_v50, 2 }
 0x441   :  { %8769 = vst [vmem:[#allocation55_spill] sm:$0xff] %v6779_v12 }
 0x442   :  { %8770 = vst [vmem:[#allocation36_spill] sm:$0xff] %v6790_v19 }
 0x444   :  { %2562 = vrot.lane.b32.xlu2 %v6467_v31, %s8767_s11  ;;  %3116 = vrot.lane.b32.xlu1 %v6447_v21, %s4635_s20 }
 0x445   :  { %2633 = vrot.lane.b32.xlu0 %v6447_v21, %s8757_s3 }
 0x446   :  { %v6800_v24 = vpop.permute.xlu2 %2971  ;;  %v2362_v28 = vpop.permute.xlu1 %2361 }
 0x447   :  { %8771 = vst [vmem:[#allocation89_spill] sm:$0xff] %v6800_v24  ;;  %v6804_v16 = vpop.permute.xlu0 %3216  ;;  %v2370_v7 = vsel %vm138_vm1, %v6638_v58, %v2362_v28  ;;  %v2371_v26 = vsel %vm138_vm1, %v2362_v28, %v6559_v6  ;;  %v2463_v58 = vperm.slane %v6732_v50, 7  ;;  %v3572_v6 = vperm.slane %v6734_v40, 6 }
 0x448   :  { %v6810_v39 = vmul.f32 %v2391_v3, %v2370_v7  ;;  %v6812_v46 = vmul.f32 %v2392_v54, %v2371_v26  ;;  %v6814_v18 = vmul.f32 %v3533_v1, %v2370_v7  ;;  %v6816_v35 = vmul.f32 %v3534_v0, %v2371_v26 }
 0x449   :  { %v3573_v3 = vperm.slane %v6734_v40, 7  ;;  %vm8794_vm1 = vcmask 1039360  }
 0x44a   :  { %8772 = vst [vmem:[#allocation14_spill] sm:$0xff] %v6810_v39  ;;  %vm8805_vm8 = vmmov %vm8794_vm1 }
 0x44b   :  { %8773 = vst [vmem:[#allocation92_spill] sm:$0xff] %v6812_v46 }
 0x44c   :  { %8774 = vst [vmem:[#allocation12_spill] sm:$0xff] %v6814_v18  ;;  %2491 = vrot.lane.b32.xlu2 %v6459_v22, %s8776_s19  ;;  %2626 = vrot.lane.b32.xlu1 %v6451_v27, %s8757_s3 }
 0x44d   :  { %8775 = vst [vmem:[#allocation27_spill] sm:$0xff] %v6816_v35  ;;  %2909 = vrot.lane.b32.xlu0 %v6447_v21, %s4640_s14  ;;  %v4551_v35 = vld [vmem:[%s8170_s1 + $0x46] ss:$8 sm:$0xf0] }
 0x44e   :  { %v6827_v54 = vpop.permute.xlu2 %2902  ;;  %v2420_v0 = vpop.permute.xlu1 %2419  ;;  %v6916_v47 = vor.u32 %v4551_v35, %v4550_v44 }
 0x44f   :  { %8777 = vst [vmem:[#allocation109_spill] sm:$0xff] %v6827_v54  ;;  %v6829_v1 = vpop.permute.xlu0 %3109  ;;  %v2442_v28 = vsel %vm209_vm2, %v6667_v63, %v2420_v0  ;;  %v6835_v7 = vsel %vm209_vm2, %v2420_v0, %v6588_v2  ;;  %v2459_v2 = vperm.slane %v6732_v50, 3 }
 0x450   :  { %8778 = vst [vmem:[#allocation116_spill] sm:$0xff] %v6829_v1  ;;  %v6837_v26 = vmul.f32 %v2463_v58, %v2442_v28  ;;  %v6839_v43 = vmul.f32 %v3572_v6, %v2442_v28  ;;  %v6842_v48 = vmul.f32 %v3573_v3, %v6835_v7  ;;  %v3568_v6 = vperm.slane %v6734_v40, 2 }
 0x451   :  { %8792 = vst [vmem:[#allocation79_spill] sm:$0xff] %v6916_v47  ;;  %v3251_v35 = vperm.slane %v6916_v47, 0 }
 0x452   :  { %8779 = vst [vmem:[#allocation95_spill] sm:$0xff] %v6837_v26 }
 0x453   :  { %8780 = vst [vmem:[#allocation113_spill] sm:$0xff] %v6839_v43 }
 0x454   :  { %8781 = vst [vmem:[#allocation118_spill] sm:$0xff] %v6842_v48  ;;  %2493 = vrot.lane.b32.xlu2 %v6467_v31, %s8776_s19  ;;  %3118 = vrot.lane.b32.xlu1 %v6469_v56, %s4635_s20 }
 0x455   :  { %2564 = vrot.lane.b32.xlu0 %v6447_v21, %s8767_s11 }
 0x456   :  { %v6852_v58 = vpop.permute.xlu2 %3289  ;;  %v2427_v3 = vpop.permute.xlu1 %2426 }
 0x457   :  { %8782 = vst [vmem:[#allocation106_spill] sm:$0xff] %v6852_v58  ;;  %v6855_v0 = vpop.permute.xlu0 %3043  ;;  %v6859_v28 = vsel %vm209_vm2, %v6713_v32, %v2427_v3  ;;  %v2438_v26 = vsel %vm209_vm2, %v2427_v3, %v6636_v57  ;;  %v2461_v32 = vperm.slane %v6732_v50, 5  ;;  %v2462_v57 = vperm.slane %v6732_v50, 6 }
 0x458   :  { %v6864_v48 = vmul.f32 %v2458_v5, %v6859_v28  ;;  %v6866_v45 = vmul.f32 %v2459_v2, %v2438_v26  ;;  %v6868_v4 = vmul.f32 %v3568_v6, %v2438_v26  ;;  %v3570_v5 = vperm.slane %v6734_v40, 4  ;;  %v4552_v26 = vld [vmem:[%s8170_s1 + $0x47] ss:$8 sm:$0xf] }
 0x459   :  { %v3571_v2 = vperm.slane %v6734_v40, 5  ;;  %v4553_v6 = vld [vmem:[%s8170_s1 + $0x47] ss:$8 sm:$0xf0] }
 0x45a   :  { %8783 = vst [vmem:[#allocation61_spill] sm:$0xff] %v6864_v48  ;;  %v6906_v14 = vor.u32 %v4553_v6, %v4552_v26 }
 0x45b   :  { %8784 = vst [vmem:[#allocation46_spill] sm:$0xff] %v6866_v45 }
 0x45c   :  { %8785 = vst [vmem:[#allocation33_spill] sm:$0xff] %v6868_v4  ;;  %2495 = vrot.lane.b32.xlu2 %v6447_v21, %s8776_s19  ;;  %2557 = vrot.lane.b32.xlu1 %v6451_v27, %s8767_s11  ;;  %v4533_v4 = vld [vmem:[%s8170_s1 + $0x5] ss:$8 sm:$0xf0] }
 0x45d   :  { %2842 = vrot.lane.b32.xlu0 %v6469_v56, %s4636_s21  ;;  %8790 = vst [vmem:[#allocation17_spill] sm:$0xff] %v6906_v14 }
 0x45e   :  { %v6880_v3 = vpop.permute.xlu2 %2907  ;;  %v2433_v43 = vpop.permute.xlu1 %2432 }
 0x45f   :  { %8786 = vst [vmem:[#allocation56_spill] sm:$0xff] %v6880_v3  ;;  %v6888_v17 = vpop.permute.xlu0 %2974  ;;  %v2440_v20 = vsel %vm209_vm2, %v6750_v11, %v2433_v43  ;;  %v2441_v46 = vsel %vm209_vm2, %v2433_v43, %v6667_v63  ;;  %v4548_v43 = vld [vmem:[%s8170_s1 + $0x45] ss:$8 sm:$0xf]  ;;  %vm8798_vm2 = vmmov %vm8794_vm1 }
 0x460   :  { %v6900_v55 = vmul.f32 %v2461_v32, %v2440_v20  ;;  %v6902_v39 = vmul.f32 %v2462_v57, %v2441_v46  ;;  %v6904_v37 = vmul.f32 %v3570_v5, %v2440_v20  ;;  %v6908_v11 = vmul.f32 %v3571_v2, %v2441_v46  ;;  %v4549_v63 = vld [vmem:[%s8170_s1 + $0x45] ss:$8 sm:$0xf0] }
 0x461   :  { %v3320_v46 = vperm.slane %v6906_v14, 0  ;;  %v6927_v32 = vor.u32 %v4549_v63, %v4548_v43  ;;  %v3230_v2 = vsel %vm8794_vm1, %v6705_v41, %v6804_v16  ;;  %v3321_v43 = vperm.slane %v6906_v14, 1  ;;  %vm8810_vm1 = vmmov %vm8807_vm9 }
 0x462   :  { %8787 = vst [vmem:[#allocation82_spill] sm:$0xff] %v6900_v55  ;;  %v3252_v41 = vperm.slane %v6916_v47, 1 }
 0x463   :  { %8788 = vst [vmem:[#allocation64_spill] sm:$0xff] %v6902_v39  ;;  %v3182_v6 = vperm.slane %v6927_v32, 0  ;;  %v3267_v39 = vmul.f32 %v3251_v35, %v3230_v2  ;;  %v4546_v35 = vld [vmem:[%s8170_s1 + $0x44] ss:$8 sm:$0xf]  ;;  %v3183_v8 = vperm.slane %v6927_v32, 1 }
 0x464   :  { %8789 = vst [vmem:[#allocation121_spill] sm:$0xff] %v6904_v37  ;;  %2844 = vrot.lane.b32.xlu2 %v6449_v23, %s4636_s21  ;;  %3049 = vrot.lane.b32.xlu1 %v6469_v56, %s4637_s28 }
 0x465   :  { %8791 = vst [vmem:[#allocation41_spill] sm:$0xff] %v6908_v11  ;;  %2704 = vrot.lane.b32.xlu0 %v6469_v56, %s4641_s15  ;;  %v4545_v11 = vld [vmem:[%s8170_s1 + $0x43] ss:$8 sm:$0xf0] }
 0x466   :  { %v6925_v20 = vpop.permute.xlu2 %2838  ;;  %8793 = vst [vmem:[#allocation96_spill] sm:$0xff] %v6927_v32  ;;  %v3286_v5 = vpop.permute.xlu1 %3285 }
 0x467   :  { %v6929_v57 = vpop.permute.xlu0 %2905  ;;  %v3299_v44 = vsel %vm1097_vm6, %v6779_v12, %v3286_v5  ;;  %v4544_v12 = vld [vmem:[%s8170_s1 + $0x43] ss:$8 sm:$0xf] }
 0x468   :  { %v3336_v26 = vmul.f32 %v3320_v46, %v3299_v44  ;;  %v3198_v46 = vmul.f32 %v3182_v6, %v6459_v22  ;;  %v4547_v44 = vld [vmem:[%s8170_s1 + $0x44] ss:$8 sm:$0xf0]  ;;  %v3231_v6 = vsel %vm8798_vm2, %v6804_v16, %v6746_v38  ;;  %v4543_v16 = vld [vmem:[%s8170_s1 + $0x42] ss:$8 sm:$0xf0]  ;;  %v6979_v13 = vor.u32 %v4545_v11, %v4544_v12  ;;  %vm8811_vm2 = vmmov %vm8808_vm7 }
 0x469   :  { %v6970_v37 = vor.u32 %v4547_v44, %v4546_v35  ;;  %v4541_v35 = vld [vmem:[%s8170_s1 + $0x41] ss:$8 sm:$0xf0]  ;;  %v3199_v11 = vmul.f32 %v3183_v8, %v6467_v31  ;;  %v3072_v8 = vsel %vm8808_vm7, %v6777_v52, %v6855_v0  ;;  %vm8817_vm7 = vmmov %vm8811_vm2 }
 0x46a   :  { %4041 = vmatpush.msra.mxu3 %v3336_v26  ;;  %8800 = vst [vmem:[#allocation58_spill] sm:$0xff] %v6979_v13 }
 0x46b   :  { %8799 = vst [vmem:[#allocation75_spill] sm:$0xff] %v6970_v37 }
 0x46c   :  { %3293 = vrot.lane.b32.xlu2 %v6477_v59, %s4634_s25  ;;  %2488 = vrot.lane.b32.xlu1 %v6451_v27, %s8776_s19 }
 0x46d   :  { %3421 = vrot.lane.b32.xlu0 %v6459_v22, %s4642_s16  ;;  %4042 = vmatpush.msra.mxu3 %v3267_v39 }
 0x46e   :  { %v6945_v63 = vpop.permute.xlu2 %3222  ;;  %v6956_v26 = vpop.permute.xlu1 %3287 }
 0x46f   :  { %8795 = vst [vmem:[#allocation52_spill] sm:$0xff] %v6945_v63  ;;  %v6954_v2 = vpop.permute.xlu0 %2833  ;;  %v3300_v39 = vsel %vm1097_vm6, %v3286_v5, %v6956_v26  ;;  %4043 = vmatpush.msra.mxu3 %v3198_v46  ;;  %v4542_v5 = vld [vmem:[%s8170_s1 + $0x42] ss:$8 sm:$0xf]  ;;  %v3268_v46 = vmul.f32 %v3252_v41, %v3231_v6  ;;  %v3077_v6 = vperm.slane %v6979_v13, 0 }
 0x470   :  { %8796 = vst [vmem:[#allocation42_spill] sm:$0xff] %v6954_v2  ;;  %v3337_v55 = vmul.f32 %v3321_v43, %v3300_v39  ;;  %v4540_v43 = vld [vmem:[%s8170_s1 + $0x41] ss:$8 sm:$0xf]  ;;  %v6994_v41 = vor.u32 %v4543_v16, %v4542_v5 }
 0x471   :  { %8797 = vst [vmem:[#allocation76_spill] sm:$0xff] %v6956_v26  ;;  %v7002_v19 = vor.u32 %v4541_v35, %v4540_v43  ;;  %v3003_v43 = vsel %vm777_vm12, %v6800_v24, %v6888_v17  ;;  %v3093_v35 = vmul.f32 %v3077_v6, %v3072_v8  ;;  %v4529_v63 = vld [vmem:[%s8170_s1 + $0x3] ss:$8 sm:$0xf0] }
 0x472   :  { %4081 = vmatpush.msra.mxu2 %v3337_v55  ;;  %v3146_v55 = vperm.slane %v6970_v37, 0  ;;  %8801 = vst [vmem:[#allocation48_spill] sm:$0xff] %v6994_v41 }
 0x473   :  { %8804 = vst [vmem:[#allocation70_spill] sm:$0xff] %v7002_v19 }
 0x474   :  { %2635 = vrot.lane.b32.xlu2 %v6469_v56, %s8757_s3  ;;  %2980 = vrot.lane.b32.xlu1 %v6469_v56, %s4638_s17 }
 0x475   :  { %2706 = vrot.lane.b32.xlu0 %v6449_v23, %s4641_s15  ;;  %4082 = vmatpush.msra.mxu2 %v3268_v46  ;;  %v3008_v46 = vperm.slane %v6994_v41, 0 }
 0x476   :  { %v6996_v12 = vpop.permute.xlu2 %2695  ;;  %v3113_v39 = vpop.permute.xlu1 %3112 }
 0x477   :  { %8802 = vst [vmem:[#allocation87_spill] sm:$0xff] %v6996_v12  ;;  %v6999_v44 = vpop.permute.xlu0 %3220  ;;  %4083 = vmatpush.msra.mxu2 %v3199_v11  ;;  %v3141_v5 = vsel %vm8807_vm9, %v6829_v1, %v3113_v39  ;;  %v2934_v11 = vsel %vm706_vm14, %v6827_v54, %v6929_v57  ;;  %v2919_v1 = vsel %vm706_vm14, %v6929_v57, %v6880_v3  ;;  %v4569_v3 = vld [vmem:[%s8170_s1 + $0x87] ss:$8 sm:$0xf0] }
 0x478   :  { %8803 = vst [vmem:[#allocation65_spill] sm:$0xff] %v6999_v44  ;;  %v7007_v18 = vsel %vm8805_vm8, %v6746_v38, %v6999_v44  ;;  %v3162_v16 = vmul.f32 %v3146_v55, %v3141_v5  ;;  %v2939_v38 = vperm.slane %v7002_v19, 0  ;;  %v3147_v55 = vperm.slane %v6970_v37, 1  ;;  %v4566_v37 = vld [vmem:[%s8170_s1 + $0x86] ss:$8 sm:$0xf] }
 0x479   :  { %8806 = vst [vmem:[#allocation103_spill] sm:$0xff] %v7007_v18  ;;  %v3024_v5 = vmul.f32 %v3008_v46, %v3003_v43  ;;  %vm8813_vm8 = vcmask 449536   ;;  %v4528_v44 = vld [vmem:[%s8170_s1 + $0x3] ss:$8 sm:$0xf] }
 0x47a   :  { %4044 = vmatpush.msra.mxu3 %v3162_v16  ;;  %v2955_v24 = vmul.f32 %v2939_v38, %v2934_v11  ;;  %v4538_v38 = vld [vmem:[%s8170_s1 + $0x40] ss:$8 sm:$0xf]  ;;  %vm8814_vm9 = vmmov %vm8813_vm8 }
 0x47c   :  { %3295 = vrot.lane.b32.xlu2 %v6479_v34, %s4634_s25  ;;  %2911 = vrot.lane.b32.xlu1 %v6469_v56, %s4640_s14 }
 0x47d   :  { %3352 = vrot.lane.b32.xlu0 %v6459_v22, %s4643_s26  ;;  %4045 = vmatpush.msra.mxu3 %v3093_v35  ;;  %v3078_v22 = vperm.slane %v6979_v13, 1  ;;  %v4531_v13 = vld [vmem:[%s8170_s1 + $0x4] ss:$8 sm:$0xf0] }
 0x47e   :  { %v7029_v6 = vpop.permute.xlu2 %2700  ;;  %v7033_v16 = vpop.permute.xlu1 %3114 }
 0x47f   :  { %v7031_v8 = vpop.permute.xlu0 %2764  ;;  %v3126_v54 = vsel %vm8810_vm1, %v3113_v39, %v7033_v16  ;;  %4046 = vmatpush.msra.mxu3 %v3024_v5  ;;  %v4574_v5 = vld [vmem:[%s8170_s1 + $0xc2] ss:$8 sm:$0xf]  ;;  %vm8826_vm1 = vmmov %vm8813_vm8 }
 0x480   :  { %8809 = vst [vmem:[#allocation53_spill] sm:$0xff] %v7031_v8  ;;  %v3163_v52 = vmul.f32 %v3147_v55, %v3126_v54  ;;  %v3009_v54 = vperm.slane %v6994_v41, 1  ;;  %v4530_v41 = vld [vmem:[%s8170_s1 + $0x4] ss:$8 sm:$0xf] }
 0x481   :  { %4047 = vmatpush.msra.mxu3 %v2955_v24 }
 0x482   :  { %4084 = vmatpush.msra.mxu2 %v3163_v52 }
 0x484   :  { %3425 = vrot.lane.b32.xlu2 %v6447_v21, %s4642_s16  ;;  %2773 = vrot.lane.b32.xlu1 %v6469_v56, %s4639_s22 }
 0x485   :  { %2566 = vrot.lane.b32.xlu0 %v6469_v56, %s8767_s11 }
 0x486   :  { %v7044_v46 = vpop.permute.xlu2 %2629  ;;  %v3046_v39 = vpop.permute.xlu1 %3045 }
 0x487   :  { %v7046_v43 = vpop.permute.xlu0 %2769  ;;  %v3057_v24 = vsel %vm8811_vm2, %v6855_v0, %v3046_v39  ;;  %v4539_v0 = vld [vmem:[%s8170_s1 + $0x40] ss:$8 sm:$0xf0] }
 0x488   :  { %v3094_v52 = vmul.f32 %v3078_v22, %v3057_v24  ;;  %v4575_v22 = vld [vmem:[%s8170_s1 + $0xc2] ss:$8 sm:$0xf0]  ;;  %v2940_v24 = vperm.slane %v7002_v19, 1 }
 0x489   :  { %v7084_v48 = vor.u32 %v4575_v22, %v4574_v5 }
 0x48a   :  { %4085 = vmatpush.msra.mxu2 %v3094_v52  ;;  %v7076_v52 = vor.u32 %v4539_v0, %v4538_v38  ;;  %v2956_v49 = vmul.f32 %v2940_v24, %v2919_v1 }
 0x48c   :  { %3226 = vrot.lane.b32.xlu2 %v6479_v34, %s4633_s24  ;;  %2775 = vrot.lane.b32.xlu1 %v6449_v23, %s4639_s22  ;;  %8812 = vst [vmem:[#allocation45_spill] sm:$0xff] %v7076_v52  ;;  %v2870_v38 = vperm.slane %v7076_v52, 0  ;;  %v2871_v0 = vperm.slane %v7076_v52, 1  ;;  %v4568_v52 = vld [vmem:[%s8170_s1 + $0x87] ss:$8 sm:$0xf] }
 0x48d   :  { %3356 = vrot.lane.b32.xlu0 %v6447_v21, %s4643_s26  ;;  %v7194_v32 = vor.u32 %v4569_v3, %v4568_v52 }
 0x48e   :  { %v7057_v35 = vpop.permute.xlu2 %2631  ;;  %v7067_v55 = vpop.permute.xlu1 %2976 }
 0x48f   :  { %v7065_v11 = vpop.permute.xlu0 %2698  ;;  %v2988_v45 = vsel %vm777_vm12, %v6888_v17, %v7067_v55  ;;  %v3782_v17 = vperm.slane %v7084_v48, 0  ;;  %8822 = vst [vmem:[#allocation30_spill] sm:$0xff] %v7194_v32 }
 0x490   :  { %v3025_v15 = vmul.f32 %v3009_v54, %v2988_v45  ;;  %v7217_v26 = vsel %vm493_vm13, %v6996_v12, %v7065_v11  ;;  %v3674_v12 = vperm.slane %v7194_v32, 0 }
 0x491   :  { %8824 = vst [vmem:[#allocation7_spill] sm:$0xff] %v7217_v26 }
 0x492   :  { %4086 = vmatpush.msra.mxu2 %v3025_v15 }
 0x494   :  { %2568 = vrot.lane.b32.xlu2 %v6449_v23, %s8767_s11  ;;  %3423 = vrot.lane.b32.xlu1 %v6467_v31, %s4642_s16 }
 0x495   :  { %3120 = vrot.lane.b32.xlu0 %v6449_v23, %s4635_s20  ;;  %4087 = vmatpush.msra.mxu2 %v2956_v49  ;;  %v4535_v49 = vld [vmem:[%s8170_s1 + $0x6] ss:$8 sm:$0xf0] }
 0x496   :  { %v7094_v57 = vpop.permute.xlu2 %2560  ;;  %v2837_v54 = vpop.permute.xlu1 %2836 }
 0x497   :  { %v7097_v45 = vpop.permute.xlu0 %2771  ;;  %v2850_v15 = vsel %vm8813_vm8, %v2837_v54, %v6925_v20  ;;  %v7103_v1 = vsel %vm8814_vm9, %v6954_v2, %v2837_v54  ;;  %v4532_v2 = vld [vmem:[%s8170_s1 + $0x5] ss:$8 sm:$0xf]  ;;  %vm8833_vm8 = vmmov %vm8826_vm1 }
 0x498   :  { %8815 = vst [vmem:[#allocation67_spill] sm:$0xff] %v7103_v1  ;;  %v2886_v5 = vmul.f32 %v2870_v38, %v7103_v1  ;;  %v2887_v22 = vmul.f32 %v2871_v0, %v2850_v15  ;;  %v3798_v24 = vmul.f32 %v3782_v17, %v2850_v15  ;;  %v7116_v38 = vor.u32 %v4535_v49, %v4534_v53  ;;  %v4536_v0 = vld [vmem:[%s8170_s1 + $0x7] ss:$8 sm:$0xf]  ;;  %vm8838_vm9 = vmmov %vm8817_vm7 }
 0x499   :  { %v4537_v17 = vld [vmem:[%s8170_s1 + $0x7] ss:$8 sm:$0xf0]  ;;  %v4572_v15 = vld [vmem:[%s8170_s1 + $0xc1] ss:$8 sm:$0xf]  ;;  %v7192_v18 = vor.u32 %v4533_v4, %v4532_v2  ;;  %v7208_v2 = vor.u32 %v4531_v13, %v4530_v41  ;;  %v2712_v13 = vsel %vm493_vm13, %v7065_v11, %v7029_v6 }
 0x49a   :  { %4048 = vmatpush.msra.mxu3 %v2886_v5  ;;  %4088 = vmatpush.msra.mxu2 %v2887_v22  ;;  %8816 = vst [vmem:[#allocation86_spill] sm:$0xff] %v7116_v38  ;;  %v4573_v53 = vld [vmem:[%s8170_s1 + $0xc1] ss:$8 sm:$0xf0]  ;;  %v2732_v19 = vperm.slane %v7116_v38, 0  ;;  %v2733_v47 = vperm.slane %v7116_v38, 1 }
 0x49b   :  { %4066 = vmatpush.msra.mxu1 %v3798_v24  ;;  %v4570_v24 = vld [vmem:[%s8170_s1 + $0xc0] ss:$8 sm:$0xf]  ;;  %v2664_v10 = vperm.slane %v7192_v18, 1  ;;  %v2595_v11 = vperm.slane %v7208_v2, 1 }
 0x49c   :  { %3051 = vrot.lane.b32.xlu2 %v6449_v23, %s4637_s28  ;;  %3224 = vrot.lane.b32.xlu1 %v6477_v59, %s4633_s24  ;;  %v4571_v49 = vld [vmem:[%s8170_s1 + $0xc0] ss:$8 sm:$0xf0] }
 0x49d   :  { %3122 = vrot.lane.b32.xlu0 %v6477_v59, %s4635_s20  ;;  %v7168_v21 = vor.u32 %v4571_v49, %v4570_v24  ;;  %v4564_v24 = vld [vmem:[%s8170_s1 + $0x85] ss:$8 sm:$0xf] }
 0x49e   :  { %v7126_v54 = vpop.permute.xlu2 %2562  ;;  %v7136_v22 = vpop.permute.xlu1 %3291  ;;  %v4565_v49 = vld [vmem:[%s8170_s1 + $0x85] ss:$8 sm:$0xf0] }
 0x49f   :  { %v7134_v5 = vpop.permute.xlu0 %3047  ;;  %8821 = vst [vmem:[#allocation90_spill] sm:$0xff] %v7168_v21  ;;  %v3710_v4 = vperm.slane %v7168_v21, 0  ;;  %v7225_v14 = vor.u32 %v4565_v49, %v4564_v24  ;;  %v2748_v24 = vmul.f32 %v2732_v19, %v7217_v26 }
 0x4a0   :  { %v7146_v1 = vsel %vm8817_vm7, %v3046_v39, %v7134_v5  ;;  %v7161_v39 = vor.u32 %v4537_v17, %v4536_v0  ;;  %v4567_v0 = vld [vmem:[%s8170_s1 + $0x86] ss:$8 sm:$0xf0]  ;;  %vm8843_vm7 = vmmov %vm8826_vm1 }
 0x4a1   :  { %8818 = vst [vmem:[#allocation43_spill] sm:$0xff] %v7146_v1  ;;  %v7163_v1 = vor.u32 %v4573_v53, %v4572_v15  ;;  %v7210_v3 = vor.u32 %v4567_v0, %v4566_v37  ;;  %v7231_v0 = vor.u32 %v4529_v63, %v4528_v44  ;;  %v3726_v49 = vmul.f32 %v3710_v4, %v2712_v13 }
 0x4a2   :  { %8819 = vst [vmem:[#allocation112_spill] sm:$0xff] %v7161_v39  ;;  %v2801_v17 = vperm.slane %v7161_v39, 0  ;;  %v2802_v15 = vperm.slane %v7161_v39, 1  ;;  %v2749_v63 = vmul.f32 %v2733_v47, %v2712_v13  ;;  %v2574_v44 = vsel %vm351_vm4, %v7094_v57, %v7126_v54 }
 0x4a3   :  { %8820 = vst [vmem:[#allocation110_spill] sm:$0xff] %v7163_v1  ;;  %v3746_v53 = vperm.slane %v7163_v1, 0  ;;  %v2526_v19 = vperm.slane %v7231_v0, 1  ;;  %v2457_v47 = vperm.slane %v6732_v50, 1  ;;  %v3566_v4 = vperm.slane %v6734_v40, 0 }
 0x4a4   :  { %3053 = vrot.lane.b32.xlu2 %v6477_v59, %s4637_s28  ;;  %3354 = vrot.lane.b32.xlu1 %v6467_v31, %s4643_s26  ;;  %8823 = vst [vmem:[#allocation114_spill] sm:$0xff] %v7210_v3 }
 0x4a5   :  { %2913 = vrot.lane.b32.xlu0 %v6449_v23, %s4640_s14 }
 0x4a6   :  { %v7198_v39 = vpop.permute.xlu2 %2491  ;;  %v2768_v31 = vpop.permute.xlu1 %2767 }
 0x4a7   :  { %v7212_v52 = vpop.permute.xlu0 %2702  ;;  %v2781_v58 = vsel %vm564_vm11, %v2768_v31, %v7046_v43  ;;  %v7223_v38 = vsel %vm564_vm11, %v7031_v8, %v2768_v31  ;;  %v2643_v31 = vsel %vm422_vm5, %v7044_v46, %v7057_v35 }
 0x4a8   :  { %8825 = vst [vmem:[#allocation81_spill] sm:$0xff] %v7223_v38  ;;  %v2817_v37 = vmul.f32 %v2801_v17, %v7223_v38  ;;  %v2818_v41 = vmul.f32 %v2802_v15, %v2781_v58  ;;  %v3762_v51 = vmul.f32 %v3746_v53, %v2781_v58  ;;  %v3638_v17 = vperm.slane %v7210_v3, 0 }
 0x4a9   :  { %v3602_v58 = vperm.slane %v7225_v14, 0  ;;  %v3783_v15 = vperm.slane %v7084_v48, 1  ;;  %v3690_v53 = vmul.f32 %v3674_v12, %v2643_v31  ;;  %v2680_v13 = vmul.f32 %v2664_v10, %v2643_v31 }
 0x4aa   :  { %4049 = vmatpush.msra.mxu3 %v2817_v37  ;;  %4089 = vmatpush.msra.mxu2 %v2818_v41  ;;  %v3654_v12 = vmul.f32 %v3638_v17, %v2574_v44  ;;  %v3747_v31 = vperm.slane %v7163_v1, 1  ;;  %v3530_v17 = vperm.slane %v6577_v33, 0 }
 0x4ab   :  { %4067 = vmatpush.msra.mxu1 %v3762_v51 }
 0x4ac   :  { %3297 = vrot.lane.b32.xlu2 %v6451_v27, %s4634_s25  ;;  %4050 = vmatpush.msra.mxu3 %v2748_v24 }
 0x4ad   :  { %2846 = vrot.lane.b32.xlu0 %v6477_v59, %s4636_s21  ;;  %2637 = vrot.lane.b32.xlu1 %v6449_v23, %s8757_s3 }
 0x4ae   :  { %4068 = vmatpush.msra.mxu1 %v3726_v49  ;;  %v7253_v51 = vpop.permute.xlu2 %2493  ;;  %4090 = vmatpush.msra.mxu2 %v2749_v63  ;;  %v7262_v24 = vpop.permute.xlu1 %2840  ;;  %v2611_v63 = vmul.f32 %v2595_v11, %v2574_v44  ;;  %v2319_v11 = vperm.slane %v6625_v62, 1  ;;  %v3494_v44 = vperm.slane %v6579_v9, 0 }
 0x4af   :  { %v2505_v37 = vsel %vm280_vm3, %v7198_v39, %v7253_v51  ;;  %v7260_v41 = vpop.permute.xlu0 %2978  ;;  %v7272_v10 = vsel %vm8826_vm1, %v6925_v20, %v7262_v24  ;;  %v3711_v20 = vperm.slane %v7168_v21, 1  ;;  %vm8851_vm1 = vmmov %vm8838_vm9 }
 0x4b0   :  { %v3618_v26 = vmul.f32 %v3602_v58, %v2505_v37  ;;  %v7267_v49 = vsel %vm777_vm12, %v7067_v55, %v7260_v41  ;;  %4069 = vmatpush.msra.mxu1 %v3690_v53  ;;  %v2542_v38 = vmul.f32 %v2526_v19, %v2505_v37  ;;  %4091 = vmatpush.msra.mxu2 %v2680_v13  ;;  %v2388_v58 = vperm.slane %v6623_v36, 1 }
 0x4b1   :  { %v3799_v8 = vmul.f32 %v3783_v15, %v7272_v10  ;;  %v7280_v55 = vsel %vm564_vm11, %v7046_v43, %v7097_v45  ;;  %v3582_v19 = vmul.f32 %v3566_v4, %v6724_v29  ;;  %v7290_v15 = vsel %vm493_vm13, %v7029_v6, %v7212_v52 }
 0x4b2   :  { %4070 = vmatpush.msra.mxu1 %v3654_v12  ;;  %4092 = vmatpush.msra.mxu2 %v2611_v63  ;;  %v2298_v43 = vsel %vm68_vm0, %v6599_v42, %v6640_v61  ;;  %v3763_v53 = vmul.f32 %v3747_v31, %v7280_v55  ;;  %v3675_v4 = vperm.slane %v7194_v32, 1  ;;  %v3546_v6 = vmul.f32 %v3530_v17, %v6783_v25 }
 0x4b3   :  { %4106 = vmatpush.msra.mxu0 %v3799_v8  ;;  %v2473_v8 = vmul.f32 %v2457_v47, %v6724_v29  ;;  %v2404_v42 = vmul.f32 %v2388_v58, %v6783_v25  ;;  %v3727_v61 = vmul.f32 %v3711_v20, %v7290_v15  ;;  %v3510_v47 = vmul.f32 %v3494_v44, %v2298_v43 }
 0x4b4   :  { %4071 = vmatpush.msra.mxu1 %v3618_v26  ;;  %3228 = vrot.lane.b32.xlu2 %v6451_v27, %s4633_s24  ;;  %vm8827_vm0 = vcmask 7168   ;;  %v2335_v12 = vmul.f32 %v2319_v11, %v2298_v43  ;;  %v3639_v20 = vperm.slane %v7210_v3, 1  ;;  %v3603_v44 = vperm.slane %v7225_v14, 1 }
 0x4b5   :  { %4093 = vmatpush.msra.mxu2 %v2542_v38  ;;  %3427 = vrot.lane.b32.xlu0 %v6469_v56, %s4642_s16  ;;  %vm8831_vm2 = vmmov %vm8827_vm0 }
 0x4b6   :  { %2497 = vrot.lane.b32.xlu1 %v6469_v56, %s8776_s19  ;;  %4072 = vmatpush.msra.mxu1 %v3582_v19  ;;  %v7305_v26 = vpop.permute.xlu2 %2495  ;;  %v3117_v38 = vpop.permute.xlu1 %3116 }
 0x4b7   :  { %4094 = vmatpush.msra.mxu2 %v2473_v8  ;;  %4107 = vmatpush.msra.mxu0 %v3763_v53  ;;  %v7309_v29 = vpop.permute.xlu0 %2633  ;;  %v7318_v37 = vsel %vm8827_vm0, %v7033_v16, %v3117_v38  ;;  %v7359_v8 = vsel %vm280_vm3, %v7253_v51, %v7305_v26  ;;  %v3495_v51 = vperm.slane %v6579_v9, 1  ;;  %vm8859_vm0 = vcmask 1039360  }
 0x4b8   :  { %v7314_v13 = vsel %vm422_vm5, %v7057_v35, %v7309_v29  ;;  %4073 = vmatpush.msra.mxu1 %v3546_v6  ;;  %v2663_v35 = vperm.slane %v7192_v18, 0  ;;  %v3567_v6 = vperm.slane %v6734_v40, 1  ;;  %v3785_v40 = vperm.slane %v7084_v48, 3 }
 0x4b9   :  { %v3691_v25 = vmul.f32 %v3675_v4, %v7314_v13  ;;  %4095 = vmatpush.msra.mxu2 %v2404_v42  ;;  %4108 = vmatpush.msra.mxu0 %v3727_v61  ;;  %v3531_v61 = vperm.slane %v6577_v33, 1 }
 0x4ba   :  { %4074 = vmatpush.msra.mxu1 %v3510_v47  ;;  %v3619_v47 = vmul.f32 %v3603_v44, %v7359_v8 }
 0x4bb   :  { %4096 = vmatpush.msra.mxu2 %v2335_v12  ;;  %4109 = vmatpush.msra.mxu0 %v3691_v25  ;;  %v2594_v25 = vperm.slane %v7208_v2, 0 }
 0x4bc   :  { %2848 = vrot.lane.b32.xlu2 %v6479_v34, %s4636_s21 }
 0x4bd   :  { %3358 = vrot.lane.b32.xlu0 %v6469_v56, %s4643_s26 }
 0x4be   :  { %2499 = vrot.lane.b32.xlu1 %v6449_v23, %s8776_s19  ;;  %v7328_v16 = vpop.permute.xlu2 %2844  ;;  %v7332_v63 = vpop.permute.xlu1 %2626 }
 0x4bf   :  { %v7330_v31 = vpop.permute.xlu0 %2909  ;;  %8828 = vst [vmem:[#allocation119_spill] sm:$0xff] %v7332_v63  ;;  %v7337_v17 = vsel %vm422_vm5, %v7332_v63, %v7044_v46  ;;  %v4557_v63 = vld [vmem:[%s8170_s1 + $0x81] ss:$8 sm:$0xf0] }
 0x4c0   :  { %8829 = vst [vmem:[#allocation98_spill] sm:$0xff] %v7337_v17  ;;  %v2679_v58 = vmul.f32 %v2663_v35, %v7337_v17  ;;  %v3511_v35 = vmul.f32 %v3495_v51, %v6648_v30 }
 0x4c2   :  { %4051 = vmatpush.msra.mxu3 %v2679_v58 }
 0x4c4   :  { %2708 = vrot.lane.b32.xlu2 %v6477_v59, %s4641_s15 }
 0x4c5   :  { %2779 = vrot.lane.b32.xlu0 %v6479_v34, %s4639_s22 }
 0x4c6   :  { %2982 = vrot.lane.b32.xlu1 %v6449_v23, %s4638_s17  ;;  %v3294_v11 = vpop.permute.xlu2 %3293  ;;  %v7354_v43 = vpop.permute.xlu1 %3118 }
 0x4c7   :  { %v7350_v46 = vsel %vm1097_vm6, %v7136_v22, %v3294_v11  ;;  %v7352_v19 = vpop.permute.xlu0 %2564  ;;  %8830 = vst [vmem:[#allocation111_spill] sm:$0xff] %v7354_v43  ;;  %v7368_v4 = vsel %vm8831_vm2, %v3117_v38, %v7354_v43  ;;  %v3547_v38 = vmul.f32 %v3531_v61, %v6787_v60  ;;  %v2525_v61 = vperm.slane %v7231_v0, 0  ;;  %vm8862_vm2 = vmmov %vm8859_vm0 }
 0x4c8   :  { %v7364_v53 = vsel %vm351_vm4, %v7126_v54, %v7352_v19  ;;  %v3583_v54 = vmul.f32 %v3567_v6, %v6859_v28 }
 0x4c9   :  { %v3655_v42 = vmul.f32 %v3639_v20, %v7364_v53 }
 0x4cb   :  { %4110 = vmatpush.msra.mxu0 %v3655_v42 }
 0x4cc   :  { %3360 = vrot.lane.b32.xlu2 %v6449_v23, %s4643_s26 }
 0x4cd   :  { %2639 = vrot.lane.b32.xlu0 %v6477_v59, %s8757_s3  ;;  %4111 = vmatpush.msra.mxu0 %v3619_v47  ;;  %v2456_v47 = vperm.slane %v6732_v50, 0  ;;  %v3784_v50 = vperm.slane %v7084_v48, 2 }
 0x4ce   :  { %2984 = vrot.lane.b32.xlu1 %v6477_v59, %s4638_s17  ;;  %v7383_v33 = vpop.permute.xlu2 %2635  ;;  %v7387_v9 = vpop.permute.xlu1 %2557 }
 0x4cf   :  { %v2843_v12 = vpop.permute.xlu0 %2842  ;;  %4112 = vmatpush.msra.mxu0 %v3583_v54  ;;  %8832 = vst [vmem:[#allocation85_spill] sm:$0xff] %v7387_v9  ;;  %v7398_v20 = vsel %vm351_vm4, %v7387_v9, %v7094_v57  ;;  %v3640_v9 = vperm.slane %v7210_v3, 2 }
 0x4d0   :  { %v7391_v28 = vsel %vm8833_vm8, %v2843_v12, %v7328_v16  ;;  %8835 = vst [vmem:[#allocation66_spill] sm:$0xff] %v7398_v20  ;;  %v2610_v60 = vmul.f32 %v2594_v25, %v7398_v20  ;;  %v2472_v25 = vmul.f32 %v2456_v47, %v6835_v7  ;;  %v7510_v20 = vsel %vm422_vm5, %v7309_v29, %v7383_v33  ;;  %vm8871_vm8 = vmmov %vm8859_vm0 }
 0x4d1   :  { %8834 = vst [vmem:[#allocation39_spill] sm:$0xff] %v7391_v28  ;;  %v3801_v58 = vmul.f32 %v3785_v40, %v7391_v28  ;;  %4113 = vmatpush.msra.mxu0 %v3547_v38  ;;  %v2387_v40 = vperm.slane %v6623_v36, 0 }
 0x4d2   :  { %4052 = vmatpush.msra.mxu3 %v2610_v60 }
 0x4d3   :  { %4114 = vmatpush.msra.mxu0 %v3511_v35  ;;  %4186 = vmatpush.msrb.mxu2 %v3801_v58  ;;  %v2318_v35 = vperm.slane %v6625_v62, 0  ;;  %v8842_v58 = vld [vmem:[#allocation84_spill] sm:$0xff] }
 0x4d4   :  { %3055 = vrot.lane.b32.xlu2 %v6479_v34, %s4637_s28  ;;  %v2403_v60 = vmul.f32 %v2387_v40, %v8842_v58 }
 0x4d5   :  { %2570 = vrot.lane.b32.xlu0 %v6477_v59, %s8767_s11 }
 0x4d6   :  { %2915 = vrot.lane.b32.xlu1 %v6477_v59, %s4640_s14  ;;  %v7407_v30 = vpop.permute.xlu2 %3295  ;;  %v7415_v6 = vpop.permute.xlu1 %3049 }
 0x4d7   :  { %v7411_v57 = vsel %vm1097_vm6, %v3294_v11, %v7407_v30  ;;  %v7413_v44 = vpop.permute.xlu0 %2704  ;;  %8837 = vst [vmem:[#allocation100_spill] sm:$0xff] %v7415_v6  ;;  %v7420_v42 = vsel %vm8838_vm9, %v7134_v5, %v7415_v6  ;;  %v8872_v6 = vld [vmem:[#allocation96_spill] sm:$0xff]  ;;  %vm8873_vm9 = vcmask 719872  }
 0x4d8   :  { %8836 = vst [vmem:[#allocation115_spill] sm:$0xff] %v7411_v57 }
 0x4dc   :  { %2986 = vrot.lane.b32.xlu2 %v6479_v34, %s4638_s17 }
 0x4dd   :  { %2501 = vrot.lane.b32.xlu0 %v6477_v59, %s8776_s19 }
 0x4de   :  { %2777 = vrot.lane.b32.xlu1 %v6477_v59, %s4639_s22  ;;  %v7429_v11 = vpop.permute.xlu2 %3425  ;;  %v7434_v54 = vpop.permute.xlu1 %2488 }
 0x4df   :  { %v7432_v51 = vpop.permute.xlu0 %3421  ;;  %8840 = vst [vmem:[#allocation83_spill] sm:$0xff] %v7434_v54  ;;  %v7439_v5 = vsel %vm280_vm3, %v7434_v54, %v7198_v39  ;;  %v7451_v39 = vsel %vm8843_vm7, %v7262_v24, %v2843_v12  ;;  %v7470_v24 = vld [vmem:[%s8175_s6] sm:$0xff]  ;;  %vm8874_vm7 = vmmov %vm8873_vm9 }
 0x4e0   :  { %8839 = vst [vmem:[#allocation120_spill] sm:$0xff] %v7432_v51  ;;  %v2541_v38 = vmul.f32 %v2525_v61, %v7439_v5  ;;  %v8845_v61 = vld [vmem:[#allocation3_spill] sm:$0xff]  ;;  %v3800_v40 = vmul.f32 %v3784_v50, %v7451_v39  ;;  %4097 = vmatmul.f32.vlgmr.msra.gmra.mxu2 %v7470_v24  ;;  %v3748_v50 = vperm.slane %v7163_v1, 2 }
 0x4e1   :  { %8841 = vst [vmem:[#allocation102_spill] sm:$0xff] %v7439_v5  ;;  %v2334_v47 = vmul.f32 %v2318_v35, %v8845_v61  ;;  %v3712_v61 = vperm.slane %v7168_v21, 2 }
 0x4e2   :  { %4053 = vmatpush.msra.mxu3 %v2541_v38  ;;  %8846 = vst [vmem:[#allocation32_spill] sm:$0xff] %v7470_v24 }
 0x4e4   :  { %2917 = vrot.lane.b32.xlu2 %v6479_v34, %s4640_s14  ;;  %4054 = vmatpush.msra.mxu3 %v2472_v25 }
 0x4e5   :  { %2503 = vrot.lane.b32.xlu0 %v6479_v34, %s8776_s19 }
 0x4e6   :  { %3429 = vrot.lane.b32.xlu1 %v6449_v23, %s4642_s16  ;;  %v7457_v36 = vpop.permute.xlu2 %3226  ;;  %v7461_v7 = vpop.permute.xlu1 %2980  ;;  %4055 = vmatpush.msra.mxu3 %v2403_v60  ;;  %v3641_v23 = vperm.slane %v7210_v3, 3 }
 0x4e7   :  { %v7459_v62 = vpop.permute.xlu0 %2706 }
 0x4e8   :  { %8844 = vst [vmem:[#allocation11_spill] sm:$0xff] %v7459_v62  ;;  %4056 = vmatpush.msra.mxu3 %v2334_v47 }
 0x4e9   :  { %4057 = vmatmul.f32.vlgmr.msra.gmra.mxu3 %v7470_v24  ;;  %v8870_v24 = vld [vmem:[#allocation65_spill] sm:$0xff] }
 0x4ea   :  { %4146 = vmatpush.msrb.mxu3 %v3800_v40  ;;  %v7503_v40 = vsel %vm493_vm13, %v7212_v52, %v7413_v44  ;;  %v3749_v52 = vperm.slane %v7163_v1, 3 }
 0x4eb   :  { %v3728_v17 = vmul.f32 %v3712_v61, %v7503_v40 }
 0x4ec   :  { %3362 = vrot.lane.b32.xlu2 %v6477_v59, %s4643_s26 }
 0x4ed   :  { %3433 = vrot.lane.b32.xlu0 %v6479_v34, %s4642_s16 }
 0x4ee   :  { %3124 = vrot.lane.b32.xlu1 %v6479_v34, %s4635_s20  ;;  %v7477_v12 = vpop.permute.xlu2 %2568  ;;  %v7482_v25 = vpop.permute.xlu1 %2911 }
 0x4ef   :  { %8847 = vst [vmem:[#allocation25_spill] sm:$0xff] %v7477_v12  ;;  %v7480_v38 = vpop.permute.xlu0 %3352 }
 0x4f0   :  { %8848 = vst [vmem:[#allocation101_spill] sm:$0xff] %v7480_v38 }
 0x4f4   :  { %3435 = vrot.lane.b32.xlu2 %v6451_v27, %s4642_s16 }
 0x4f5   :  { %3366 = vrot.lane.b32.xlu0 %v6451_v27, %s4643_s26  ;;  %v3676_v27 = vperm.slane %v7194_v32, 2 }
 0x4f6   :  { %2710 = vrot.lane.b32.xlu1 %v6479_v34, %s4641_s15  ;;  %v7490_v35 = vpop.permute.xlu2 %3051  ;;  %v2774_v60 = vpop.permute.xlu1 %2773 }
 0x4f7   :  { %8849 = vst [vmem:[#allocation74_spill] sm:$0xff] %v7490_v35  ;;  %v7493_v58 = vpop.permute.xlu0 %2566  ;;  %v7498_v47 = vsel %vm564_vm11, %v7097_v45, %v2774_v60  ;;  %v3692_v54 = vmul.f32 %v3676_v27, %v7510_v20  ;;  %v4556_v27 = vld [vmem:[%s8170_s1 + $0x81] ss:$8 sm:$0xf] }
 0x4f8   :  { %v3764_v5 = vmul.f32 %v3748_v50, %v7498_v47  ;;  %v7517_v45 = vsel %vm351_vm4, %v7352_v19, %v7493_v58  ;;  %v3713_v50 = vperm.slane %v7168_v21, 3  ;;  %v7552_v21 = vor.u32 %v4557_v63, %v4556_v27 }
 0x4fa   :  { %4147 = vmatpush.msrb.mxu3 %v3764_v5 }
 0x4fc   :  { %4148 = vmatpush.msrb.mxu3 %v3728_v17  ;;  %v7544_v17 = vsel %vm493_vm13, %v7413_v44, %v7459_v62 }
 0x4fd   :  { %8854 = vst [vmem:[#allocation18_spill] sm:$0xff] %v7544_v17  ;;  %v3729_v1 = vmul.f32 %v3713_v50, %v7544_v17 }
 0x4fe   :  { %2641 = vrot.lane.b32.xlu1 %v6479_v34, %s8757_s3  ;;  %v7524_v29 = vpop.permute.xlu2 %3053  ;;  %v7533_v19 = vpop.permute.xlu1 %2775  ;;  %4149 = vmatpush.msrb.mxu3 %v3692_v54 }
 0x4ff   :  { %8850 = vst [vmem:[#allocation29_spill] sm:$0xff] %v7524_v29  ;;  %v7529_v5 = vsel %vm8851_vm1, %v7490_v35, %v7524_v29  ;;  %v7531_v61 = vpop.permute.xlu0 %3356  ;;  %v3656_v29 = vmul.f32 %v3640_v9, %v7517_v45  ;;  %v3458_v9 = vperm.slane %v7552_v21, 0  ;;  %vm8889_vm1 = vmmov %vm8859_vm0 }
 0x500   :  { %8852 = vst [vmem:[#allocation105_spill] sm:$0xff] %v7529_v5  ;;  %v7549_v5 = vsel %vm564_vm11, %v2774_v60, %v7533_v19  ;;  %v3459_v60 = vperm.slane %v7552_v21, 1 }
 0x501   :  { %8853 = vst [vmem:[#allocation9_spill] sm:$0xff] %v7533_v19  ;;  %v3765_v57 = vmul.f32 %v3749_v52, %v7549_v5  ;;  %4150 = vmatpush.msrb.mxu3 %v3656_v29  ;;  %v8867_v19 = vld [vmem:[#allocation76_spill] sm:$0xff] }
 0x502   :  { %8855 = vst [vmem:[#allocation8_spill] sm:$0xff] %v7549_v5 }
 0x503   :  { %4187 = vmatpush.msrb.mxu2 %v3765_v57 }
 0x505   :  { %4188 = vmatpush.msrb.mxu2 %v3729_v1 }
 0x506   :  { %2572 = vrot.lane.b32.xlu1 %v6479_v34, %s8767_s11  ;;  %v7557_v44 = vpop.permute.xlu2 %3297  ;;  %v3424_v52 = vpop.permute.xlu1 %3423 }
 0x507   :  { %8856 = vst [vmem:[#allocation31_spill] sm:$0xff] %v7557_v44  ;;  %v7564_v54 = vsel %vm1097_vm6, %v7407_v30, %v7557_v44  ;;  %v7566_v63 = vpop.permute.xlu0 %3120  ;;  %v3437_v1 = vsel %vm1239_vm15, %v7432_v51, %v3424_v52  ;;  %v3438_v57 = vsel %vm1239_vm15, %v3424_v52, %v7429_v11  ;;  %v4554_v52 = vld [vmem:[%s8170_s1 + $0x80] ss:$8 sm:$0xf] }
 0x508   :  { %8857 = vst [vmem:[#allocation104_spill] sm:$0xff] %v7564_v54  ;;  %v3474_v50 = vmul.f32 %v3458_v9, %v3437_v1  ;;  %v3475_v29 = vmul.f32 %v3459_v60, %v3438_v57  ;;  %v4555_v9 = vld [vmem:[%s8170_s1 + $0x80] ss:$8 sm:$0xf0] }
 0x509   :  { %v7596_v57 = vor.u32 %v4555_v9, %v4554_v52 }
 0x50a   :  { %4075 = vmatpush.msra.mxu1 %v3474_v50  ;;  %4115 = vmatpush.msra.mxu0 %v3475_v29 }
 0x50b   :  { %v3389_v50 = vperm.slane %v7596_v57, 0  ;;  %v3390_v29 = vperm.slane %v7596_v57, 1 }
 0x50e   :  { %3431 = vrot.lane.b32.xlu1 %v6477_v59, %s4642_s16  ;;  %v7574_v27 = vpop.permute.xlu2 %3228  ;;  %v7589_v60 = vpop.permute.xlu1 %3224 }
 0x50f   :  { %8858 = vst [vmem:[#allocation68_spill] sm:$0xff] %v7574_v27  ;;  %v7579_v30 = vsel %vm8859_vm0, %v7457_v36, %v7574_v27  ;;  %v7581_v44 = vpop.permute.xlu0 %3122  ;;  %v7594_v1 = vsel %vm8862_vm2, %v7589_v60, %v7457_v36  ;;  %v8865_v27 = vld [vmem:[#allocation17_spill] sm:$0xff]  ;;  %vm8894_vm0 = vcmask 449536  }
 0x510   :  { %8860 = vst [vmem:[#allocation19_spill] sm:$0xff] %v7579_v30  ;;  %v3322_v30 = vperm.slane %v8865_v27, 2  ;;  %v3323_v54 = vperm.slane %v8865_v27, 3  ;;  %vm8895_vm2 = vmmov %vm8894_vm0 }
 0x511   :  { %8861 = vst [vmem:[#allocation62_spill] sm:$0xff] %v7581_v44  ;;  %v8866_v44 = vld [vmem:[#allocation106_spill] sm:$0xff] }
 0x512   :  { %8863 = vst [vmem:[#allocation69_spill] sm:$0xff] %v7594_v1  ;;  %v3301_v36 = vsel %vm1097_vm6, %v8867_v19, %v8866_v44  ;;  %v3302_v52 = vsel %vm1097_vm6, %v8866_v44, %v7136_v22  ;;  %v8868_v1 = vld [vmem:[#allocation79_spill] sm:$0xff]  ;;  %v7621_v19 = vld [vmem:[%s8175_s6 + $0x8] sm:$0xff] }
 0x513   :  { %v3253_v62 = vperm.slane %v8868_v1, 2  ;;  %v3254_v17 = vperm.slane %v8868_v1, 3  ;;  %v3338_v44 = vmul.f32 %v3322_v30, %v3301_v36 }
 0x516   :  { %3364 = vrot.lane.b32.xlu1 %v6479_v34, %s4643_s26  ;;  %v3355_v59 = vpop.permute.xlu1 %3354 }
 0x517   :  { %v7602_v51 = vpop.permute.xlu0 %2913  ;;  %v3368_v9 = vsel %vm1168_vm10, %v7480_v38, %v3355_v59  ;;  %v3369_v34 = vsel %vm1168_vm10, %v3355_v59, %v7531_v61  ;;  %v3339_v38 = vmul.f32 %v3323_v54, %v3302_v52  ;;  %v4032_v59 = vld [vmem:[%s8176_s7] sm:$0xff] }
 0x518   :  { %8864 = vst [vmem:[#allocation107_spill] sm:$0xff] %v7602_v51  ;;  %v3405_v5 = vmul.f32 %v3389_v50, %v3368_v9  ;;  %v3406_v28 = vmul.f32 %v3390_v29, %v3369_v34  ;;  %v8869_v51 = vld [vmem:[#allocation52_spill] sm:$0xff]  ;;  %v3184_v50 = vperm.slane %v8872_v6, 2  ;;  %v3185_v34 = vperm.slane %v8872_v6, 3  ;;  %v8875_v29 = vld [vmem:[#allocation103_spill] sm:$0xff]  ;;  %v8877_v9 = vld [vmem:[#allocation58_spill] sm:$0xff] }
 0x519   :  { %v3233_v22 = vsel %vm8871_vm8, %v8870_v24, %v8869_v51  ;;  %v3269_v24 = vmul.f32 %v3253_v62, %v8875_v29  ;;  %v8876_v54 = vld [vmem:[#allocation75_spill] sm:$0xff]  ;;  %v3079_v35 = vperm.slane %v8877_v9, 2  ;;  %v8878_v62 = vld [vmem:[#allocation28_spill] sm:$0xff]  ;;  %vm8896_vm8 = vmmov %vm8874_vm7 }
 0x51a   :  { %4076 = vmatpush.msra.mxu1 %v3405_v5  ;;  %4116 = vmatpush.msra.mxu0 %v3406_v28  ;;  %v3270_v30 = vmul.f32 %v3254_v17, %v3233_v22  ;;  %v3148_v5 = vperm.slane %v8876_v54, 2  ;;  %v3677_v28 = vperm.slane %v7194_v32, 3  ;;  %v3149_v36 = vperm.slane %v8876_v54, 3  ;;  %v8879_v29 = vld [vmem:[#allocation48_spill] sm:$0xff]  ;;  %v8881_v32 = vld [vmem:[#allocation70_spill] sm:$0xff] }
 0x51b   :  { %4576 = vmatmul.msk.f32.vlgmr.msra.gmra.mxu1 %vm8873_vm9, %v7621_v19  ;;  %4577 = vmatmul.msk.f32.vlgmr.msra.gmra.mxu0 %vm8874_vm7, %v7621_v19  ;;  %v3200_v17 = vmul.f32 %v3184_v50, %v8878_v62  ;;  %v3080_v22 = vperm.slane %v8877_v9, 3  ;;  %v3011_v3 = vperm.slane %v8879_v29, 3  ;;  %v2941_v9 = vperm.slane %v8881_v32, 2 }
 0x51c   :  { %4121 = vmatpush.msrb.mxu1 %v3338_v44  ;;  %4161 = vmatpush.msrb.mxu0 %v3339_v38  ;;  %v7650_v38 = vsel %vm351_vm4, %v7493_v58, %v7477_v12  ;;  %v3165_v62 = vmul.f32 %v3149_v36, %v7368_v4  ;;  %v8880_v58 = vld [vmem:[#allocation43_spill] sm:$0xff]  ;;  %v8882_v4 = vld [vmem:[#allocation56_spill] sm:$0xff]  ;;  %vm8899_vm9 = vcmask 7168   ;;  %vm8907_vm7 = vcmask 56320  }
 0x51d   :  { %v3095_v12 = vmul.f32 %v3079_v35, %v8880_v58  ;;  %v3096_v35 = vmul.f32 %v3080_v22, %v7420_v42  ;;  %v8884_v22 = vld [vmem:[#allocation112_spill] sm:$0xff] }
 0x51e   :  { %4035 = vperm.xlu1 %4603, %v4032_v59   ;;  %4122 = vmatpush.msrb.mxu1 %v3269_v24  ;;  %v3201_v59 = vmul.f32 %v3185_v34, %v6469_v56  ;;  %v3010_v24 = vperm.slane %v8879_v29, 2  ;;  %v2990_v56 = vsel %vm777_vm12, %v7260_v41, %v7461_v7  ;;  %v2920_v34 = vsel %vm706_vm14, %v8882_v4, %v7330_v31  ;;  %v8883_v41 = vld [vmem:[#allocation45_spill] sm:$0xff] }
 0x51f   :  { %v7639_v52 = vpop.permute.xlu0 %2846  ;;  %4162 = vmatpush.msrb.mxu0 %v3270_v30  ;;  %v7643_v43 = vpop.permute.xlu1 %2637  ;;  %v3164_v30 = vmul.f32 %v3148_v5, %v7318_v37  ;;  %v4416_v37 = vld [vmem:[%s8177_s8] sm:$0xff]  ;;  %v2942_v5 = vperm.slane %v8881_v32, 3  ;;  %v2872_v36 = vperm.slane %v8883_v41, 2  ;;  %v2804_v58 = vperm.slane %v8884_v22, 3 }
 0x520   :  { %v7655_v44 = vsel %vm422_vm5, %v7383_v33, %v7643_v43  ;;  %4123 = vmatpush.msrb.mxu1 %v3200_v17  ;;  %v3657_v33 = vmul.f32 %v3641_v23, %v7650_v38  ;;  %v2921_v23 = vsel %vm706_vm14, %v7330_v31, %v7482_v25  ;;  %v3604_v17 = vperm.slane %v7225_v14, 2 }
 0x521   :  { %v3693_v50 = vmul.f32 %v3677_v28, %v7655_v44  ;;  %4163 = vmatpush.msrb.mxu0 %v3201_v59  ;;  %v3026_v28 = vmul.f32 %v3010_v24, %v7267_v49  ;;  %v2873_v59 = vperm.slane %v8883_v41, 3  ;;  %v2957_v49 = vmul.f32 %v2941_v9, %v2920_v34 }
 0x522   :  { %4124 = vmatpush.msrb.mxu1 %v3164_v30  ;;  %v3027_v30 = vmul.f32 %v3011_v3, %v2990_v56  ;;  %v2888_v3 = vmul.f32 %v2872_v36, %v7272_v10  ;;  %v2665_v34 = vperm.slane %v7192_v18, 2  ;;  %v2820_v10 = vmul.f32 %v2804_v58, %v7498_v47 }
 0x523   :  { %4189 = vmatpush.msrb.mxu2 %v3693_v50  ;;  %4164 = vmatpush.msrb.mxu0 %v3165_v62  ;;  %v2803_v50 = vperm.slane %v8884_v22, 2  ;;  %v2958_v62 = vmul.f32 %v2942_v5, %v2921_v23  ;;  %v2596_v5 = vperm.slane %v7208_v2, 2  ;;  %v2597_v23 = vperm.slane %v7208_v2, 3 }
 0x524   :  { %4125 = vmatpush.msrb.mxu1 %v3095_v12  ;;  %v8885_v12 = vld [vmem:[#allocation86_spill] sm:$0xff]  ;;  %v2527_v47 = vperm.slane %v7231_v0, 2 }
 0x525   :  { %4190 = vmatpush.msrb.mxu2 %v3657_v33  ;;  %4165 = vmatpush.msrb.mxu0 %v3096_v35  ;;  %v2734_v33 = vperm.slane %v8885_v12, 2  ;;  %v2735_v4 = vperm.slane %v8885_v12, 3  ;;  %v2819_v9 = vmul.f32 %v2803_v50, %v7280_v55  ;;  %v2666_v35 = vperm.slane %v7192_v18, 3 }
 0x526   :  { %4419 = vperm.xlu1 %4603, %v4416_v37   ;;  %4126 = vmatpush.msrb.mxu1 %v3026_v28  ;;  %v2889_v37 = vmul.f32 %v2873_v59, %v7451_v39  ;;  %v8886_v28 = vld [vmem:[#allocation33_spill] sm:$0xff]  ;;  %v3605_v55 = vperm.slane %v7225_v14, 3 }
 0x527   :  { %v7684_v42 = vpop.permute.xlu0 %3427  ;;  %4166 = vmatpush.msrb.mxu0 %v3027_v30  ;;  %v2750_v39 = vmul.f32 %v2734_v33, %v7290_v15  ;;  %v2751_v36 = vmul.f32 %v2735_v4, %v7503_v40  ;;  %v2681_v15 = vmul.f32 %v2665_v34, %v7314_v13  ;;  %v2682_v40 = vmul.f32 %v2666_v35, %v7510_v20  ;;  %v8887_v33 = vld [vmem:[#allocation99_spill] sm:$0xff]  ;;  %v8888_v4 = vld [vmem:[#allocation24_spill] sm:$0xff] }
 0x528   :  { %v2498_v24 = vpop.permute.xlu1 %2497  ;;  %4127 = vmatpush.msrb.mxu1 %v2957_v49  ;;  %v3439_v30 = vsel %vm1239_vm15, %v7429_v11, %v7684_v42  ;;  %v2528_v49 = vperm.slane %v7231_v0, 3  ;;  %v3324_v13 = vperm.slane %v8865_v27, 4  ;;  %v2612_v11 = vmul.f32 %v2596_v5, %v7364_v53 }
 0x529   :  { %v2507_v31 = vsel %vm280_vm3, %v7305_v26, %v2498_v24  ;;  %4167 = vmatpush.msrb.mxu0 %v2958_v62  ;;  %v4430_v26 = vld [vmem:[%s8178_s9] sm:$0xff]  ;;  %v3391_v62 = vperm.slane %v7596_v57, 2  ;;  %v3186_v35 = vperm.slane %v8872_v6, 4  ;;  %v3786_v5 = vperm.slane %v7084_v48, 4 }
 0x52a   :  { %v3620_v56 = vmul.f32 %v3604_v17, %v2507_v31  ;;  %4128 = vmatpush.msrb.mxu1 %v2888_v3  ;;  %v3460_v17 = vperm.slane %v7552_v21, 2  ;;  %v2544_v53 = vmul.f32 %v2528_v49, %v2507_v31  ;;  %v8902_v49 = vld [vmem:[#allocation58_spill] sm:$0xff] }
 0x52b   :  { %4168 = vmatpush.msrb.mxu0 %v2889_v37 }
 0x52c   :  { %4151 = vmatpush.msrb.mxu3 %v3620_v56  ;;  %4129 = vmatpush.msrb.mxu1 %v2819_v9  ;;  %v2613_v56 = vmul.f32 %v2597_v23, %v7517_v45  ;;  %v3476_v37 = vmul.f32 %v3460_v17, %v3439_v30  ;;  %v3255_v9 = vperm.slane %v8868_v1, 4  ;;  %v3234_v45 = vsel %vm8889_vm1, %v8869_v51, %v7589_v60  ;;  %v8892_v60 = vld [vmem:[#allocation46_spill] sm:$0xff]  ;;  %v8897_v17 = vld [vmem:[#allocation36_spill] sm:$0xff]  ;;  %v8900_v30 = vld [vmem:[#allocation93_spill] sm:$0xff] }
 0x52d   :  { %4169 = vmatpush.msrb.mxu0 %v2820_v10  ;;  %v8891_v10 = vld [vmem:[#allocation61_spill] sm:$0xff]  ;;  %v3787_v51 = vperm.slane %v7084_v48, 5  ;;  %vm8922_vm1 = vmmov %vm8894_vm0 }
 0x52e   :  { %4152 = vmatpush.msrb.mxu3 %v8886_v28  ;;  %4433 = vperm.xlu1 %4603, %v4430_v26   ;;  %v8890_v26 = vld [vmem:[#allocation73_spill] sm:$0xff]  ;;  %v8893_v28 = vld [vmem:[#allocation12_spill] sm:$0xff] }
 0x52f   :  { %v7708_v59 = vpop.permute.xlu0 %3358  ;;  %4130 = vmatpush.msrb.mxu1 %v2750_v39  ;;  %4170 = vmatpush.msrb.mxu0 %v2751_v36  ;;  %v3271_v39 = vmul.f32 %v3255_v9, %v3234_v45  ;;  %v7756_v36 = vsel %vm8894_vm0, %v7328_v16, %v7639_v52  ;;  %v8909_v9 = vld [vmem:[#allocation32_spill] sm:$0xff]  ;;  %vm8933_vm0 = vmmov %vm8899_vm9 }
 0x530   :  { %v7715_v50 = vpop.permute.xlu1 %2499  ;;  %4153 = vmatpush.msrb.mxu3 %v8887_v33  ;;  %v3370_v3 = vsel %vm1168_vm10, %v7531_v61, %v7708_v59  ;;  %v3340_v61 = vmul.f32 %v3324_v13, %v7350_v46  ;;  %v7746_v46 = vpop.permute.xlu2 %2848  ;;  %v8903_v33 = vld [vmem:[#allocation16_spill] sm:$0xff]  ;;  %v8905_v13 = vld [vmem:[#allocation74_spill] sm:$0xff] }
 0x531   :  { %v7722_v58 = vsel %vm280_vm3, %v2498_v24, %v7715_v50  ;;  %4131 = vmatpush.msrb.mxu1 %v2681_v15  ;;  %4171 = vmatpush.msrb.mxu0 %v2682_v40  ;;  %v2543_v24 = vmul.f32 %v2527_v47, %v7359_v8  ;;  %v3407_v34 = vmul.f32 %v3391_v62, %v3370_v3  ;;  %v8898_v47 = vld [vmem:[#allocation111_spill] sm:$0xff]  ;;  %v8901_v40 = vld [vmem:[#allocation21_spill] sm:$0xff]  ;;  %v3081_v62 = vperm.slane %v8902_v49, 4 }
 0x532   :  { %v3621_v20 = vmul.f32 %v3605_v55, %v7722_v58  ;;  %4154 = vmatpush.msrb.mxu3 %v8888_v4  ;;  %v3150_v55 = vperm.slane %v8876_v54, 4  ;;  %v7761_v23 = vsel %vm8895_vm2, %v7639_v52, %v7746_v46  ;;  %v3129_v15 = vsel %vm8899_vm9, %v8898_v47, %v7566_v63  ;;  %v8904_v52 = vld [vmem:[#allocation88_spill] sm:$0xff] }
 0x533   :  { %4132 = vmatpush.msrb.mxu1 %v2612_v11  ;;  %4172 = vmatpush.msrb.mxu0 %v2613_v56  ;;  %v3202_v16 = vmul.f32 %v3186_v35, %v8901_v40  ;;  %v8906_v11 = vld [vmem:[#allocation100_spill] sm:$0xff]  ;;  %v3803_v56 = vmul.f32 %v3787_v51, %v7761_v23  ;;  %v8910_v35 = vld [vmem:[#allocation107_spill] sm:$0xff]  ;;  %v8913_v40 = vld [vmem:[#allocation18_spill] sm:$0xff] }
 0x534   :  { %4191 = vmatpush.msrb.mxu2 %v3621_v20  ;;  %4155 = vmatpush.msrb.mxu3 %v3476_v37  ;;  %v3060_v3 = vsel %vm8907_vm7, %v8906_v11, %v8905_v13  ;;  %v3802_v20 = vmul.f32 %v3786_v5, %v7756_v36  ;;  %v8908_v37 = vld [vmem:[#allocation54_spill] sm:$0xff]  ;;  %v3166_v4 = vmul.f32 %v3150_v55, %v3129_v15  ;;  %v8912_v47 = vld [vmem:[#allocation8_spill] sm:$0xff]  ;;  %v2529_v13 = vperm.slane %v7231_v0, 4 }
 0x535   :  { %4133 = vmatpush.msrb.mxu1 %v2543_v24  ;;  %4173 = vmatpush.msrb.mxu0 %v2544_v53  ;;  %v3012_v24 = vperm.slane %v8879_v29, 4 }
 0x536   :  { %4192 = vmatpush.msrb.mxu2 %v8890_v26  ;;  %4156 = vmatpush.msrb.mxu3 %v3407_v34  ;;  %v3097_v34 = vmul.f32 %v3081_v62, %v3060_v3  ;;  %v2598_v62 = vperm.slane %v7208_v2, 4  ;;  %v8914_v3 = vld [vmem:[#allocation110_spill] sm:$0xff] }
 0x537   :  { %v7740_v8 = vpop.permute.xlu0 %2779  ;;  %4134 = vmatpush.msrb.mxu1 %v8891_v10  ;;  %4174 = vmatpush.msrb.mxu0 %v8892_v60  ;;  %v2922_v10 = vsel %vm706_vm14, %v7482_v25, %v8910_v35 }
 0x538   :  { %4201 = vmatpush.msra.mxu3 %v3340_v61  ;;  %v7744_v31 = vpop.permute.xlu1 %2982  ;;  %4193 = vmatpush.msrb.mxu2 %v8893_v28  ;;  %v2943_v61 = vperm.slane %v8881_v32, 4  ;;  %v7796_v60 = vpop.permute.xlu2 %2708  ;;  %v8911_v28 = vld [vmem:[#allocation39_spill] sm:$0xff]  ;;  %v2614_v11 = vmul.f32 %v2598_v62, %v7650_v38 }
 0x539   :  { %4578 = vmatmul.msk.f32.vlgmr.msrb.gmra.mxu3 %vm8896_vm8, %v7621_v19  ;;  %4135 = vmatpush.msrb.mxu1 %v8897_v17  ;;  %v2991_v53 = vsel %vm777_vm12, %v7461_v7, %v7744_v31  ;;  %v2805_v7 = vperm.slane %v8884_v22, 4  ;;  %v2736_v17 = vperm.slane %v8885_v12, 4 }
 0x53a   :  { %4175 = vmatpush.msrb.mxu0 %v8900_v30  ;;  %4202 = vmatpush.msra.mxu3 %v3271_v39  ;;  %v2874_v39 = vperm.slane %v8883_v41, 4  ;;  %v3028_v5 = vmul.f32 %v3012_v24, %v2991_v53  ;;  %v2959_v51 = vmul.f32 %v2943_v61, %v2922_v10  ;;  %v2667_v30 = vperm.slane %v7192_v18, 4  ;;  %v8917_v10 = vld [vmem:[#allocation9_spill] sm:$0xff] }
 0x53b   :  { %4194 = vmatpush.msrb.mxu2 %v8903_v33  ;;  %4136 = vmatpush.msrb.mxu1 %v8904_v52  ;;  %v2821_v15 = vmul.f32 %v2805_v7, %v8912_v47  ;;  %v2545_v53 = vmul.f32 %v2529_v13, %v7722_v58  ;;  %v8919_v47 = vld [vmem:[#allocation114_spill] sm:$0xff]  ;;  %v3752_v13 = vperm.slane %v8914_v3, 6 }
 0x53c   :  { %4176 = vmatpush.msrb.mxu0 %v8908_v37  ;;  %4203 = vmatpush.msra.mxu3 %v3202_v16  ;;  %v2890_v55 = vmul.f32 %v2874_v39, %v8911_v28  ;;  %v2752_v16 = vmul.f32 %v2736_v17, %v8913_v40  ;;  %v2683_v52 = vmul.f32 %v2667_v30, %v7655_v44  ;;  %v8916_v44 = vld [vmem:[#allocation11_spill] sm:$0xff]  ;;  %v8920_v40 = vld [vmem:[#allocation117_spill] sm:$0xff] }
 0x53d   :  { %4137 = vmatmul.f32.vlgmr.msrb.gmra.mxu1 %v8909_v9  ;;  %4177 = vmatmul.f32.vlgmr.msrb.gmra.mxu0 %v8909_v9  ;;  %v7820_v61 = vsel %vm493_vm13, %v8916_v44, %v7796_v60 }
 0x53e   :  { %4226 = vmatpush.msra.mxu1 %v3802_v20  ;;  %4266 = vmatpush.msra.mxu0 %v3803_v56  ;;  %v3750_v20 = vperm.slane %v8914_v3, 4  ;;  %v3751_v56 = vperm.slane %v8914_v3, 5 }
 0x53f   :  { %4204 = vmatpush.msra.mxu3 %v3166_v4  ;;  %v7787_v45 = vpop.permute.xlu0 %2639  ;;  %v8915_v4 = vld [vmem:[#allocation90_spill] sm:$0xff] }
 0x540   :  { %v7789_v26 = vpop.permute.xlu1 %2984  ;;  %v7813_v37 = vpop.permute.xlu2 %3360  ;;  %v3714_v24 = vperm.slane %v8915_v4, 4  ;;  %v7836_v28 = vsel %vm422_vm5, %v7643_v43, %v7787_v45 }
 0x541   :  { %4205 = vmatpush.msra.mxu3 %v3097_v34 }
 0x542   :  { %v3730_v17 = vmul.f32 %v3714_v24, %v7820_v61  ;;  %v8925_v24 = vld [vmem:[#allocation53_spill] sm:$0xff] }
 0x543   :  { %4206 = vmatpush.msra.mxu3 %v3028_v5  ;;  %v8918_v5 = vld [vmem:[#allocation30_spill] sm:$0xff] }
 0x544   :  { %v3678_v7 = vperm.slane %v8918_v5, 4 }
 0x545   :  { %4207 = vmatpush.msra.mxu3 %v2959_v51 }
 0x547   :  { %4208 = vmatpush.msra.mxu3 %v2890_v55  ;;  %v7806_v33 = vpop.permute.xlu0 %2570  ;;  %v3788_v55 = vperm.slane %v7084_v48, 6 }
 0x548   :  { %v7802_v25 = vpop.permute.xlu1 %2915 }
 0x549   :  { %4209 = vmatpush.msra.mxu3 %v2821_v15  ;;  %v3642_v15 = vperm.slane %v8919_v47, 4 }
 0x54b   :  { %4210 = vmatpush.msra.mxu3 %v2752_v16  ;;  %v8921_v16 = vld [vmem:[#allocation42_spill] sm:$0xff] }
 0x54c   :  { %v7847_v62 = vsel %vm8922_vm1, %v7746_v46, %v8921_v16  ;;  %v7861_v46 = vsel %vm564_vm11, %v7740_v8, %v8925_v24 }
 0x54d   :  { %4211 = vmatpush.msra.mxu3 %v2683_v52  ;;  %v8923_v52 = vld [vmem:[#allocation25_spill] sm:$0xff]  ;;  %v3804_v44 = vmul.f32 %v3788_v55, %v7847_v62 }
 0x54e   :  { %v7852_v43 = vsel %vm351_vm4, %v8923_v52, %v7806_v33  ;;  %v3256_v52 = vperm.slane %v8868_v1, 5 }
 0x54f   :  { %4212 = vmatpush.msra.mxu3 %v2614_v11  ;;  %v7841_v30 = vpop.permute.xlu0 %2501  ;;  %v3694_v11 = vmul.f32 %v3678_v7, %v7836_v28  ;;  %v8926_v7 = vld [vmem:[#allocation38_spill] sm:$0xff] }
 0x550   :  { %v2778_v34 = vpop.permute.xlu1 %2777 }
 0x551   :  { %v7824_v38 = vsel %vm564_vm11, %v8917_v10, %v2778_v34  ;;  %v7828_v39 = vsel %vm564_vm11, %v2778_v34, %v7740_v8  ;;  %4213 = vmatpush.msra.mxu3 %v2545_v53  ;;  %v7866_v53 = vsel %vm280_vm3, %v7715_v50, %v7841_v30  ;;  %v3461_v34 = vperm.slane %v7552_v21, 3  ;;  %vm8929_vm11 = vmmov %vm8896_vm8 }
 0x552   :  { %v3766_v58 = vmul.f32 %v3750_v20, %v7824_v38  ;;  %v3767_v51 = vmul.f32 %v3751_v56, %v7828_v39  ;;  %v3606_v20 = vperm.slane %v7225_v14, 4  ;;  %v8924_v56 = vld [vmem:[#allocation14_spill] sm:$0xff]  ;;  %v3658_v10 = vmul.f32 %v3642_v15, %v7852_v43 }
 0x553   :  { %4214 = vmatpush.msra.mxu3 %v8920_v40  ;;  %v3392_v8 = vperm.slane %v7596_v57, 3  ;;  %v3371_v50 = vsel %vm1168_vm10, %v7708_v59, %v7813_v37  ;;  %v3325_v40 = vperm.slane %v8865_v27, 5 }
 0x554   :  { %4227 = vmatpush.msra.mxu1 %v3766_v58  ;;  %4267 = vmatpush.msra.mxu0 %v3767_v51  ;;  %v7874_v51 = vpop.permute.xlu2 %3055  ;;  %v3622_v55 = vmul.f32 %v3606_v20, %v7866_v53  ;;  %v3187_v20 = vperm.slane %v8872_v6, 5 }
 0x555   :  { %4215 = vmatpush.msra.mxu3 %v8924_v56  ;;  %v3408_v59 = vmul.f32 %v3392_v8, %v3371_v50  ;;  %v8934_v50 = vld [vmem:[#allocation122_spill] sm:$0xff] }
 0x556   :  { %4228 = vmatpush.msra.mxu1 %v3730_v17  ;;  %v3768_v17 = vmul.f32 %v3752_v13, %v7861_v46  ;;  %v8928_v13 = vld [vmem:[#allocation115_spill] sm:$0xff] }
 0x557   :  { %4216 = vmatpush.msra.mxu3 %v8926_v7  ;;  %v3341_v56 = vmul.f32 %v3325_v40, %v8928_v13  ;;  %v8932_v7 = vld [vmem:[#allocation62_spill] sm:$0xff]  ;;  %v8936_v13 = vld [vmem:[#allocation105_spill] sm:$0xff] }
 0x558   :  { %4229 = vmatpush.msra.mxu1 %v3694_v11  ;;  %v7872_v58 = vpop.permute.xlu1 %3429  ;;  %4217 = vmatmul.f32.vlgmr.msra.gmra.mxu3 %v8909_v9  ;;  %v8927_v11 = vld [vmem:[#allocation121_spill] sm:$0xff]  ;;  %v3130_v8 = vsel %vm8933_vm0, %v7566_v63, %v8932_v7  ;;  %v3716_v63 = vperm.slane %v8915_v4, 6 }
 0x559   :  { %4306 = vmatpush.msrb.mxu3 %v3804_v44  ;;  %v3440_v15 = vsel %vm1239_vm15, %v7684_v42, %v7872_v58  ;;  %v8930_v42 = vld [vmem:[#allocation27_spill] sm:$0xff]  ;;  %v8931_v44 = vld [vmem:[#allocation69_spill] sm:$0xff] }
 0x55a   :  { %4230 = vmatpush.msra.mxu1 %v3658_v10  ;;  %v3477_v16 = vmul.f32 %v3461_v34, %v3440_v15  ;;  %v3151_v34 = vperm.slane %v8876_v54, 5  ;;  %v3272_v10 = vmul.f32 %v3256_v52, %v8931_v44  ;;  %v8935_v15 = vld [vmem:[#allocation26_spill] sm:$0xff]  ;;  %v2992_v52 = vsel %vm777_vm12, %v7744_v31, %v7789_v26 }
 0x55b   :  { %4307 = vmatpush.msrb.mxu3 %v3768_v17  ;;  %v3082_v17 = vperm.slane %v8902_v49, 5  ;;  %v3203_v40 = vmul.f32 %v3187_v20, %v8935_v15  ;;  %v2923_v20 = vsel %vm706_vm14, %v8910_v35, %v7802_v25  ;;  %v2875_v44 = vperm.slane %v8883_v41, 5 }
 0x55c   :  { %4231 = vmatpush.msra.mxu1 %v3622_v55  ;;  %4195 = vmatpush.msrb.mxu2 %v3477_v16  ;;  %v7903_v55 = vpop.permute.xlu2 %2986  ;;  %v3167_v16 = vmul.f32 %v3151_v34, %v3130_v8  ;;  %v8937_v8 = vld [vmem:[#allocation87_spill] sm:$0xff]  ;;  %v2806_v35 = vperm.slane %v8884_v22, 5 }
 0x55e   :  { %4232 = vmatpush.msra.mxu1 %v8927_v11  ;;  %4196 = vmatpush.msrb.mxu2 %v3408_v59  ;;  %v3013_v59 = vperm.slane %v8879_v29, 5  ;;  %v3715_v11 = vperm.slane %v8915_v4, 5 }
 0x55f   :  { %4579 = vmatmul.msk.f32.vlgmr.msrb.gmra.mxu2 %vm8929_vm11, %v7621_v19 }
 0x560   :  { %4233 = vmatpush.msra.mxu1 %v8930_v42  ;;  %v7894_v24 = vpop.permute.xlu1 %3124  ;;  %4241 = vmatpush.msra.mxu2 %v3341_v56  ;;  %v3098_v56 = vmul.f32 %v3082_v17, %v8936_v13  ;;  %v2944_v42 = vperm.slane %v8881_v32, 5  ;;  %v3680_v13 = vperm.slane %v8918_v5, 6 }
 0x562   :  { %4234 = vmatpush.msra.mxu1 %v8934_v50  ;;  %4242 = vmatpush.msra.mxu2 %v3272_v10  ;;  %v3029_v10 = vmul.f32 %v3013_v59, %v2992_v52  ;;  %v2891_v59 = vmul.f32 %v2875_v44, %v7756_v36  ;;  %v3679_v52 = vperm.slane %v8918_v5, 5 }
 0x564   :  { %4243 = vmatpush.msra.mxu2 %v3203_v40  ;;  %v2960_v40 = vmul.f32 %v2944_v42, %v2923_v20  ;;  %v2599_v20 = vperm.slane %v7208_v2, 5 }
 0x566   :  { %4244 = vmatpush.msra.mxu2 %v3167_v16  ;;  %v2737_v16 = vperm.slane %v8885_v12, 5 }
 0x568   :  { %v2711_v34 = vpop.permute.xlu1 %2710  ;;  %4245 = vmatpush.msra.mxu2 %v3098_v56  ;;  %v2753_v42 = vmul.f32 %v2737_v16, %v7820_v61  ;;  %v2504_v61 = vpop.permute.xlu0 %2503 }
 0x569   :  { %v7920_v31 = vsel %vm493_vm13, %v7796_v60, %v2711_v34  ;;  %v7924_v50 = vsel %vm493_vm13, %v2711_v34, %v8937_v8  ;;  %v7931_v60 = vpop.permute.xlu2 %2917  ;;  %v8938_v34 = vld [vmem:[#allocation119_spill] sm:$0xff]  ;;  %vm8967_vm13 = vcmask 1039360  }
 0x56a   :  { %v3731_v17 = vmul.f32 %v3715_v11, %v7920_v31  ;;  %v3732_v15 = vmul.f32 %v3716_v63, %v7924_v50  ;;  %4246 = vmatpush.msra.mxu2 %v3029_v10  ;;  %v2668_v11 = vperm.slane %v7192_v18, 5  ;;  %v2822_v63 = vmul.f32 %v2806_v35, %v7824_v38 }
 0x56c   :  { %4268 = vmatpush.msra.mxu0 %v3731_v17  ;;  %4308 = vmatpush.msrb.mxu3 %v3732_v15  ;;  %v2684_v38 = vmul.f32 %v2668_v11, %v7836_v28  ;;  %v2530_v17 = vperm.slane %v7231_v0, 5  ;;  %v2615_v15 = vmul.f32 %v2599_v20, %v7852_v43  ;;  %v3607_v28 = vperm.slane %v7225_v14, 5  ;;  %v8939_v43 = vld [vmem:[#allocation83_spill] sm:$0xff] }
 0x56d   :  { %4247 = vmatpush.msra.mxu2 %v2960_v40  ;;  %v3644_v40 = vperm.slane %v8919_v47, 6  ;;  %v7965_v11 = vsel %vm280_vm3, %v2504_v61, %v8939_v43  ;;  %v3463_v43 = vperm.slane %v7552_v21, 5 }
 0x56e   :  { %v2546_v16 = vmul.f32 %v2530_v17, %v7866_v53  ;;  %v8940_v53 = vld [vmem:[#allocation85_spill] sm:$0xff] }
 0x56f   :  { %4248 = vmatpush.msra.mxu2 %v2891_v59  ;;  %v3608_v59 = vperm.slane %v7225_v14, 6 }
 0x570   :  { %v2642_v56 = vpop.permute.xlu1 %2641  ;;  %v3434_v17 = vpop.permute.xlu0 %3433 }
 0x571   :  { %4249 = vmatpush.msra.mxu2 %v2822_v63  ;;  %v7941_v36 = vsel %vm422_vm5, %v7787_v45, %v2642_v56  ;;  %v7945_v44 = vsel %vm422_vm5, %v2642_v56, %v8938_v34  ;;  %v3643_v45 = vperm.slane %v8919_v47, 5  ;;  %v7954_v35 = vpop.permute.xlu2 %3362  ;;  %v8941_v34 = vld [vmem:[#allocation82_spill] sm:$0xff]  ;;  %vm8964_vm5 = vmmov %vm8907_vm7 }
 0x572   :  { %v3695_v10 = vmul.f32 %v3679_v52, %v7941_v36  ;;  %v3696_v8 = vmul.f32 %v3680_v13, %v7945_v44  ;;  %v7961_v13 = vsel %vm280_vm3, %v7841_v30, %v2504_v61  ;;  %v3789_v30 = vperm.slane %v7084_v48, 7  ;;  %v8943_v48 = vld [vmem:[#allocation67_spill] sm:$0xff]  ;;  %vm8957_vm3 = vmmov %vm8896_vm8 }
 0x573   :  { %4250 = vmatpush.msra.mxu2 %v2753_v42  ;;  %v3462_v61 = vperm.slane %v7552_v21, 4  ;;  %vm8971_vm2 = vmmov %vm8957_vm3 }
 0x574   :  { %4269 = vmatpush.msra.mxu0 %v3695_v10  ;;  %4309 = vmatpush.msrb.mxu3 %v3696_v8  ;;  %v3753_v10 = vperm.slane %v8914_v3, 7  ;;  %v3623_v8 = vmul.f32 %v3607_v28, %v7961_v13  ;;  %v8945_v3 = vld [vmem:[#allocation81_spill] sm:$0xff]  ;;  %v3681_v28 = vperm.slane %v8918_v5, 7  ;;  %vm8981_vm8 = vmmov %vm8971_vm2 }
 0x575   :  { %4251 = vmatpush.msra.mxu2 %v2684_v38  ;;  %v3624_v38 = vmul.f32 %v3608_v59, %v7965_v11  ;;  %v3393_v59 = vperm.slane %v7596_v57, 4 }
 0x577   :  { %4252 = vmatpush.msra.mxu2 %v2615_v15  ;;  %v3717_v15 = vperm.slane %v8915_v4, 7  ;;  %v3372_v4 = vsel %vm1168_vm10, %v7813_v37, %v7954_v35 }
 0x578   :  { %v2573_v52 = vpop.permute.xlu1 %2572 }
 0x579   :  { %4253 = vmatpush.msra.mxu2 %v2546_v16  ;;  %v7969_v63 = vsel %vm351_vm4, %v7806_v33, %v2573_v52  ;;  %v7973_v56 = vsel %vm351_vm4, %v2573_v52, %v8940_v53  ;;  %v8942_v33 = vld [vmem:[#allocation92_spill] sm:$0xff]  ;;  %v3769_v16 = vmul.f32 %v3753_v10, %v8945_v3  ;;  %v8946_v52 = vld [vmem:[#allocation41_spill] sm:$0xff]  ;;  %vm8959_vm4 = vmmov %vm8933_vm0 }
 0x57a   :  { %v3659_v42 = vmul.f32 %v3643_v45, %v7969_v63  ;;  %v3660_v20 = vmul.f32 %v3644_v40, %v7973_v56  ;;  %v3805_v45 = vmul.f32 %v3789_v30, %v8943_v48  ;;  %v8944_v40 = vld [vmem:[#allocation94_spill] sm:$0xff]  ;;  %v3326_v48 = vperm.slane %v8865_v27, 6 }
 0x57b   :  { %4254 = vmatpush.msra.mxu2 %v8941_v34 }
 0x57c   :  { %4270 = vmatpush.msra.mxu0 %v3659_v42  ;;  %4310 = vmatpush.msrb.mxu3 %v3660_v20  ;;  %v7996_v42 = vpop.permute.xlu2 %3435  ;;  %v3464_v20 = vperm.slane %v7552_v21, 6 }
 0x57d   :  { %4255 = vmatpush.msra.mxu2 %v8942_v33  ;;  %v3443_v34 = vsel %vm1239_vm15, %v3434_v17, %v7996_v42  ;;  %v3645_v33 = vperm.slane %v8919_v47, 7  ;;  %v3394_v47 = vperm.slane %v7596_v57, 5 }
 0x57e   :  { %4271 = vmatpush.msra.mxu0 %v3623_v8  ;;  %4311 = vmatpush.msrb.mxu3 %v3624_v38  ;;  %v8948_v8 = vld [vmem:[#allocation71_spill] sm:$0xff] }
 0x57f   :  { %4256 = vmatpush.msra.mxu2 %v8944_v40  ;;  %v8949_v38 = vld [vmem:[#allocation7_spill] sm:$0xff]  ;;  %v3409_v40 = vmul.f32 %v3393_v59, %v3372_v4 }
 0x580   :  { %4257 = vmatmul.f32.vlgmr.msra.gmra.mxu2 %v8909_v9  ;;  %4272 = vmatpush.msra.mxu0 %v8946_v52  ;;  %v3432_v53 = vpop.permute.xlu1 %3431  ;;  %v8947_v9 = vld [vmem:[#allocation113_spill] sm:$0xff]  ;;  %v3733_v37 = vmul.f32 %v3717_v15, %v8949_v38  ;;  %v8951_v52 = vld [vmem:[#allocation63_spill] sm:$0xff]  ;;  %v3152_v38 = vperm.slane %v8876_v54, 6 }
 0x581   :  { %4346 = vmatpush.msrb.mxu2 %v3805_v45  ;;  %v3441_v5 = vsel %vm1239_vm15, %v7872_v58, %v3432_v53  ;;  %v3442_v30 = vsel %vm1239_vm15, %v3432_v53, %v3434_v17  ;;  %4312 = vmatpush.msrb.mxu3 %v8947_v9  ;;  %v8950_v45 = vld [vmem:[#allocation60_spill] sm:$0xff]  ;;  %v3609_v58 = vperm.slane %v7225_v14, 7  ;;  %v8952_v17 = vld [vmem:[#allocation98_spill] sm:$0xff]  ;;  %v3257_v53 = vperm.slane %v8868_v1, 6  ;;  %v8953_v15 = vld [vmem:[#allocation5_spill] sm:$0xff] }
 0x582   :  { %v3478_v10 = vmul.f32 %v3462_v61, %v3441_v5  ;;  %4273 = vmatpush.msra.mxu0 %v8948_v8  ;;  %v3479_v3 = vmul.f32 %v3463_v43, %v3442_v30  ;;  %v3697_v61 = vmul.f32 %v3681_v28, %v8952_v17  ;;  %v3480_v5 = vmul.f32 %v3464_v20, %v3443_v34  ;;  %v8954_v14 = vld [vmem:[#allocation66_spill] sm:$0xff]  ;;  %v8955_v43 = vld [vmem:[#allocation104_spill] sm:$0xff]  ;;  %v3367_v20 = vpop.permute.xlu0 %3366 }
 0x583   :  { %4347 = vmatpush.msrb.mxu2 %v3769_v16  ;;  %4313 = vmatpush.msrb.mxu3 %v8950_v45  ;;  %v3395_v16 = vperm.slane %v7596_v57, 6  ;;  %v3661_v59 = vmul.f32 %v3645_v33, %v8954_v14  ;;  %v3342_v4 = vmul.f32 %v3326_v48, %v8955_v43  ;;  %v3188_v28 = vperm.slane %v8872_v6, 6  ;;  %v8956_v30 = vld [vmem:[#allocation102_spill] sm:$0xff] }
 0x584   :  { %4235 = vmatpush.msra.mxu1 %v3478_v10  ;;  %4274 = vmatpush.msra.mxu0 %v8951_v52  ;;  %v3625_v9 = vmul.f32 %v3609_v58, %v8956_v30  ;;  %v8958_v10 = vld [vmem:[#allocation19_spill] sm:$0xff]  ;;  %v3327_v48 = vperm.slane %v8865_v27, 7  ;;  %v3131_v45 = vsel %vm8959_vm4, %v8932_v7, %v7894_v24  ;;  %v8963_v27 = vld [vmem:[#allocation29_spill] sm:$0xff]  ;;  %v8965_v7 = vld [vmem:[#allocation108_spill] sm:$0xff]  ;;  %v3014_v14 = vperm.slane %v8879_v29, 6 }
 0x585   :  { %4348 = vmatpush.msrb.mxu2 %v3733_v37  ;;  %4314 = vmatpush.msrb.mxu3 %v8953_v15  ;;  %v3273_v8 = vmul.f32 %v3257_v53, %v8958_v10  ;;  %v8961_v52 = vld [vmem:[#allocation31_spill] sm:$0xff]  ;;  %v8962_v53 = vld [vmem:[#allocation10_spill] sm:$0xff]  ;;  %v3062_v15 = vsel %vm8964_vm5, %v8963_v27, %v7874_v51  ;;  %v3168_v43 = vmul.f32 %v3152_v38, %v3131_v45  ;;  %v8969_v30 = vld [vmem:[#allocation120_spill] sm:$0xff]  ;;  %v2945_v10 = vperm.slane %v8881_v32, 6 }
 0x586   :  { %4236 = vmatpush.msra.mxu1 %v3409_v40  ;;  %4275 = vmatpush.msra.mxu0 %v3479_v3  ;;  %v8960_v3 = vld [vmem:[#allocation55_spill] sm:$0xff]  ;;  %v8972_v38 = vld [vmem:[#allocation13_spill] sm:$0xff] }
 0x587   :  { %4349 = vmatpush.msrb.mxu2 %v3697_v61  ;;  %4315 = vmatpush.msrb.mxu3 %v3480_v5  ;;  %v3315_v17 = vsel %vm1097_vm6, %v8961_v52, %v8960_v3  ;;  %v3083_v61 = vperm.slane %v8902_v49, 6  ;;  %v3258_v5 = vperm.slane %v8868_v1, 7  ;;  %v2993_v1 = vsel %vm777_vm12, %v7789_v26, %v7903_v55  ;;  %vm8970_vm6 = vmmov %vm8957_vm3  ;;  %v8976_v3 = vld [vmem:[#allocation77_spill] sm:$0xff] }
 0x588   :  { %4580 = vmatmul.msk.f32.vlgmr.msra.gmra.mxu1 %vm8957_vm3, %v7621_v19  ;;  %v3365_v34 = vpop.permute.xlu1 %3364  ;;  %v3030_v45 = vmul.f32 %v3014_v14, %v2993_v1  ;;  %v3084_v52 = vperm.slane %v8902_v49, 7  ;;  %v8980_v49 = vld [vmem:[#allocation89_spill] sm:$0xff]  ;;  %v2669_v14 = vperm.slane %v7192_v18, 6 }
 0x589   :  { %4350 = vmatpush.msrb.mxu2 %v3661_v59  ;;  %4281 = vmatpush.msrb.mxu1 %v3342_v4  ;;  %v3373_v37 = vsel %vm1168_vm10, %v7954_v35, %v3365_v34  ;;  %v3374_v33 = vsel %vm1168_vm10, %v3365_v34, %v3367_v20  ;;  %v3204_v35 = vmul.f32 %v3188_v28, %v8962_v53  ;;  %v3465_v59 = vperm.slane %v7552_v21, 7  ;;  %v8968_v4 = vld [vmem:[#allocation118_spill] sm:$0xff] }
 0x58a   :  { %v3410_v58 = vmul.f32 %v3394_v47, %v3373_v37  ;;  %v3411_v40 = vmul.f32 %v3395_v16, %v3374_v33  ;;  %v8966_v47 = vld [vmem:[#allocation68_spill] sm:$0xff]  ;;  %v3343_v28 = vmul.f32 %v3327_v48, %v3315_v17  ;;  %v3189_v34 = vperm.slane %v8872_v6, 7  ;;  %v8973_v33 = vld [vmem:[#allocation101_spill] sm:$0xff] }
 0x58b   :  { %4351 = vmatpush.msrb.mxu2 %v3625_v9  ;;  %4282 = vmatpush.msrb.mxu1 %v3273_v8  ;;  %v3246_v16 = vsel %vm8967_vm13, %v8966_v47, %v8965_v7  ;;  %v3453_v9 = vsel %vm1239_vm15, %v7996_v42, %v8969_v30  ;;  %v3099_v21 = vmul.f32 %v3083_v61, %v3062_v15  ;;  %v3396_v8 = vperm.slane %v7596_v57, 7  ;;  %vm8975_vm15 = vmmov %vm8933_vm0  ;;  %v8978_v17 = vld [vmem:[#allocation40_spill] sm:$0xff] }
 0x58c   :  { %4276 = vmatpush.msra.mxu0 %v3410_v58  ;;  %4316 = vmatpush.msrb.mxu3 %v3411_v40  ;;  %v3274_v26 = vmul.f32 %v3258_v5, %v3246_v16  ;;  %v2924_v42 = vsel %vm706_vm14, %v7802_v25, %v7931_v60  ;;  %v3153_v37 = vperm.slane %v8876_v54, 7  ;;  %v3384_v6 = vsel %vm1168_vm10, %v3367_v20, %v8973_v33  ;;  %v8974_v40 = vld [vmem:[#allocation116_spill] sm:$0xff]  ;;  %v8977_v25 = vld [vmem:[#allocation37_spill] sm:$0xff]  ;;  %vm8979_vm10 = vmmov %vm8964_vm5 }
 0x58d   :  { %4352 = vmatpush.msrb.mxu2 %v8968_v4  ;;  %4283 = vmatpush.msrb.mxu1 %v3204_v35  ;;  %v2876_v48 = vperm.slane %v8883_v41, 6  ;;  %v3481_v58 = vmul.f32 %v3465_v59, %v3453_v9  ;;  %v3132_v57 = vsel %vm8975_vm15, %v7894_v24, %v8974_v40  ;;  %v3205_v54 = vmul.f32 %v3189_v34, %v8977_v25  ;;  %v8988_v34 = vld [vmem:[#allocation49_spill] sm:$0xff] }
 0x58e   :  { %4581 = vmatmul.msk.f32.vlgmr.msra.gmra.mxu0 %vm8970_vm6, %v7621_v19  ;;  %4582 = vmatmul.msk.f32.vlgmr.msrb.gmra.mxu3 %vm8971_vm2, %v7621_v19  ;;  %v3063_v20 = vsel %vm8979_vm10, %v7874_v51, %v8978_v17  ;;  %v2961_v61 = vmul.f32 %v2945_v10, %v2924_v42  ;;  %v2807_v53 = vperm.slane %v8884_v22, 6  ;;  %v3412_v35 = vmul.f32 %v3396_v8, %v3384_v6  ;;  %v4098_v10 = vpop.f32.mrf.mxu2 }
 0x58f   :  { %4353 = vmatpush.msrb.mxu2 %v8972_v38  ;;  %4284 = vmatpush.msrb.mxu1 %v3168_v43  ;;  %v3015_v24 = vperm.slane %v8879_v29, 7  ;;  %v3169_v5 = vmul.f32 %v3153_v37, %v3132_v57  ;;  %v2892_v27 = vmul.f32 %v2876_v48, %v7761_v23  ;;  %v2994_v15 = vsel %vm777_vm12, %v7903_v55, %v8980_v49  ;;  %v8982_v29 = vld [vmem:[#allocation109_spill] sm:$0xff] }
 0x590   :  { %4321 = vmatpush.msrb.mxu0 %v3343_v28  ;;  %v2738_v7 = vperm.slane %v8885_v12, 6  ;;  %v3100_v51 = vmul.f32 %v3084_v52, %v3063_v20  ;;  %v2946_v47 = vperm.slane %v8881_v32, 7  ;;  %v2925_v16 = vsel %vm706_vm14, %v7931_v60, %v8982_v29 }
 0x591   :  { %4354 = vmatpush.msrb.mxu2 %v8976_v3  ;;  %4285 = vmatpush.msrb.mxu1 %v3099_v21  ;;  %v2823_v23 = vmul.f32 %v2807_v53, %v7828_v39  ;;  %v2877_v55 = vperm.slane %v8883_v41, 7  ;;  %v3031_v59 = vmul.f32 %v3015_v24, %v2994_v15  ;;  %v2600_v32 = vperm.slane %v7208_v2, 6  ;;  %v4058_v21 = vpop.f32.mrf.mxu3 }
 0x592   :  { %4322 = vmatpush.msrb.mxu0 %v3274_v26  ;;  %v2754_v43 = vmul.f32 %v2738_v7, %v7920_v31  ;;  %v2962_v4 = vmul.f32 %v2946_v47, %v2925_v16  ;;  %v2531_v60 = vperm.slane %v7231_v0, 6  ;;  %v2685_v39 = vmul.f32 %v2669_v14, %v7941_v36  ;;  %v4036_v26 = vpop.permute.xlu1 %4035 }
 0x593   :  { %4355 = vmatpush.msrb.mxu2 %v3481_v58  ;;  %4286 = vmatpush.msrb.mxu1 %v3030_v45  ;;  %v2893_v28 = vmul.f32 %v2877_v55, %v7847_v62  ;;  %v2739_v41 = vperm.slane %v8885_v12, 7  ;;  %v2616_v1 = vmul.f32 %v2600_v32, %v7969_v63  ;;  %v2670_v30 = vperm.slane %v7192_v18, 7  ;;  %v8983_v63 = vld [vmem:[#allocation64_spill] sm:$0xff]  ;;  %v8984_v18 = vld [vmem:[#allocation91_spill] sm:$0xff] }
 0x594   :  { %4323 = vmatpush.msrb.mxu0 %v3205_v54  ;;  %v2601_v36 = vperm.slane %v7208_v2, 7  ;;  %v2532_v12 = vperm.slane %v7231_v0, 7  ;;  %v4618_v2 = vld [vmem:[%s8175_s6] sm:$0xff]  ;;  %v4059_v6 = vadd.f32 %v4058_v21, %v4036_v26  ;;  %v4099_v48 = vadd.f32 %v4098_v10, %v4036_v26 }
 0x595   :  { %4356 = vmatpush.msrb.mxu2 %v3412_v35  ;;  %4287 = vmatpush.msrb.mxu1 %v2961_v61  ;;  %v2755_v9 = vmul.f32 %v2739_v41, %v7924_v50  ;;  %v2686_v62 = vmul.f32 %v2670_v30, %v7945_v44  ;;  %v8985_v50 = vld [vmem:[#allocation72_spill] sm:$0xff]  ;;  %v8986_v0 = vld [vmem:[#allocation95_spill] sm:$0xff]  ;;  %v8987_v44 = vld [vmem:[#allocation97_spill] sm:$0xff] }
 0x596   :  { %4324 = vmatpush.msrb.mxu0 %v3169_v5  ;;  %4583 = vmatmul.msk.f32.vlgmr.msrb.gmra.mxu2 %vm8981_vm8, %v7621_v19  ;;  %v2808_v19 = vperm.slane %v8884_v22, 7  ;;  %v2547_v22 = vmul.f32 %v2531_v60, %v7961_v13  ;;  %v2548_v13 = vmul.f32 %v2532_v12, %v7965_v11 }
 0x597   :  { %4288 = vmatpush.msrb.mxu1 %v2892_v27 }
 0x598   :  { %4325 = vmatpush.msrb.mxu0 %v3100_v51  ;;  %v2824_v31 = vmul.f32 %v2808_v19, %v7861_v46  ;;  %v2617_v46 = vmul.f32 %v2601_v36, %v7973_v56  ;;  %v4078_v56 = vpop.f32.mrf.mxu1  ;;  %v4118_v11 = vpop.f32.mrf.mxu0  ;;  %v8989_v19 = vld [vmem:[#allocation80_spill] sm:$0xff] }
 0x599   :  { %4289 = vmatpush.msrb.mxu1 %v2823_v23  ;;  %v4079_v40 = vadd.f32 %v4078_v56, %v4059_v6  ;;  %v4119_v57 = vadd.f32 %v4118_v11, %v4099_v48 }
 0x59a   :  { %4326 = vmatpush.msrb.mxu0 %v3031_v59 }
 0x59b   :  { %4290 = vmatpush.msrb.mxu1 %v2754_v43  ;;  %v4361_v17 = vadd.f32 %v4119_v57, %v4079_v40 }
 0x59c   :  { %4327 = vmatpush.msrb.mxu0 %v2962_v4 }
 0x59d   :  { %4291 = vmatpush.msrb.mxu1 %v2685_v39 }
 0x59e   :  { %4328 = vmatpush.msrb.mxu0 %v2893_v28 }
 0x59f   :  { %4292 = vmatpush.msrb.mxu1 %v2616_v1 }
 0x5a0   :  { %4329 = vmatpush.msrb.mxu0 %v2824_v31 }
 0x5a1   :  { %4293 = vmatpush.msrb.mxu1 %v2547_v22 }
 0x5a2   :  { %4330 = vmatpush.msrb.mxu0 %v2755_v9 }
 0x5a3   :  { %4294 = vmatpush.msrb.mxu1 %v8983_v63 }
 0x5a4   :  { %4331 = vmatpush.msrb.mxu0 %v2686_v62 }
 0x5a5   :  { %4295 = vmatpush.msrb.mxu1 %v8984_v18 }
 0x5a6   :  { %4332 = vmatpush.msrb.mxu0 %v2617_v46 }
 0x5a7   :  { %4296 = vmatpush.msrb.mxu1 %v8985_v50 }
 0x5a8   :  { %4333 = vmatpush.msrb.mxu0 %v2548_v13  ;;  %4297 = vmatmul.f32.vlgmr.msrb.gmra.mxu1 %v4618_v2 }
 0x5aa   :  { %4334 = vmatpush.msrb.mxu0 %v8986_v0 }
 0x5ac   :  { %4335 = vmatpush.msrb.mxu0 %v8987_v44 }
 0x5ae   :  { %4336 = vmatpush.msrb.mxu0 %v8988_v34 }
 0x5af   :  { %4337 = vmatmul.f32.vlgmr.msrb.gmra.mxu0 %v4618_v2 }
 0x5ba   :  { %v4138_v8 = vpop.f32.mrf.mxu1  ;;  %v4178_v42 = vpop.f32.mrf.mxu0 }
 0x5bb   :  { %v4139_v45 = vadd.f32 %v4138_v8, %v4036_v26  ;;  %v4179_v3 = vadd.f32 %v4178_v42, %v4036_v26 }
 0x5bc   :  { %v4158_v38 = vpop.f32.mrf.mxu3 }
 0x5bd   :  { %v4159_v52 = vadd.f32 %v4158_v38, %v4139_v45 }
 0x5bf   :  { %v4362_v35 = vadd.f32 %v4361_v17, %v4159_v52 }
 0x5db   :  { %v4218_v58 = vpop.f32.mrf.mxu3 }
 0x5dc   :  { %v4219_v20 = vadd.f32 %v4218_v58, %v4036_v26 }
 0x5e2   :  { %v4198_v37 = vpop.f32.mrf.mxu2 }
 0x5e3   :  { %v4199_v61 = vadd.f32 %v4198_v37, %v4179_v3  ;;  %v4420_v37 = vpop.permute.xlu1 %4419 }
 0x5e5   :  { %v4363_v15 = vadd.f32 %v4362_v35, %v4199_v61 }
 0x603   :  { %v4258_v25 = vpop.f32.mrf.mxu2 }
 0x604   :  { %v4259_v24 = vadd.f32 %v4258_v25, %v4036_v26 }
 0x605   :  { %v4238_v33 = vpop.f32.mrf.mxu1 }
 0x606   :  { %v4239_v5 = vadd.f32 %v4238_v33, %v4219_v20 }
 0x608   :  { %v4364_v51 = vadd.f32 %v4363_v15, %v4239_v5 }
 0x60b   :  { %v4278_v54 = vpop.f32.mrf.mxu0 }
 0x60c   :  { %v4279_v7 = vadd.f32 %v4278_v54, %v4259_v24  ;;  %v4434_v24 = vpop.permute.xlu1 %4433 }
 0x60e   :  { %v4365_v23 = vadd.f32 %v4364_v51, %v4279_v7 }
 0x611   :  { %v4318_v49 = vpop.f32.mrf.mxu3 }
 0x619   :  { %v4358_v16 = vpop.f32.mrf.mxu2 }
 0x625   :  { %v4298_v53 = vpop.f32.mrf.mxu1 }
 0x626   :  { %v4299_v27 = vadd.f32 %v4298_v53, %v4036_v26 }
 0x628   :  { %v4319_v47 = vadd.f32 %v4318_v49, %v4299_v27 }
 0x62a   :  { %v4366_v55 = vadd.f32 %v4365_v23, %v4319_v47 }
 0x62c   :  { %v4338_v29 = vpop.f32.mrf.mxu0 }
 0x62d   :  { %v4339_v14 = vadd.f32 %v4338_v29, %v4036_v26 }
 0x62f   :  { %v4359_v59 = vadd.f32 %v4358_v16, %v4339_v14 }
 0x631   :  { %v4367_v43 = vadd.f32 %v4366_v55, %v4359_v59  ;;  %v4619_v55 = vld [vmem:[%s8169_s0] sm:$0xff] }
 0x633   :  { %4368 = vadd.xlane.f32.xlu2 %v4367_v43  ;;  %v4620_v43 = vld [vmem:[%s8169_s0 + $0x8] sm:$0xff] }
 0x6a6   :  { %v4369_v32 = vpop.xlane.xlu2 %4368 }
 0x6a7   :  { %v4370_v4 = vmul.f32 %v4369_v32, %v8989_v19 }
 0x6a9   :  { %v4371_v60 = vsub.f32 %v4079_v40, %v4370_v4  ;;  %v4372_v39 = vsub.f32 %v4119_v57, %v4370_v4  ;;  %v4373_v28 = vsub.f32 %v4159_v52, %v4370_v4  ;;  %v4374_v41 = vsub.f32 %v4199_v61, %v4370_v4 }
 0x6aa   :  { %v4375_v30 = vsub.f32 %v4239_v5, %v4370_v4  ;;  %v4376_v36 = vsub.f32 %v4279_v7, %v4370_v4  ;;  %v4377_v63 = vsub.f32 %v4319_v47, %v4370_v4  ;;  %v4378_v13 = vsub.f32 %v4359_v59, %v4370_v4 }
 0x6ab   :  { %v4379_v1 = vmul.f32 %v4371_v60, %v4371_v60  ;;  %v4380_v31 = vmul.f32 %v4372_v39, %v4372_v39  ;;  %v4381_v22 = vmul.f32 %v4373_v28, %v4373_v28  ;;  %v4382_v12 = vmul.f32 %v4374_v41, %v4374_v41 }
 0x6ac   :  { %v4383_v46 = vmul.f32 %v4375_v30, %v4375_v30  ;;  %v4384_v50 = vmul.f32 %v4376_v36, %v4376_v36  ;;  %v4385_v0 = vmul.f32 %v4377_v63, %v4377_v63  ;;  %v4386_v34 = vmul.f32 %v4378_v13, %v4378_v13 }
 0x6ad   :  { %v4387_v9 = vadd.f32 %v4380_v31, %v4379_v1  ;;  %v4624_v31 = vld [vmem:[%s8169_s0 + $0x28] sm:$0xff] }
 0x6af   :  { %v4388_v62 = vadd.f32 %v4387_v9, %v4381_v22  ;;  %v4625_v22 = vld [vmem:[%s8169_s0 + $0x30] sm:$0xff] }
 0x6b1   :  { %v4389_v18 = vadd.f32 %v4388_v62, %v4382_v12 }
 0x6b3   :  { %v4390_v2 = vadd.f32 %v4389_v18, %v4383_v46 }
 0x6b5   :  { %v4391_v44 = vadd.f32 %v4390_v2, %v4384_v50 }
 0x6b7   :  { %v4392_v56 = vadd.f32 %v4391_v44, %v4385_v0 }
 0x6b9   :  { %v4393_v21 = vadd.f32 %v4392_v56, %v4386_v34 }
 0x6bb   :  { %4394 = vadd.xlane.f32.xlu0 %v4393_v21 }
 0x72e   :  { %v4395_v10 = vpop.xlane.xlu0 %4394 }
 0x72f   :  { %v4396_v11 = vmul.f32 %v4395_v10, %v8989_v19  ;;  %v4621_v19 = vld [vmem:[%s8169_s0 + $0x10] sm:$0xff] }
 0x731   :  { %v4397_v8 = vadd.f32 1e-05, %v4396_v11 }
 0x733   :  { %4609 = vrsqrt.f32 %v4397_v8  ;;  %vm4404_vm14 = vweird.f32 %v4397_v8 }
 0x739   :  { %v4610_v38 = vpop.eup %4609 }
 0x73a   :  { %v4399_v26 = vmul.f32 %v4610_v38, %v4397_v8  ;;  %vm4405_vm12 = vweird.f32 %v4610_v38 }
 0x73b   :  { %vm4406_vm9 = vmor %vm4404_vm14, %vm4405_vm12 }
 0x73c   :  { %v4400_v42 = vmul.f32 %v4610_v38, %v4399_v26 }
 0x73e   :  { %v4401_v33 = vmul.f32 0.5, %v4400_v42 }
 0x740   :  { %v4402_v6 = vsub.f32 1.5, %v4401_v33 }
 0x742   :  { %v4403_v48 = vmul.f32 %v4610_v38, %v4402_v6 }
 0x744   :  { %v4407_v45 = vsel %vm4406_vm9, %v4610_v38, %v4403_v48 }
 0x745   :  { %v4408_v58 = vmul.f32 %v4407_v45, %v4371_v60  ;;  %v4409_v40 = vmul.f32 %v4407_v45, %v4372_v39  ;;  %v4410_v57 = vmul.f32 %v4407_v45, %v4373_v28  ;;  %v4411_v3 = vmul.f32 %v4407_v45, %v4374_v41  ;;  %v4622_v39 = vld [vmem:[%s8169_s0 + $0x18] sm:$0xff]  ;;  %v4623_v41 = vld [vmem:[%s8169_s0 + $0x20] sm:$0xff] }
 0x746   :  { %v4412_v52 = vmul.f32 %v4407_v45, %v4375_v30  ;;  %v4413_v25 = vmul.f32 %v4407_v45, %v4376_v36  ;;  %v4414_v54 = vmul.f32 %v4407_v45, %v4377_v63  ;;  %v4415_v17 = vmul.f32 %v4407_v45, %v4378_v13  ;;  %v4626_v36 = vld [vmem:[%s8169_s0 + $0x38] sm:$0xff] }
 0x747   :  { %v4422_v20 = vmul.f32 %v4420_v37, %v4408_v58  ;;  %v4423_v61 = vmul.f32 %v4420_v37, %v4409_v40  ;;  %v4424_v53 = vmul.f32 %v4420_v37, %v4410_v57  ;;  %v4425_v35 = vmul.f32 %v4420_v37, %v4411_v3 }
 0x748   :  { %v4426_v5 = vmul.f32 %v4420_v37, %v4412_v52  ;;  %v4427_v27 = vmul.f32 %v4420_v37, %v4413_v25  ;;  %v4428_v49 = vmul.f32 %v4420_v37, %v4414_v54  ;;  %v4429_v15 = vmul.f32 %v4420_v37, %v4415_v17 }
 0x749   :  { %v4436_v7 = vadd.f32 %v4434_v24, %v4422_v20  ;;  %v4437_v51 = vadd.f32 %v4434_v24, %v4423_v61  ;;  %v4438_v47 = vadd.f32 %v4434_v24, %v4424_v53  ;;  %v4439_v29 = vadd.f32 %v4434_v24, %v4425_v35 }
 0x74a   :  { %v4440_v16 = vadd.f32 %v4434_v24, %v4426_v5  ;;  %v4441_v23 = vadd.f32 %v4434_v24, %v4427_v27  ;;  %v4442_v14 = vadd.f32 %v4434_v24, %v4428_v49  ;;  %v4443_v60 = vadd.f32 %v4434_v24, %v4429_v15 }
 0x74b   :  { %v4444_v59 = vadd.f32 %v4619_v55, %v4436_v7  ;;  %v4445_v32 = vadd.f32 %v4620_v43, %v4437_v51  ;;  %v4446_v4 = vadd.f32 %v4621_v19, %v4438_v47  ;;  %v4447_v28 = vadd.f32 %v4622_v39, %v4439_v29 }
 0x74c   :  { %v4448_v1 = vadd.f32 %v4623_v41, %v4440_v16  ;;  %v4449_v30 = vadd.f32 %v4624_v31, %v4441_v23  ;;  %v4450_v9 = vadd.f32 %v4625_v22, %v4442_v14  ;;  %v4451_v12 = vadd.f32 %v4626_v36, %v4443_v60 }
 0x74d   :  { %4452 = vst [vmem:[%s8179_s10] sm:$0xff] %v4444_v59 }
 0x74e   :  { %4453 = vst [vmem:[%s8179_s10 + $0x8] sm:$0xff] %v4445_v32 }
 0x74f   :  { %4454 = vst [vmem:[%s8179_s10 + $0x10] sm:$0xff] %v4446_v4 }
 0x750   :  { %4455 = vst [vmem:[%s8179_s10 + $0x18] sm:$0xff] %v4447_v28 }
 0x751   :  { %4456 = vst [vmem:[%s8179_s10 + $0x20] sm:$0xff] %v4448_v1 }
 0x752   :  { %4457 = vst [vmem:[%s8179_s10 + $0x28] sm:$0xff] %v4449_v30 }
 0x753   :  { %4458 = vst [vmem:[%s8179_s10 + $0x30] sm:$0xff] %v4450_v9 }
 0x754   :  { %4459 = vst [vmem:[%s8179_s10 + $0x38] sm:$0xff] %v4451_v12 }

</bundles_post_ra>
